<compile_context>
chip_gen: v6e
topology: v6e:2x2x1
jax: 0.10.0
libtpu: 0.0.40
codegen_flags: <defaults>
</compile_context>

<pallas_src>
import jax
import jax.numpy as jnp
from jax import lax
from jax.experimental import pallas as pl
from jax.experimental.pallas import tpu as pltpu


def _round_up(x, m):
    return (x + m - 1) // m * m


def _vq_kernel(x_ref, e_ref, e2_ref, idx_ref, m_sc, i_sc):
    """One (M-tile, K-tile) step of nearest-code search with online argmax."""
    k = pl.program_id(1)
    nk = pl.num_programs(1)
    tk = e_ref.shape[0]

    @pl.when(k == 0)
    def _():
        m_sc[...] = jnp.full_like(m_sc, -jnp.inf)
        i_sc[...] = jnp.zeros_like(i_sc)

    x = x_ref[...]                                    # (tm, D)
    e = e_ref[...]                                    # (tk, D)
    e2h = e2_ref[...]                                 # (1, tk) = 0.5*||e||^2, +inf for padded codes

    # score = x.e - 0.5*||e||^2 : same argmax as -(||x||^2 - 2 x.e + ||e||^2)
    # (per-row constant shift + positive rescale), so ||x||^2 and the factor 2
    # are dead work for the selection.
    xe = lax.dot_general(x, e, (((1,), (1,)), ((), ())),
                         preferred_element_type=jnp.float32)        # (tm, tk) on MXU
    s = xe - e2h                                                    # single VALU pass

    # Per-tile argmax, first-occurrence tie-break (torch.argmax semantics).
    local_max = jnp.max(s, axis=-1, keepdims=True)                  # (tm, 1)
    iota = lax.broadcasted_iota(jnp.int32, s.shape, 1)
    local_arg = jnp.min(jnp.where(s == local_max, iota, tk),
                        axis=-1, keepdims=True)                     # (tm, 1)

    # Online (running) argmax across K tiles.  Strict '>' keeps the earliest
    # tile on ties -> global first-occurrence semantics.  Padded codes score
    # -inf (or NaN) and thus never win.
    m_prev = m_sc[...]
    better = local_max > m_prev                                     # (tm, 1) bool
    m_sc[...] = jnp.where(better, local_max, m_prev)
    i_sc[...] = jnp.where(better, k * tk + local_arg, i_sc[...])

    @pl.when(k == nk - 1)
    def _():
        idx_ref[0, 0, :] = i_sc[:, 0]                               # lane-dense store


def _vq_pallas(flatten, embed, *, tm_cap=512, tk_cap=2048, score_dtype=None):
    """flatten: (M, D), embed: (K, D).  Returns nearest-code indices (M,) int32."""
    M, D = flatten.shape
    K, D2 = embed.shape
    assert D == D2

    # --- M tiling: big MXU-sized tiles, but keep gm >= 2 so the "parallel" M
    # axis can actually split across v7x's two TensorCores.
    tm = min(tm_cap, _round_up(M, 8))
    if M > 16 and _round_up(M, tm) <= tm:        # would be a single M tile -> split
        tm = _round_up((M + 1) // 2, 8)
    Mp = _round_up(M, tm)

    # --- K tiling: lane-align K; whole codebook resident when small (DMA'd once
    # thanks to the then-constant block index), otherwise large streamed chunks.
    Kp = _round_up(K, 128)
    if Kp <= tk_cap:
        tk = Kp
    else:
        tk = max(t for t in (1024, 512, 256, 128) if Kp % t == 0)
    gm, gk = Mp // tm, Kp // tk

    f32 = jnp.float32
    # 0.5*||e||^2 hoisted out of the kernel; +inf for padded codes -> score -inf.
    e2h = 0.5 * jnp.sum(embed.astype(f32) * embed.astype(f32), axis=1)
    e2h = jnp.pad(e2h, (0, Kp - K), constant_values=jnp.inf)[None, :].astype(f32)

    # No D padding (full-dim blocks); pad M / K only if strictly needed.
    x_in = flatten if Mp == M else jnp.pad(flatten, ((0, Mp - M), (0, 0)))
    e_in = embed if Kp == K else jnp.pad(embed, ((0, Kp - K), (0, 0)))
    if score_dtype is not None:
        x_in = x_in.astype(score_dtype)
        e_in = e_in.astype(score_dtype)

    # Codebook spec: triple-buffer only when it is actually streamed over K.
    if gk > 1:
        e_spec = pl.BlockSpec((tk, D), lambda i, k: (k, 0),
                              pipeline_mode=pl.Buffered(3))
    else:
        e_spec = pl.BlockSpec((tk, D), lambda i, k: (k, 0))

    # Derived VMEM budget (v7x has only 64 MiB physical VMEM).
    xbytes = x_in.dtype.itemsize
    ebytes = e_in.dtype.itemsize
    ebuf = 3 if gk > 1 else 2
    footprint = (2 * tm * D * xbytes          # x tile, double-buffered
                 + ebuf * tk * D * ebytes     # codebook tile buffers
                 + 2 * tk * 4                 # 0.5*||e||^2 tile buffers
                 + 2 * tm * 4                 # index output block buffers
                 + tm * 8                     # running max / argmax scratch
                 + 3 * tm * tk * 4)           # (tm, tk) score tile + temporaries
    vmem_limit_bytes = int(min(max(2 * footprint, 16 * 1024 * 1024),
                               64 * 1024 * 1024))

    idx = pl.pallas_call(
        _vq_kernel,
        out_shape=jax.ShapeDtypeStruct((gm, 1, tm), jnp.int32),     # lane-dense indices
        grid_spec=pltpu.PrefetchScalarGridSpec(
            num_scalar_prefetch=0,
            grid=(gm, gk),                                          # K (reduction) last
            in_specs=[
                pl.BlockSpec((tm, D), lambda i, k: (i, 0)),         # x tile (full D)
                e_spec,                                             # codebook K-tile
                pl.BlockSpec((1, tk), lambda i, k: (0, k)),         # 0.5*||e||^2 K-tile
            ],
            out_specs=pl.BlockSpec((1, 1, tm), lambda i, k: (i, 0, 0)),  # resident over k
            scratch_shapes=[
                pltpu.VMEM((tm, 1), jnp.float32),                   # running max score
                pltpu.VMEM((tm, 1), jnp.int32),                     # running argmax
            ],
        ),
        compiler_params=pltpu.CompilerParams(
            dimension_semantics=("parallel", "arbitrary"),          # M shardable on v7x
            vmem_limit_bytes=vmem_limit_bytes,
        ),
    )(x_in, e_in, e2h)

    return idx.reshape(Mp)[:M]


class VectorQuantizePallas:
    """JAX/Pallas equivalent of VectorQuantize (eval-mode forward)."""

    def __init__(self, dim, codebook_size, key, score_dtype=None):
        self.dim = dim
        self.codebook_size = codebook_size
        self.score_dtype = score_dtype
        # EuclideanCodebook.__init__: embed = torch.randn(codebook_size, dim)
        self.embed = jax.random.normal(key, (codebook_size, dim), jnp.float32)

    def __call__(self, x, svq_temp=None):
        # x: (B, N, D), channel_last=True, accept_image_fmap=False, heads=1
        # TODO(synk): Categorical temperature sampling (svq_temp) not implemented.
        assert svq_temp is None
        B, N, D = x.shape
        M = B * N
        flatten = x.reshape(M, D)

        # Kernel emits only indices; quantize = F.embedding(ind, embed) is an
        # XLA gather (no second MXU pass inside the kernel).
        idx_flat = _vq_pallas(flatten, self.embed, score_dtype=self.score_dtype)
        quantize = jnp.take(self.embed, idx_flat, axis=0).reshape(B, N, D)
        embed_ind = idx_flat.reshape(B, N)

        # Counts / perplexity in plain XLA from the indices.
        # TODO(synk): for very large M, replace the scatter-add with a sorted
        # segment_sum to keep the perplexity post-pass off the critical path.
        counts = jnp.zeros((self.codebook_size,), jnp.float32).at[idx_flat].add(1.0)
        avg_probs = counts / jnp.float32(M)
        perplexity = jnp.exp(-jnp.sum(avg_probs * jnp.log(avg_probs + 1e-10)))

        # Eval-mode loss dict (training branch not executed).
        vq_loss = {
            "loss": jnp.zeros((1,), jnp.float32),
            "commit_loss": 0.0,
            "orthogonal_reg_loss": 0.0,
        }
        return quantize, embed_ind, vq_loss, perplexity


def _check(vq, x):
    quantize, embed_ind, vq_loss, perplexity = vq(x)
    jax.block_until_ready((quantize, embed_ind, vq_loss["loss"], perplexity))

    B, N, D = x.shape
    K = vq.codebook_size
    flatten = x.reshape(-1, D).astype(jnp.float32)
    dist = -(jnp.sum(flatten ** 2, 1, keepdims=True)
             - 2.0 * flatten @ vq.embed.T
             + jnp.sum(vq.embed ** 2, 1, keepdims=True).T)            # (M, K)
    best_dist = jnp.max(dist, axis=-1)
    ind_flat = embed_ind.reshape(-1)
    chosen_dist = jnp.take_along_axis(dist, ind_flat[:, None], axis=-1)[:, 0]
    ref_ind = jnp.argmax(dist, axis=-1)

    assert bool(jnp.all((ind_flat >= 0) & (ind_flat < K)))
    # Selected code is (numerically) the nearest one.
    assert jnp.allclose(chosen_dist, best_dist, atol=1e-3)
    # Indices match the exact argmax except possibly on numerically tied codes.
    assert bool(jnp.all((ind_flat == ref_ind) | (jnp.abs(chosen_dist - best_dist) < 1e-3)))
    # quantize is the codebook gathered at the selected indices.
    assert jnp.allclose(quantize.reshape(-1, D), vq.embed[ind_flat], atol=1e-5)
    assert quantize.shape == (B, N, D) and embed_ind.shape == (B, N)
    assert bool(jnp.isfinite(perplexity))


if __name__ == "__main__":
    key = jax.random.PRNGKey(0)
    k_emb1, k_x1, k_emb2, k_x2 = jax.random.split(key, 4)

    # Case 1: small codebook -> whole codebook VMEM-resident (single K grid step),
    # M split into 2 tiles (gm >= 2 for megacore), D=32 left unpadded.
    B, N, D, K = 2, 200, 32, 320
    vq = VectorQuantizePallas(dim=D, codebook_size=K, key=k_emb1)
    x = jax.random.normal(k_x1, (B, N, D), jnp.float32)
    _check(vq, x)

    # Case 2: large codebook -> K streamed over the grid (online argmax across
    # K tiles, Buffered(3) codebook pipeline, K padded 3000 -> 3072 with +inf
    # sentinel on the padded codes).
    B2, N2, D2, K2 = 2, 100, 32, 3000
    vq2 = VectorQuantizePallas(dim=D2, codebook_size=K2, key=k_emb2)
    x2 = jax.random.normal(k_x2, (B2, N2, D2), jnp.float32)
    _check(vq2, x2)

    print("KERNEL_OK")
</pallas_src>

<mosaic_0001>
module attributes {stable_mosaic.version = 11 : i64} {
  func.func @_vq_kernel(%arg0: i32, %arg1: i32, %arg2: memref<200x32xf32, #tpu.memory_space<vmem>>, %arg3: memref<384x32xf32, #tpu.memory_space<vmem>>, %arg4: memref<1x384xf32, #tpu.memory_space<vmem>>, %arg5: memref<1x1x200xi32, #tpu.memory_space<vmem>>, %arg6: memref<200x1xf32, #tpu.memory_space<vmem>>, %arg7: memref<200x1xi32, #tpu.memory_space<vmem>>) attributes {dimension_semantics = [#tpu.dimension_semantics<parallel>, #tpu.dimension_semantics<arbitrary>], iteration_bounds = array<i64: 2, 1>, scalar_prefetch = 0 : i64, scratch_operands = 2 : i64, tpu.core_type = #tpu.core_type<tc>, window_params = [{transform_indices = @transform_0, window_bounds = array<i64: 200, 32>}, {transform_indices = @transform_1, window_bounds = array<i64: 384, 32>}, {transform_indices = @transform_2, window_bounds = array<i64: 1, 384>}, {transform_indices = @transform_3, window_bounds = array<i64: 1, 1, 200>}]} {
    %c0_i32 = arith.constant 0 : i32
    %0 = arith.cmpi eq, %arg1, %c0_i32 : i32
    %1 = arith.extui %0 : i1 to i32
    %c0_i32_0 = arith.constant 0 : i32
    %2 = arith.cmpi ne, %1, %c0_i32_0 : i32
    scf.if %2 {
      %cst_19 = arith.constant 0xFF800000 : f32
      %31 = vector.broadcast %cst_19 : f32 to vector<200x1xf32>
      %c0_20 = arith.constant 0 : index
      %c0_21 = arith.constant 0 : index
      %32 = vector.load %arg6[%c0_20, %c0_21] : memref<200x1xf32, #tpu.memory_space<vmem>>, vector<200x1xf32>
      tpu.vector_store %arg6[%c0_20, %c0_21], %31 {strides = array<i32>} : memref<200x1xf32, #tpu.memory_space<vmem>>, vector<200x1xf32>,
      %c0_i32_22 = arith.constant 0 : i32
      %33 = vector.broadcast %c0_i32_22 : i32 to vector<200x1xi32>
      %c0_23 = arith.constant 0 : index
      %c0_24 = arith.constant 0 : index
      %34 = vector.load %arg7[%c0_23, %c0_24] : memref<200x1xi32, #tpu.memory_space<vmem>>, vector<200x1xi32>
      tpu.vector_store %arg7[%c0_23, %c0_24], %33 {strides = array<i32>} : memref<200x1xi32, #tpu.memory_space<vmem>>, vector<200x1xi32>,
    } else {
    }
    %c0 = arith.constant 0 : index
    %c0_1 = arith.constant 0 : index
    %3 = vector.load %arg2[%c0, %c0_1] : memref<200x32xf32, #tpu.memory_space<vmem>>, vector<200x32xf32>
    %c0_2 = arith.constant 0 : index
    %c0_3 = arith.constant 0 : index
    %4 = vector.load %arg3[%c0_2, %c0_3] : memref<384x32xf32, #tpu.memory_space<vmem>>, vector<384x32xf32>
    %c0_4 = arith.constant 0 : index
    %c0_5 = arith.constant 0 : index
    %5 = vector.load %arg4[%c0_4, %c0_5] : memref<1x384xf32, #tpu.memory_space<vmem>>, vector<1x384xf32>
    %cst = arith.constant dense<0.000000e+00> : vector<200x384xf32>
    %6 = tpu.matmul %3, %4, %cst {dimension_numbers = #tpu.dot_dimension_numbers<[1], [1], [0], [0], [0, 0, 1, 0], [], []>} : vector<200x32xf32>, vector<384x32xf32>, vector<200x384xf32> -> vector<200x384xf32>
    %7 = vector.broadcast %5 : vector<1x384xf32> to vector<200x384xf32>
    %8 = arith.subf %6, %7 : vector<200x384xf32>
    %cst_6 = arith.constant dense<0xFF800000> : vector<200xf32>
    %9 = vector.multi_reduction <maximumf>, %8, %cst_6 [1] : vector<200x384xf32> to vector<200xf32>
    %10 = vector.shape_cast %9 : vector<200xf32> to vector<200x1xf32>
    %11 = tpu.iota {dimensions = array<i32: 1>} : vector<200x384xi32>
    %12 = vector.broadcast %10 : vector<200x1xf32> to vector<200x384xf32>
    %13 = arith.cmpf oeq, %8, %12 : vector<200x384xf32>
    %c384_i32 = arith.constant 384 : i32
    %14 = vector.broadcast %c384_i32 : i32 to vector<200x384xi32>
    %15 = arith.select %13, %11, %14 : vector<200x384xi1>, vector<200x384xi32>
    %cst_7 = arith.constant dense<2147483647> : vector<200xi32>
    %16 = vector.multi_reduction <minsi>, %15, %cst_7 [1] : vector<200x384xi32> to vector<200xi32>
    %17 = vector.shape_cast %16 : vector<200xi32> to vector<200x1xi32>
    %c0_8 = arith.constant 0 : index
    %c0_9 = arith.constant 0 : index
    %18 = vector.load %arg6[%c0_8, %c0_9] : memref<200x1xf32, #tpu.memory_space<vmem>>, vector<200x1xf32>
    %19 = arith.cmpf ogt, %10, %18 : vector<200x1xf32>
    %20 = arith.select %19, %10, %18 : vector<200x1xi1>, vector<200x1xf32>
    %c0_10 = arith.constant 0 : index
    %c0_11 = arith.constant 0 : index
    %21 = vector.load %arg6[%c0_10, %c0_11] : memref<200x1xf32, #tpu.memory_space<vmem>>, vector<200x1xf32>
    tpu.vector_store %arg6[%c0_10, %c0_11], %20 {strides = array<i32>} : memref<200x1xf32, #tpu.memory_space<vmem>>, vector<200x1xf32>,
    %c384_i32_12 = arith.constant 384 : i32
    %22 = arith.muli %arg1, %c384_i32_12 : i32
    %23 = vector.broadcast %22 : i32 to vector<200x1xi32>
    %24 = arith.addi %23, %17 : vector<200x1xi32>
    %c0_13 = arith.constant 0 : index
    %c0_14 = arith.constant 0 : index
    %25 = vector.load %arg7[%c0_13, %c0_14] : memref<200x1xi32, #tpu.memory_space<vmem>>, vector<200x1xi32>
    %26 = arith.select %19, %24, %25 : vector<200x1xi1>, vector<200x1xi32>
    %c0_15 = arith.constant 0 : index
    %c0_16 = arith.constant 0 : index
    %27 = vector.load %arg7[%c0_15, %c0_16] : memref<200x1xi32, #tpu.memory_space<vmem>>, vector<200x1xi32>
    tpu.vector_store %arg7[%c0_15, %c0_16], %26 {strides = array<i32>} : memref<200x1xi32, #tpu.memory_space<vmem>>, vector<200x1xi32>,
    %c0_i32_17 = arith.constant 0 : i32
    %28 = arith.cmpi eq, %arg1, %c0_i32_17 : i32
    %29 = arith.extui %28 : i1 to i32
    %c0_i32_18 = arith.constant 0 : i32
    %30 = arith.cmpi ne, %29, %c0_i32_18 : i32
    scf.if %30 {
      %c0_19 = arith.constant 0 : index
      %c0_20 = arith.constant 0 : index
      %31 = vector.load %arg7[%c0_19, %c0_20] : memref<200x1xi32, #tpu.memory_space<vmem>>, vector<200x1xi32>
      %32 = vector.shape_cast %31 : vector<200x1xi32> to vector<200xi32>
      %c0_21 = arith.constant 0 : index
      %c0_22 = arith.constant 0 : index
      %c0_23 = arith.constant 0 : index
      %33 = vector.load %arg5[%c0_21, %c0_22, %c0_23] : memref<1x1x200xi32, #tpu.memory_space<vmem>>, vector<1x1x200xi32>
      %34 = vector.shape_cast %33 : vector<1x1x200xi32> to vector<200xi32>
      %35 = vector.shape_cast %32 : vector<200xi32> to vector<1x1x200xi32>
      tpu.vector_store %arg5[%c0_21, %c0_22, %c0_23], %35 {strides = array<i32>} : memref<1x1x200xi32, #tpu.memory_space<vmem>>, vector<1x1x200xi32>,
    } else {
    }
    return
  }
  func.func @transform_0(%arg0: i32, %arg1: i32) -> (i32, i32) {
    %c0_i32 = arith.constant 0 : i32
    %c0_i32_0 = arith.constant 0 : i32
    return %arg0, %c0_i32 : i32, i32
  }
  func.func @transform_1(%arg0: i32, %arg1: i32) -> (i32, i32) {
    %c0_i32 = arith.constant 0 : i32
    %c0_i32_0 = arith.constant 0 : i32
    return %arg1, %c0_i32 : i32, i32
  }
  func.func @transform_2(%arg0: i32, %arg1: i32) -> (i32, i32) {
    %c0_i32 = arith.constant 0 : i32
    %c0_i32_0 = arith.constant 0 : i32
    return %c0_i32, %arg1 : i32, i32
  }
  func.func @transform_3(%arg0: i32, %arg1: i32) -> (i32, i32, i32) {
    %c0_i32 = arith.constant 0 : i32
    %c0_i32_0 = arith.constant 0 : i32
    %c0_i32_1 = arith.constant 0 : i32
    return %arg0, %c0_i32, %c0_i32_0 : i32, i32, i32
  }
}

</mosaic_0001>

<bundles_post_ra>
// kernel: tpu_custom_call.1
= control target key start
LH: loop header
LB: loop body
LE: loop exit
PB: predicated region body
PF: predicated region fallthrough
CT: control target
= control target key end

     0   :  { %8 = vsyncpa [#allocation5], 0  ;;  %s7664_s0 = inlined_call_operand.vmem [shape: f32[400,32], index: 0, kind: input, shape index: {}]   ;;  %s7665_s1 = inlined_call_operand.vmem [shape: f32[384,32], index: 1, kind: input, shape index: {}]   ;;  %s7666_s2 = inlined_call_operand.vmem [shape: f32[1,384], index: 2, kind: input, shape index: {}]   ;;  %s7667_s3 = inlined_call_operand.hbm [shape: s32[2,1,200], index: 3, kind: output, shape index: {}]  }
   0x1   :  { %10 = vsyncpa [#allocation5 + $0x1], 0  ;;  %s5395_s12 = smov 0   ;;  %s5397_s13 = smov 0  }
   0x2   :  { %s5399_s14 = smov 0   ;;  %s5401_s15 = smov 0  }
   0x3   :  { %s5403_s16 = smov 0   ;;  %s5405_s17 = smov 0  }
   0x4 LB: > { %s4811_s18 = sadd.s32 4294967295, %s5367_s17   ;;  %s4812_s19 = sadd.s32 4294967294, %s5367_s17   ;;  %s5367_s17 = sphi %s5405_s17, %s16_s17   ;;  %s5363_s16 = sphi %s5403_s16, %s7926_s16   ;;  %s5359_s15 = sphi %s5401_s15, %s7925_s15   ;;  %s5355_s14 = sphi %s5399_s14, %s7924_s14   ;;  %s5351_s13 = sphi %s5397_s13, %s7923_s13   ;;  %s5347_s12 = sphi %s5395_s12, %s7922_s12  }
   0x5   : > { %s28_s20 = sadd.s32 1, %s5363_s16  ;;  %s113_s21 = sadd.s32 1, %s5355_s14 }
   0x6   : > { %p30_p0 = scmp.ge.s32.totalorder %s28_s20, 2  ;;  %p123_p1 = scmp.ne.s32.totalorder %s5355_s14, %s5351_s13 }
   0x7   : > { %p124_p2 = scmp.eq.s32.totalorder %s4811_s18, 1  ;;  %p129_p3 = scmp.ne.s32.totalorder %s5351_s13, %s5347_s12 }
   0x8   : > { %s7928_s20 = smov (%p30_p0, %s28_s20), 0  ;;  %p130_p5 = scmp.eq.s32.totalorder %s4812_s19, 1 }
   0x9   : > { %p5435_p4 = por %p124_p2, %p123_p1  ;;  %s110_s23 = ssub.s32 %s5363_s16, %s7928_s20 }
   0xa   : > { %p4817_p6 = scmp.ge.s32.totalorder %s5367_s17, 1  ;;  %p111_p7 = scmp.eq.s32.totalorder %s110_s23, 0 }
   0xb   : > { %p5442_p8 = por %p130_p5, %p129_p3  ;;  %p174_p9 = scmp.lt.s32.totalorder %s5367_s17, 3 }
   0xc   : > { %s5448_s25 = scalar_select %p111_p7, %s5355_s14, %s113_s21  }
   0xd   : > { %p175_p10 = pnand %p4817_p6, %p174_p9 }
   0xf   : > { %178 = sbr.rel (%p175_p10) target bundleno = 1040 (0x410), region = 32 }
  0x14   : > { %v335_v0 = vld [vmem:[%s7665_s1 + $0xf8] sm:$0xff]  ;;  %vm353_vm0 = vcmask 261120   ;;  %s207_s5 = smul.u32 25, %s5359_s15  ;;  %v5369_v3 = vmov 0.0   ;;  %v334_v4 = vld [vmem:[%s7665_s1 + $0xf0] sm:$0xff]  ;;  %v333_v7 = vld [vmem:[%s7665_s1 + $0xe8] sm:$0xff] }
  0x15   : > { %v319_v1 = vld [vmem:[%s7665_s1 + $0x78] sm:$0xff]  ;;  %4974 = vmatprep.subr.msk.mxu0 %vm353_vm0, %v335_v0  ;;  %5097 = vmatprep.subr.mxu1 %v5369_v3  ;;  %v318_v5 = vld [vmem:[%s7665_s1 + $0x70] sm:$0xff]  ;;  %vm5370_vm1 = vmmov 0   ;;  %v317_v8 = vld [vmem:[%s7665_s1 + $0x68] sm:$0xff]  ;;  %vm228_vm2 = vcmask 7168   ;;  %s4973_s6 = sshll.u32 %s5359_s15, 5 }
  0x16   : > { %v351_v2 = vld [vmem:[%s7665_s1 + $0x178] sm:$0xff]  ;;  %4975 = vmatpush3.xpose.msk.msra.mxu0 %vm353_vm0, %v319_v1  ;;  %p208_p11 = scmp.lt.s32.totalorder %s207_s5, 49  ;;  %v350_v6 = vld [vmem:[%s7665_s1 + $0x170] sm:$0xff]  ;;  %5129 = vmatprep.mubr.msk.f32.mxu1 %vm5370_vm1, %v5369_v3  ;;  %v349_v9 = vld [vmem:[%s7665_s1 + $0x168] sm:$0xff]  ;;  %s5374_s15 = smov [#allocation4]  }
  0x17   : > { %5098 = vmatpush3.xpose.msk.msra.mxu1 %vm353_vm0, %v351_v2  ;;  %4976 = vmatprep.subr.msk.mxu0 %vm353_vm0, %v334_v4  ;;  %v332_v10 = vld [vmem:[%s7665_s1 + $0xe0] sm:$0xff]  ;;  %v331_v13 = vld [vmem:[%s7665_s1 + $0xd8] sm:$0xff]  ;;  %v330_v17 = vld [vmem:[%s7665_s1 + $0xd0] sm:$0xff]  ;;  %s5295_s21 = sshll.u32 %s5374_s15, 4  ;;  %s5296_s21 = int_to_ptr.vmem [resolvable:$false] %s5295_s21 }
  0x18   : > { %5099 = vmatprep.subr.mxu1 %v5369_v3  ;;  %s7930_s5 = smov (!%p208_p11, %s207_s5), 49  ;;  %v316_v11 = vld [vmem:[%s7665_s1 + $0x60] sm:$0xff]  ;;  %v315_v14 = vld [vmem:[%s7665_s1 + $0x58] sm:$0xff]  ;;  %v314_v18 = vld [vmem:[%s7665_s1 + $0x50] sm:$0xff]  ;;  %s5297_s23 = scalar_lea.vmem %s5296_s21, 64 }
  0x19   : > { %s4819_s30 = sshll.u32 %s7930_s5, 3  ;;  %v348_v12 = vld [vmem:[%s7665_s1 + $0x160] sm:$0xff]  ;;  %v347_v15 = vld [vmem:[%s7665_s1 + $0x158] sm:$0xff]  ;;  %v346_v19 = vld [vmem:[%s7665_s1 + $0x150] sm:$0xff]  ;;  %s4715_s5 = scalar_lea.hbm %s7667_s3, %s4973_s6 }
  0x1a   : > { %4977 = vmatpush3.xpose.msk.msra.mxu0 %vm353_vm0, %v318_v5  ;;  %s5509_s18 = scalar_lea.vmem %s7664_s0, %s4819_s30  ;;  %v329_v20 = vld [vmem:[%s7665_s1 + $0xc8] sm:$0xff]  ;;  %v328_v23 = vld [vmem:[%s7665_s1 + $0xc0] sm:$0xff]  ;;  %v327_v26 = vld [vmem:[%s7665_s1 + $0xb8] sm:$0xff]  ;;  %s204_s30 = sand.u32 1, %s5351_s13  }
  0x1b   : > { %5100 = vmatpush3.xpose.msk.msra.mxu1 %vm353_vm0, %v350_v6  ;;  %4978 = vmatprep.subr.msk.mxu0 %vm353_vm0, %v333_v7  ;;  %v5522_v16 = vld [vmem:[%s5509_s18] sm:$0xff]  ;;  %v313_v21 = vld [vmem:[%s7665_s1 + $0x48] sm:$0xff]  ;;  %v311_v27 = vld [vmem:[%s7665_s1 + $0x38] sm:$0xff]  ;;  %s4818_s4 = sshll.u32 %s204_s30, 1  ;;  %s4703_s11 = scalar_lea.sflag [#allocation5], %s204_s30 }
  0x1c   : > { %5101 = vmatprep.subr.mxu1 %v5369_v3  ;;  %5006 = vmatprep.mubr.msk.f32.mxu0 %vm353_vm0, %v5522_v16  ;;  %v345_v22 = vld [vmem:[%s7665_s1 + $0x148] sm:$0xff]  ;;  %v312_v24 = vld [vmem:[%s7665_s1 + $0x40] sm:$0xff]  ;;  %v343_v28 = vld [vmem:[%s7665_s1 + $0x138] sm:$0xff]  ;;  %s206_s7 = scalar_lea.vmem [#allocation4], %s4818_s4 }
  0x1d   : > { %v344_v25 = vld [vmem:[%s7665_s1 + $0x140] sm:$0xff]  ;;  %v326_v29 = vld [vmem:[%s7665_s1 + $0xb0] sm:$0xff]  ;;  %v325_v32 = vld [vmem:[%s7665_s1 + $0xa8] sm:$0xff]  ;;  %s4717_s8 = sshll.u32 %s206_s7, 4  ;;  %s4718_s8 = int_to_ptr.vmem [resolvable:$true] %s4717_s8 }
  0x1e   : > { %4979 = vmatpush3.xpose.msk.msra.mxu0 %vm353_vm0, %v317_v8  ;;  %v310_v30 = vld [vmem:[%s7665_s1 + $0x30] sm:$0xff]  ;;  %v309_v33 = vld [vmem:[%s7665_s1 + $0x28] sm:$0xff]  ;;  %v324_v35 = vld [vmem:[%s7665_s1 + $0xa0] sm:$0xff]  ;;  %s5291_s19 = scalar_lea.vmem %s4718_s8, 32  ;;  %p5298_p1 = scmp.lt.s32.totalorder %s4718_s8, %s5296_s21 }
  0x1f   : > { %5102 = vmatpush3.xpose.msk.msra.mxu1 %vm353_vm0, %v349_v9  ;;  %4980 = vmatprep.subr.msk.mxu0 %vm353_vm0, %v332_v10  ;;  %v342_v31 = vld [vmem:[%s7665_s1 + $0x130] sm:$0xff]  ;;  %v341_v34 = vld [vmem:[%s7665_s1 + $0x128] sm:$0xff]  ;;  %v308_v36 = vld [vmem:[%s7665_s1 + $0x20] sm:$0xff]  ;;  %p5292_p12 = scmp.ne.s32.totalorder %s4718_s8, %s5291_s19  ;;  %p5299_p2 = scmp.lt.s32.totalorder %s5297_s23, %s5291_s19 }
  0x20   : > { %5103 = vmatprep.subr.mxu1 %v5369_v3  ;;  %v340_v37 = vld [vmem:[%s7665_s1 + $0x120] sm:$0xff]  ;;  %v323_v38 = vld [vmem:[%s7665_s1 + $0x98] sm:$0xff]  ;;  %v322_v41 = vld [vmem:[%s7665_s1 + $0x90] sm:$0xff] }
  0x21   : > { %v307_v39 = vld [vmem:[%s7665_s1 + $0x18] sm:$0xff]  ;;  %v306_v42 = vld [vmem:[%s7665_s1 + $0x10] sm:$0xff]  ;;  %v321_v44 = vld [vmem:[%s7665_s1 + $0x88] sm:$0xff]  ;;  %p5293_p13 = pnand %p5292_p12, %p5435_p4  ;;  %p5300_p3 = por %p5299_p2, %p5298_p1 }
  0x22   : > { %4981 = vmatpush3.xpose.msk.msra.mxu0 %vm353_vm0, %v316_v11  ;;  %v339_v40 = vld [vmem:[%s7665_s1 + $0x118] sm:$0xff]  ;;  %v338_v43 = vld [vmem:[%s7665_s1 + $0x110] sm:$0xff]  ;;  %v305_v45 = vld [vmem:[%s7665_s1 + $0x8] sm:$0xff]  ;;  %v5371_v11 = vmov -inf  }
  0x23   : > { %5104 = vmatpush3.xpose.msk.msra.mxu1 %vm353_vm0, %v348_v12  ;;  %4982 = vmatprep.subr.msk.mxu0 %vm353_vm0, %v331_v13  ;;  %v337_v46 = vld [vmem:[%s7665_s1 + $0x108] sm:$0xff]  ;;  %v320_v47 = vld [vmem:[%s7665_s1 + $0x80] sm:$0xff]  ;;  %v281_v51 = vld [vmem:[%s5509_s18 + $0x10] sm:$0xff]  ;;  %229 = vst.msk [vmem:[#allocation2] sm:$0xff] %vm228_vm2, %v5371_v11  ;;  %p5294_p0 = pneg %p5293_p13 }
  0x24   : > { %5105 = vmatprep.subr.mxu1 %v5369_v3  ;;  %v304_v48 = vld [vmem:[%s7665_s1] sm:$0xff]  ;;  %v280_v50 = vld [vmem:[%s5509_s18 + $0x8] sm:$0xff]  ;;  %v282_v52 = vld [vmem:[%s5509_s18 + $0x18] sm:$0xff]  ;;  %230 = vst.msk [vmem:[#allocation2 + $0x8] sm:$0xff] %vm228_vm2, %v5371_v11 }
  0x25   : > { %v336_v49 = vld [vmem:[%s7665_s1 + $0x100] sm:$0xff]  ;;  %v284_v54 = vld [vmem:[%s5509_s18 + $0x28] sm:$0xff]  ;;  %v285_v55 = vld [vmem:[%s5509_s18 + $0x30] sm:$0xff]  ;;  %231 = vst.msk [vmem:[#allocation2 + $0x10] sm:$0xff] %vm228_vm2, %v5371_v11  ;;  %p5301_p5 = pnand %p5300_p3, %p5294_p0 }
  0x26   : > { %4983 = vmatpush3.xpose.msk.msra.mxu0 %vm353_vm0, %v315_v14  ;;  %v283_v53 = vld [vmem:[%s5509_s18 + $0x20] sm:$0xff]  ;;  %v286_v56 = vld [vmem:[%s5509_s18 + $0x38] sm:$0xff]  ;;  %v288_v58 = vld [vmem:[%s5509_s18 + $0x48] sm:$0xff]  ;;  %232 = vst.msk [vmem:[#allocation2 + $0x18] sm:$0xff] %vm228_vm2, %v5371_v11 }
  0x27   : > { %5106 = vmatpush3.xpose.msk.msra.mxu1 %vm353_vm0, %v347_v15  ;;  %4984 = vmatprep.subr.msk.mxu0 %vm353_vm0, %v330_v17  ;;  %v287_v57 = vld [vmem:[%s5509_s18 + $0x40] sm:$0xff]  ;;  %v289_v59 = vld [vmem:[%s5509_s18 + $0x50] sm:$0xff]  ;;  %v290_v60 = vld [vmem:[%s5509_s18 + $0x58] sm:$0xff]  ;;  %233 = vst.msk [vmem:[#allocation2 + $0x20] sm:$0xff] %vm228_vm2, %v5371_v11 }
  0x28   : > { %5107 = vmatprep.subr.mxu1 %v5369_v3  ;;  %v291_v61 = vld [vmem:[%s5509_s18 + $0x60] sm:$0xff]  ;;  %v292_v62 = vld [vmem:[%s5509_s18 + $0x68] sm:$0xff]  ;;  %v293_v63 = vld [vmem:[%s5509_s18 + $0x70] sm:$0xff]  ;;  %234 = vst.msk [vmem:[#allocation2 + $0x28] sm:$0xff] %vm228_vm2, %v5371_v11 }
  0x29   : > { %v294_v0 = vld [vmem:[%s5509_s18 + $0x78] sm:$0xff]  ;;  %v295_v1 = vld [vmem:[%s5509_s18 + $0x80] sm:$0xff]  ;;  %v296_v2 = vld [vmem:[%s5509_s18 + $0x88] sm:$0xff]  ;;  %235 = vst.msk [vmem:[#allocation2 + $0x30] sm:$0xff] %vm228_vm2, %v5371_v11 }
  0x2a   : > { %4985 = vmatpush3.xpose.msk.msra.mxu0 %vm353_vm0, %v314_v18  ;;  %v297_v4 = vld [vmem:[%s5509_s18 + $0x90] sm:$0xff]  ;;  %v298_v5 = vld [vmem:[%s5509_s18 + $0x98] sm:$0xff]  ;;  %v299_v6 = vld [vmem:[%s5509_s18 + $0xa0] sm:$0xff]  ;;  %236 = vst.msk [vmem:[#allocation2 + $0x38] sm:$0xff] %vm228_vm2, %v5371_v11 }
  0x2b   : > { %5108 = vmatpush3.xpose.msk.msra.mxu1 %vm353_vm0, %v346_v19  ;;  %4986 = vmatprep.subr.msk.mxu0 %vm353_vm0, %v329_v20  ;;  %v300_v7 = vld [vmem:[%s5509_s18 + $0xa8] sm:$0xff]  ;;  %v301_v8 = vld [vmem:[%s5509_s18 + $0xb0] sm:$0xff]  ;;  %v302_v9 = vld [vmem:[%s5509_s18 + $0xb8] sm:$0xff]  ;;  %237 = vst.msk [vmem:[#allocation2 + $0x40] sm:$0xff] %vm228_vm2, %v5371_v11 }
  0x2c   : > { %5109 = vmatprep.subr.mxu1 %v5369_v3  ;;  %v303_v10 = vld [vmem:[%s5509_s18 + $0xc0] sm:$0xff]  ;;  %238 = vst.msk [vmem:[#allocation2 + $0x48] sm:$0xff] %vm228_vm2, %v5371_v11  ;;  %239 = vst.msk [vmem:[#allocation2 + $0x50] sm:$0xff] %vm228_vm2, %v5371_v11 }
  0x2d   : > { %240 = vst.msk [vmem:[#allocation2 + $0x58] sm:$0xff] %vm228_vm2, %v5371_v11  ;;  %241 = vst.msk [vmem:[#allocation2 + $0x60] sm:$0xff] %vm228_vm2, %v5371_v11 }
  0x2e   : > { %4987 = vmatpush3.xpose.msk.msra.mxu0 %vm353_vm0, %v313_v21  ;;  %242 = vst.msk [vmem:[#allocation2 + $0x68] sm:$0xff] %vm228_vm2, %v5371_v11  ;;  %243 = vst.msk [vmem:[#allocation2 + $0x70] sm:$0xff] %vm228_vm2, %v5371_v11 }
  0x2f   : > { %5110 = vmatpush3.xpose.msk.msra.mxu1 %vm353_vm0, %v345_v22  ;;  %4988 = vmatprep.subr.msk.mxu0 %vm353_vm0, %v328_v23  ;;  %244 = vst.msk [vmem:[#allocation2 + $0x78] sm:$0xff] %vm228_vm2, %v5371_v11  ;;  %245 = vst.msk [vmem:[#allocation2 + $0x80] sm:$0xff] %vm228_vm2, %v5371_v11 }
  0x30   : > { %5111 = vmatprep.subr.mxu1 %v5369_v3  ;;  %246 = vst.msk [vmem:[#allocation2 + $0x88] sm:$0xff] %vm228_vm2, %v5371_v11  ;;  %247 = vst.msk [vmem:[#allocation2 + $0x90] sm:$0xff] %vm228_vm2, %v5371_v11 }
  0x31   : > { %248 = vst.msk [vmem:[#allocation2 + $0x98] sm:$0xff] %vm228_vm2, %v5371_v11  ;;  %249 = vst.msk [vmem:[#allocation2 + $0xa0] sm:$0xff] %vm228_vm2, %v5371_v11 }
  0x32   : > { %4989 = vmatpush3.xpose.msk.msra.mxu0 %vm353_vm0, %v312_v24  ;;  %250 = vst.msk [vmem:[#allocation2 + $0xa8] sm:$0xff] %vm228_vm2, %v5371_v11  ;;  %251 = vst.msk [vmem:[#allocation2 + $0xb0] sm:$0xff] %vm228_vm2, %v5371_v11 }
  0x33   : > { %5112 = vmatpush3.xpose.msk.msra.mxu1 %vm353_vm0, %v344_v25  ;;  %4990 = vmatprep.subr.msk.mxu0 %vm353_vm0, %v327_v26  ;;  %252 = vst.msk [vmem:[#allocation2 + $0xb8] sm:$0xff] %vm228_vm2, %v5371_v11  ;;  %253 = vst.msk [vmem:[#allocation2 + $0xc0] sm:$0xff] %vm228_vm2, %v5371_v11 }
  0x34   : > { %5113 = vmatprep.subr.mxu1 %v5369_v3 }
  0x36   : > { %4991 = vmatpush3.xpose.msk.msra.mxu0 %vm353_vm0, %v311_v27 }
  0x37   : > { %5114 = vmatpush3.xpose.msk.msra.mxu1 %vm353_vm0, %v343_v28  ;;  %4992 = vmatprep.subr.msk.mxu0 %vm353_vm0, %v326_v29 }
  0x38   : > { %5115 = vmatprep.subr.mxu1 %v5369_v3 }
  0x3a   : > { %4993 = vmatpush3.xpose.msk.msra.mxu0 %vm353_vm0, %v310_v30 }
  0x3b   : > { %5116 = vmatpush3.xpose.msk.msra.mxu1 %vm353_vm0, %v342_v31  ;;  %4994 = vmatprep.subr.msk.mxu0 %vm353_vm0, %v325_v32 }
  0x3c   : > { %5117 = vmatprep.subr.mxu1 %v5369_v3 }
  0x3e   : > { %4995 = vmatpush3.xpose.msk.msra.mxu0 %vm353_vm0, %v309_v33 }
  0x3f   : > { %5118 = vmatpush3.xpose.msk.msra.mxu1 %vm353_vm0, %v341_v34  ;;  %4996 = vmatprep.subr.msk.mxu0 %vm353_vm0, %v324_v35 }
  0x40   : > { %5119 = vmatprep.subr.mxu1 %v5369_v3 }
  0x42   : > { %4997 = vmatpush3.xpose.msk.msra.mxu0 %vm353_vm0, %v308_v36 }
  0x43   : > { %5120 = vmatpush3.xpose.msk.msra.mxu1 %vm353_vm0, %v340_v37  ;;  %4998 = vmatprep.subr.msk.mxu0 %vm353_vm0, %v323_v38 }
  0x44   : > { %5121 = vmatprep.subr.mxu1 %v5369_v3 }
  0x46   : > { %4999 = vmatpush3.xpose.msk.msra.mxu0 %vm353_vm0, %v307_v39 }
  0x47   : > { %5122 = vmatpush3.xpose.msk.msra.mxu1 %vm353_vm0, %v339_v40  ;;  %5000 = vmatprep.subr.msk.mxu0 %vm353_vm0, %v322_v41 }
  0x48   : > { %5123 = vmatprep.subr.mxu1 %v5369_v3 }
  0x4a   : > { %5001 = vmatpush3.xpose.msk.msra.mxu0 %vm353_vm0, %v306_v42 }
  0x4b   : > { %5124 = vmatpush3.xpose.msk.msra.mxu1 %vm353_vm0, %v338_v43  ;;  %5002 = vmatprep.subr.msk.mxu0 %vm353_vm0, %v321_v44 }
  0x4c   : > { %5125 = vmatprep.subr.mxu1 %v5369_v3 }
  0x4e   : > { %5003 = vmatpush3.xpose.msk.msra.mxu0 %vm353_vm0, %v305_v45 }
  0x4f   : > { %5126 = vmatpush3.xpose.msk.msra.mxu1 %vm353_vm0, %v337_v46  ;;  %5004 = vmatprep.subr.msk.mxu0 %vm353_vm0, %v320_v47 }
  0x50   : > { %5127 = vmatprep.subr.mxu1 %v5369_v3 }
  0x52   : > { %5005 = vmatpush3.xpose.msk.msra.mxu0 %vm353_vm0, %v304_v48 }
  0x53   : > { %5128 = vmatpush3.xpose.msk.msra.mxu1 %vm353_vm0, %v336_v49 }
  0x55   : > { %5007 = vmatmul.mubr.msk.f32.vlgmr.msra.gmra.mxu0 %vm353_vm0, %v5522_v16 }
  0x56   : > { %5130 = vmatmul.mubr.msk.f32.vlgmr.msra.gmra.mxu1 %vm353_vm0, %v5522_v16  ;;  %5008 = vmatprep.mubr.msk.f32.mxu0 %vm353_vm0, %v280_v50  ;;  %v352_v16 = vld [vmem:[%s7666_s2] sm:$0x7] }
  0x57   : > { %5132 = vmatprep.mubr.msk.f32.mxu1 %vm5370_vm1, %v5369_v3 }
  0x59   : > { %5009 = vmatmul.mubr.msk.f32.gmra.mxu0 %vm353_vm0, %v280_v50 }
  0x5a   : > { %5133 = vmatmul.mubr.msk.f32.gmra.mxu1 %vm353_vm0, %v280_v50  ;;  %5010 = vmatprep.mubr.msk.f32.mxu0 %vm353_vm0, %v281_v51 }
  0x5b   : > { %5135 = vmatprep.mubr.msk.f32.mxu1 %vm5370_vm1, %v5369_v3 }
  0x5d   : > { %5011 = vmatmul.mubr.msk.f32.gmra.mxu0 %vm353_vm0, %v281_v51 }
  0x5e   : > { %5136 = vmatmul.mubr.msk.f32.gmra.mxu1 %vm353_vm0, %v281_v51  ;;  %5012 = vmatprep.mubr.msk.f32.mxu0 %vm353_vm0, %v282_v52 }
  0x5f   : > { %5138 = vmatprep.mubr.msk.f32.mxu1 %vm5370_vm1, %v5369_v3 }
  0x61   : > { %5013 = vmatmul.mubr.msk.f32.gmra.mxu0 %vm353_vm0, %v282_v52 }
  0x62   : > { %5139 = vmatmul.mubr.msk.f32.gmra.mxu1 %vm353_vm0, %v282_v52  ;;  %5014 = vmatprep.mubr.msk.f32.mxu0 %vm353_vm0, %v283_v53 }
  0x63   : > { %5141 = vmatprep.mubr.msk.f32.mxu1 %vm5370_vm1, %v5369_v3 }
  0x65   : > { %5015 = vmatmul.mubr.msk.f32.gmra.mxu0 %vm353_vm0, %v283_v53 }
  0x66   : > { %5142 = vmatmul.mubr.msk.f32.gmra.mxu1 %vm353_vm0, %v283_v53  ;;  %5016 = vmatprep.mubr.msk.f32.mxu0 %vm353_vm0, %v284_v54 }
  0x67   : > { %5144 = vmatprep.mubr.msk.f32.mxu1 %vm5370_vm1, %v5369_v3 }
  0x69   : > { %5017 = vmatmul.mubr.msk.f32.gmra.mxu0 %vm353_vm0, %v284_v54 }
  0x6a   : > { %5145 = vmatmul.mubr.msk.f32.gmra.mxu1 %vm353_vm0, %v284_v54  ;;  %5018 = vmatprep.mubr.msk.f32.mxu0 %vm353_vm0, %v285_v55 }
  0x6b   : > { %5147 = vmatprep.mubr.msk.f32.mxu1 %vm5370_vm1, %v5369_v3 }
  0x6d   : > { %5019 = vmatmul.mubr.msk.f32.gmra.mxu0 %vm353_vm0, %v285_v55 }
  0x6e   : > { %5148 = vmatmul.mubr.msk.f32.gmra.mxu1 %vm353_vm0, %v285_v55  ;;  %5020 = vmatprep.mubr.msk.f32.mxu0 %vm353_vm0, %v286_v56 }
  0x6f   : > { %5150 = vmatprep.mubr.msk.f32.mxu1 %vm5370_vm1, %v5369_v3 }
  0x71   : > { %5021 = vmatmul.mubr.msk.f32.gmra.mxu0 %vm353_vm0, %v286_v56 }
  0x72   : > { %5151 = vmatmul.mubr.msk.f32.gmra.mxu1 %vm353_vm0, %v286_v56  ;;  %5022 = vmatprep.mubr.msk.f32.mxu0 %vm353_vm0, %v287_v57 }
  0x73   : > { %5153 = vmatprep.mubr.msk.f32.mxu1 %vm5370_vm1, %v5369_v3 }
  0x75   : > { %5023 = vmatmul.mubr.msk.f32.gmra.mxu0 %vm353_vm0, %v287_v57 }
  0x76   : > { %5154 = vmatmul.mubr.msk.f32.gmra.mxu1 %vm353_vm0, %v287_v57  ;;  %5024 = vmatprep.mubr.msk.f32.mxu0 %vm353_vm0, %v288_v58 }
  0x77   : > { %5156 = vmatprep.mubr.msk.f32.mxu1 %vm5370_vm1, %v5369_v3 }
  0x79   : > { %5025 = vmatmul.mubr.msk.f32.gmra.mxu0 %vm353_vm0, %v288_v58 }
  0x7a   : > { %5157 = vmatmul.mubr.msk.f32.gmra.mxu1 %vm353_vm0, %v288_v58  ;;  %5026 = vmatprep.mubr.msk.f32.mxu0 %vm353_vm0, %v289_v59 }
  0x7b   : > { %5159 = vmatprep.mubr.msk.f32.mxu1 %vm5370_vm1, %v5369_v3 }
  0x7d   : > { %5027 = vmatmul.mubr.msk.f32.gmra.mxu0 %vm353_vm0, %v289_v59 }
  0x7e   : > { %5160 = vmatmul.mubr.msk.f32.gmra.mxu1 %vm353_vm0, %v289_v59  ;;  %5028 = vmatprep.mubr.msk.f32.mxu0 %vm353_vm0, %v290_v60 }
  0x7f   : > { %5162 = vmatprep.mubr.msk.f32.mxu1 %vm5370_vm1, %v5369_v3 }
  0x81   : > { %5029 = vmatmul.mubr.msk.f32.gmra.mxu0 %vm353_vm0, %v290_v60 }
  0x82   : > { %5163 = vmatmul.mubr.msk.f32.gmra.mxu1 %vm353_vm0, %v290_v60  ;;  %5030 = vmatprep.mubr.msk.f32.mxu0 %vm353_vm0, %v291_v61 }
  0x83   : > { %5165 = vmatprep.mubr.msk.f32.mxu1 %vm5370_vm1, %v5369_v3 }
  0x85   : > { %5031 = vmatmul.mubr.msk.f32.gmra.mxu0 %vm353_vm0, %v291_v61 }
  0x86   : > { %5166 = vmatmul.mubr.msk.f32.gmra.mxu1 %vm353_vm0, %v291_v61  ;;  %5032 = vmatprep.mubr.msk.f32.mxu0 %vm353_vm0, %v292_v62 }
  0x87   : > { %5168 = vmatprep.mubr.msk.f32.mxu1 %vm5370_vm1, %v5369_v3 }
  0x89   : > { %5033 = vmatmul.mubr.msk.f32.gmra.mxu0 %vm353_vm0, %v292_v62 }
  0x8a   : > { %5169 = vmatmul.mubr.msk.f32.gmra.mxu1 %vm353_vm0, %v292_v62  ;;  %5034 = vmatprep.mubr.msk.f32.mxu0 %vm353_vm0, %v293_v63 }
  0x8b   : > { %5171 = vmatprep.mubr.msk.f32.mxu1 %vm5370_vm1, %v5369_v3 }
  0x8d   : > { %5035 = vmatmul.mubr.msk.f32.gmra.mxu0 %vm353_vm0, %v293_v63 }
  0x8e   : > { %5172 = vmatmul.mubr.msk.f32.gmra.mxu1 %vm353_vm0, %v293_v63  ;;  %5036 = vmatprep.mubr.msk.f32.mxu0 %vm353_vm0, %v294_v0 }
  0x8f   : > { %5174 = vmatprep.mubr.msk.f32.mxu1 %vm5370_vm1, %v5369_v3 }
  0x91   : > { %5037 = vmatmul.mubr.msk.f32.gmra.mxu0 %vm353_vm0, %v294_v0 }
  0x92   : > { %5175 = vmatmul.mubr.msk.f32.gmra.mxu1 %vm353_vm0, %v294_v0  ;;  %5038 = vmatprep.mubr.msk.f32.mxu0 %vm353_vm0, %v295_v1 }
  0x93   : > { %5177 = vmatprep.mubr.msk.f32.mxu1 %vm5370_vm1, %v5369_v3 }
  0x95   : > { %5039 = vmatmul.mubr.msk.f32.gmra.mxu0 %vm353_vm0, %v295_v1 }
  0x96   : > { %5178 = vmatmul.mubr.msk.f32.gmra.mxu1 %vm353_vm0, %v295_v1  ;;  %5040 = vmatprep.mubr.msk.f32.mxu0 %vm353_vm0, %v296_v2 }
  0x97   : > { %5180 = vmatprep.mubr.msk.f32.mxu1 %vm5370_vm1, %v5369_v3 }
  0x99   : > { %5041 = vmatmul.mubr.msk.f32.gmra.mxu0 %vm353_vm0, %v296_v2 }
  0x9a   : > { %5181 = vmatmul.mubr.msk.f32.gmra.mxu1 %vm353_vm0, %v296_v2  ;;  %5042 = vmatprep.mubr.msk.f32.mxu0 %vm353_vm0, %v297_v4 }
  0x9b   : > { %5183 = vmatprep.mubr.msk.f32.mxu1 %vm5370_vm1, %v5369_v3 }
  0x9d   : > { %5043 = vmatmul.mubr.msk.f32.gmra.mxu0 %vm353_vm0, %v297_v4 }
  0x9e   : > { %5184 = vmatmul.mubr.msk.f32.gmra.mxu1 %vm353_vm0, %v297_v4  ;;  %5044 = vmatprep.mubr.msk.f32.mxu0 %vm353_vm0, %v298_v5 }
  0x9f   : > { %5186 = vmatprep.mubr.msk.f32.mxu1 %vm5370_vm1, %v5369_v3 }
  0xa1   : > { %5045 = vmatmul.mubr.msk.f32.gmra.mxu0 %vm353_vm0, %v298_v5 }
  0xa2   : > { %5187 = vmatmul.mubr.msk.f32.gmra.mxu1 %vm353_vm0, %v298_v5  ;;  %5046 = vmatprep.mubr.msk.f32.mxu0 %vm353_vm0, %v299_v6 }
  0xa3   : > { %5189 = vmatprep.mubr.msk.f32.mxu1 %vm5370_vm1, %v5369_v3 }
  0xa5   : > { %5047 = vmatmul.mubr.msk.f32.gmra.mxu0 %vm353_vm0, %v299_v6 }
  0xa6   : > { %5190 = vmatmul.mubr.msk.f32.gmra.mxu1 %vm353_vm0, %v299_v6  ;;  %5048 = vmatprep.mubr.msk.f32.mxu0 %vm353_vm0, %v300_v7 }
  0xa7   : > { %5192 = vmatprep.mubr.msk.f32.mxu1 %vm5370_vm1, %v5369_v3 }
  0xa9   : > { %5049 = vmatmul.mubr.msk.f32.gmra.mxu0 %vm353_vm0, %v300_v7 }
  0xaa   : > { %5193 = vmatmul.mubr.msk.f32.gmra.mxu1 %vm353_vm0, %v300_v7  ;;  %5050 = vmatprep.mubr.msk.f32.mxu0 %vm353_vm0, %v301_v8 }
  0xab   : > { %5195 = vmatprep.mubr.msk.f32.mxu1 %vm5370_vm1, %v5369_v3 }
  0xad   : > { %5051 = vmatmul.mubr.msk.f32.gmra.mxu0 %vm353_vm0, %v301_v8 }
  0xae   : > { %5196 = vmatmul.mubr.msk.f32.gmra.mxu1 %vm353_vm0, %v301_v8  ;;  %5052 = vmatprep.mubr.msk.f32.mxu0 %vm353_vm0, %v302_v9 }
  0xaf   : > { %5198 = vmatprep.mubr.msk.f32.mxu1 %vm5370_vm1, %v5369_v3 }
  0xb1   : > { %5053 = vmatmul.mubr.msk.f32.gmra.mxu0 %vm353_vm0, %v302_v9 }
  0xb2   : > { %5199 = vmatmul.mubr.msk.f32.gmra.mxu1 %vm353_vm0, %v302_v9  ;;  %5054 = vmatprep.mubr.msk.f32.mxu0 %vm353_vm0, %v303_v10 }
  0xb3   : > { %5201 = vmatprep.mubr.msk.f32.mxu1 %vm5370_vm1, %v5369_v3  ;;  %v7668_v3 = vlaneseq }
  0xb5   : > { %5055 = vmatmul.mubr.msk.f32.gmra.mxu0 %vm353_vm0, %v303_v10  ;;  %v5845_v12 = vshrl.u32 %v7668_v3, 7 }
  0xb6   : > { %5202 = vmatmul.mubr.msk.f32.gmra.mxu1 %vm353_vm0, %v303_v10 }
  0xb7   : > { %7761 = vst [vmem:[#allocation7_spill] sm:$0xff] %v5845_v12  ;;  %v981_v13 = vsub.s32 0, %v5845_v12  ;;  %v985_v14 = vsub.s32 1, %v5845_v12  ;;  %v989_v15 = vsub.s32 2, %v5845_v12 }
  0xb9   : > { %v5853_v17 = vrot.slane %v352_v16, %v981_v13  ;;  %v5855_v18 = vrot.slane %v352_v16, %v985_v14  ;;  %v5857_v19 = vrot.slane %v352_v16, %v989_v15 }
 0x115   : > { %v639_v20 = vpop.f32.mrf.mxu0 }
 0x116   : > { %v854_v21 = vpop.f32.mrf.mxu1  ;;  %v5860_v24 = vsub.f32 %v639_v20, %v5853_v17 }
 0x117   : > { %v641_v22 = vpop.f32.mrf.mxu0  ;;  %v5866_v26 = vsub.f32 %v854_v21, %v5857_v19 }
 0x118   : > { %v5131_v23 = vpop.f32.mrf.mxu1  ;;  %v5863_v25 = vsub.f32 %v641_v22, %v5855_v18 }
 0x119   : > { %v645_v27 = vpop.f32.mrf.mxu0 }
 0x11a   : > { %v859_v28 = vpop.f32.mrf.mxu1  ;;  %v1069_v29 = vmax.f32 %v5860_v24, %v5863_v25  ;;  %v5871_v32 = vsub.f32 %v645_v27, %v5853_v17 }
 0x11b   : > { %v647_v30 = vpop.f32.mrf.mxu0  ;;  %v5877_v34 = vsub.f32 %v859_v28, %v5857_v19 }
 0x11c   : > { %v5134_v31 = vpop.f32.mrf.mxu1  ;;  %v5874_v33 = vsub.f32 %v647_v30, %v5855_v18  ;;  %v1070_v35 = vmax.f32 %v1069_v29, %v5866_v26 }
 0x11d   : > { %v651_v36 = vpop.f32.mrf.mxu0 }
 0x11e   : > { %v864_v37 = vpop.f32.mrf.mxu1  ;;  %v1073_v38 = vmax.f32 %v5871_v32, %v5874_v33  ;;  %1071 = vmax.xlane.f32.xlu0 %v1070_v35  ;;  %v5883_v41 = vsub.f32 %v651_v36, %v5853_v17 }
 0x11f   : > { %v653_v39 = vpop.f32.mrf.mxu0  ;;  %v5889_v43 = vsub.f32 %v864_v37, %v5857_v19 }
 0x120   : > { %v5137_v40 = vpop.f32.mrf.mxu1  ;;  %v5886_v42 = vsub.f32 %v653_v39, %v5855_v18  ;;  %v1074_v44 = vmax.f32 %v1073_v38, %v5877_v34 }
 0x121   : > { %v657_v45 = vpop.f32.mrf.mxu0 }
 0x122   : > { %v869_v46 = vpop.f32.mrf.mxu1  ;;  %1075 = vmax.xlane.f32.xlu0 %v1074_v44  ;;  %v1077_v47 = vmax.f32 %v5883_v41, %v5886_v42  ;;  %v5895_v50 = vsub.f32 %v657_v45, %v5853_v17 }
 0x123   : > { %v659_v48 = vpop.f32.mrf.mxu0  ;;  %v5901_v52 = vsub.f32 %v869_v46, %v5857_v19 }
 0x124   : > { %v5140_v49 = vpop.f32.mrf.mxu1  ;;  %v5898_v51 = vsub.f32 %v659_v48, %v5855_v18  ;;  %v1078_v53 = vmax.f32 %v1077_v47, %v5889_v43 }
 0x125   : > { %v663_v54 = vpop.f32.mrf.mxu0 }
 0x126   : > { %v874_v55 = vpop.f32.mrf.mxu1  ;;  %v1081_v56 = vmax.f32 %v5895_v50, %v5898_v51  ;;  %1079 = vmax.xlane.f32.xlu1 %v1078_v53  ;;  %v5907_v59 = vsub.f32 %v663_v54, %v5853_v17 }
 0x127   : > { %v665_v57 = vpop.f32.mrf.mxu0  ;;  %v5913_v61 = vsub.f32 %v874_v55, %v5857_v19 }
 0x128   : > { %v5143_v58 = vpop.f32.mrf.mxu1  ;;  %v5910_v60 = vsub.f32 %v665_v57, %v5855_v18  ;;  %v1082_v62 = vmax.f32 %v1081_v56, %v5901_v52 }
 0x129   : > { %v669_v63 = vpop.f32.mrf.mxu0 }
 0x12a   : > { %v879_v0 = vpop.f32.mrf.mxu1  ;;  %v1085_v1 = vmax.f32 %v5907_v59, %v5910_v60  ;;  %1083 = vmax.xlane.f32.xlu1 %v1082_v62  ;;  %v5919_v5 = vsub.f32 %v669_v63, %v5853_v17 }
 0x12b   : > { %v671_v2 = vpop.f32.mrf.mxu0  ;;  %v5925_v7 = vsub.f32 %v879_v0, %v5857_v19 }
 0x12c   : > { %v5146_v4 = vpop.f32.mrf.mxu1  ;;  %v5922_v6 = vsub.f32 %v671_v2, %v5855_v18  ;;  %v1086_v8 = vmax.f32 %v1085_v1, %v5913_v61 }
 0x12d   : > { %v675_v9 = vpop.f32.mrf.mxu0 }
 0x12e   : > { %v884_v10 = vpop.f32.mrf.mxu1  ;;  %v1089_v11 = vmax.f32 %v5919_v5, %v5922_v6  ;;  %1087 = vmax.xlane.f32.xlu0 %v1086_v8  ;;  %v5931_v15 = vsub.f32 %v675_v9, %v5853_v17 }
 0x12f   : > { %v677_v13 = vpop.f32.mrf.mxu0  ;;  %v5937_v20 = vsub.f32 %v884_v10, %v5857_v19 }
 0x130   : > { %v5149_v14 = vpop.f32.mrf.mxu1  ;;  %v5934_v16 = vsub.f32 %v677_v13, %v5855_v18  ;;  %v1090_v21 = vmax.f32 %v1089_v11, %v5925_v7 }
 0x131   : > { %v681_v22 = vpop.f32.mrf.mxu0 }
 0x132   : > { %v889_v23 = vpop.f32.mrf.mxu1  ;;  %v1093_v27 = vmax.f32 %v5931_v15, %v5934_v16  ;;  %1091 = vmax.xlane.f32.xlu1 %v1090_v21  ;;  %v5943_v30 = vsub.f32 %v681_v22, %v5853_v17 }
 0x133   : > { %v683_v28 = vpop.f32.mrf.mxu0  ;;  %v5949_v35 = vsub.f32 %v889_v23, %v5857_v19 }
 0x134   : > { %v5152_v29 = vpop.f32.mrf.mxu1  ;;  %v5946_v31 = vsub.f32 %v683_v28, %v5855_v18  ;;  %v1094_v36 = vmax.f32 %v1093_v27, %v5937_v20 }
 0x135   : > { %v687_v37 = vpop.f32.mrf.mxu0 }
 0x136   : > { %v894_v38 = vpop.f32.mrf.mxu1  ;;  %v1097_v39 = vmax.f32 %v5943_v30, %v5946_v31  ;;  %1095 = vmax.xlane.f32.xlu0 %v1094_v36  ;;  %v5955_v45 = vsub.f32 %v687_v37, %v5853_v17 }
 0x137   : > { %v689_v40 = vpop.f32.mrf.mxu0  ;;  %v5961_v47 = vsub.f32 %v894_v38, %v5857_v19 }
 0x138   : > { %v5155_v44 = vpop.f32.mrf.mxu1  ;;  %v5958_v46 = vsub.f32 %v689_v40, %v5855_v18  ;;  %v1098_v48 = vmax.f32 %v1097_v39, %v5949_v35 }
 0x139   : > { %v693_v49 = vpop.f32.mrf.mxu0 }
 0x13a   : > { %v899_v53 = vpop.f32.mrf.mxu1  ;;  %v1101_v54 = vmax.f32 %v5955_v45, %v5958_v46  ;;  %1099 = vmax.xlane.f32.xlu1 %v1098_v48  ;;  %v5967_v57 = vsub.f32 %v693_v49, %v5853_v17 }
 0x13b   : > { %v695_v55 = vpop.f32.mrf.mxu0  ;;  %v5973_v62 = vsub.f32 %v899_v53, %v5857_v19 }
 0x13c   : > { %v5158_v56 = vpop.f32.mrf.mxu1  ;;  %v5970_v58 = vsub.f32 %v695_v55, %v5855_v18  ;;  %v1102_v63 = vmax.f32 %v1101_v54, %v5961_v47 }
 0x13d   : > { %v699_v0 = vpop.f32.mrf.mxu0 }
 0x13e   : > { %v904_v1 = vpop.f32.mrf.mxu1  ;;  %v1105_v2 = vmax.f32 %v5967_v57, %v5970_v58  ;;  %1103 = vmax.xlane.f32.xlu0 %v1102_v63  ;;  %v5979_v9 = vsub.f32 %v699_v0, %v5853_v17 }
 0x13f   : > { %v701_v4 = vpop.f32.mrf.mxu0  ;;  %v5985_v11 = vsub.f32 %v904_v1, %v5857_v19 }
 0x140   : > { %v5161_v8 = vpop.f32.mrf.mxu1  ;;  %v5982_v10 = vsub.f32 %v701_v4, %v5855_v18  ;;  %v1106_v13 = vmax.f32 %v1105_v2, %v5973_v62 }
 0x141   : > { %v705_v14 = vpop.f32.mrf.mxu0 }
 0x142   : > { %v909_v21 = vpop.f32.mrf.mxu1  ;;  %v1109_v22 = vmax.f32 %v5979_v9, %v5982_v10  ;;  %1107 = vmax.xlane.f32.xlu1 %v1106_v13  ;;  %v5991_v28 = vsub.f32 %v705_v14, %v5853_v17 }
 0x143   : > { %v707_v23 = vpop.f32.mrf.mxu0  ;;  %v5997_v36 = vsub.f32 %v909_v21, %v5857_v19 }
 0x144   : > { %v5164_v27 = vpop.f32.mrf.mxu1  ;;  %v5994_v29 = vsub.f32 %v707_v23, %v5855_v18  ;;  %v1110_v37 = vmax.f32 %v1109_v22, %v5985_v11 }
 0x145   : > { %v711_v38 = vpop.f32.mrf.mxu0 }
 0x146   : > { %v914_v39 = vpop.f32.mrf.mxu1  ;;  %v1113_v40 = vmax.f32 %v5991_v28, %v5994_v29  ;;  %1111 = vmax.xlane.f32.xlu1 %v1110_v37  ;;  %v6003_v49 = vsub.f32 %v711_v38, %v5853_v17 }
 0x147   : > { %v713_v44 = vpop.f32.mrf.mxu0  ;;  %v6009_v54 = vsub.f32 %v914_v39, %v5857_v19 }
 0x148   : > { %v5167_v48 = vpop.f32.mrf.mxu1  ;;  %v6006_v53 = vsub.f32 %v713_v44, %v5855_v18  ;;  %v1114_v55 = vmax.f32 %v1113_v40, %v5997_v36 }
 0x149   : > { %v717_v56 = vpop.f32.mrf.mxu0 }
 0x14a   : > { %v919_v63 = vpop.f32.mrf.mxu1  ;;  %v1117_v0 = vmax.f32 %v6003_v49, %v6006_v53  ;;  %1115 = vmax.xlane.f32.xlu1 %v1114_v55  ;;  %v6015_v4 = vsub.f32 %v717_v56, %v5853_v17 }
 0x14b   : > { %v719_v1 = vpop.f32.mrf.mxu0  ;;  %v6021_v13 = vsub.f32 %v919_v63, %v5857_v19 }
 0x14c   : > { %v5170_v2 = vpop.f32.mrf.mxu1  ;;  %v6018_v8 = vsub.f32 %v719_v1, %v5855_v18  ;;  %v1118_v14 = vmax.f32 %v1117_v0, %v6009_v54 }
 0x14d   : > { %7762 = vst [vmem:[#allocation8_spill] sm:$0xff] %v6021_v13  ;;  %v723_v21 = vpop.f32.mrf.mxu0 }
 0x14e   : > { %v924_v22 = vpop.f32.mrf.mxu1  ;;  %v1121_v23 = vmax.f32 %v6015_v4, %v6018_v8  ;;  %1119 = vmax.xlane.f32.xlu1 %v1118_v14 }
 0x14f   : > { %v725_v27 = vpop.f32.mrf.mxu0 }
 0x150   : > { %v5173_v37 = vpop.f32.mrf.mxu1  ;;  %v1122_v38 = vmax.f32 %v1121_v23, %v6021_v13  ;;  %v6028_v63 = vsub.f32 %v725_v27, %v5855_v18 }
 0x151   : > { %v729_v39 = vpop.f32.mrf.mxu0  ;;  %v6040_v37 = vsub.f32 %v723_v21, %v5853_v17 }
 0x152   : > { %v929_v40 = vpop.f32.mrf.mxu1  ;;  %1123 = vmax.xlane.f32.xlu1 %v1122_v38  ;;  %7763 = vst [vmem:[#allocation9_spill] sm:$0xff] %v6028_v63 }
 0x153   : > { %v731_v44 = vpop.f32.mrf.mxu0  ;;  %7767 = vst [vmem:[#allocation13_spill] sm:$0xff] %v6040_v37 }
 0x154   : > { %v5176_v48 = vpop.f32.mrf.mxu1 }
 0x155   : > { %v735_v55 = vpop.f32.mrf.mxu0 }
 0x156   : > { %v934_v56 = vpop.f32.mrf.mxu1  ;;  %v6031_v2 = vsub.f32 %v735_v55, %v5853_v17  ;;  %v6047_v55 = vsub.f32 %v924_v22, %v5857_v19 }
 0x157   : > { %v737_v0 = vpop.f32.mrf.mxu0  ;;  %v6037_v23 = vsub.f32 %v934_v56, %v5857_v19 }
 0x158   : > { %v5179_v1 = vpop.f32.mrf.mxu1  ;;  %7764 = vst [vmem:[#allocation10_spill] sm:$0xff] %v6031_v2  ;;  %v6034_v14 = vsub.f32 %v737_v0, %v5855_v18  ;;  %7768 = vst [vmem:[#allocation14_spill] sm:$0xff] %v6047_v55  ;;  %v6050_v0 = vsub.f32 %v731_v44, %v5855_v18 }
 0x159   : > { %7766 = vst [vmem:[#allocation12_spill] sm:$0xff] %v6037_v23  ;;  %v741_v38 = vpop.f32.mrf.mxu0  ;;  %v1125_v1 = vmax.f32 %v6040_v37, %v6028_v63  ;;  %v6063_v63 = vsub.f32 %v729_v39, %v5853_v17 }
 0x15a   : > { %7765 = vst [vmem:[#allocation11_spill] sm:$0xff] %v6034_v14  ;;  %v939_v48 = vpop.f32.mrf.mxu1  ;;  %v1133_v27 = vmax.f32 %v6031_v2, %v6034_v14  ;;  %7769 = vst [vmem:[#allocation15_spill] sm:$0xff] %v6050_v0  ;;  %v6053_v12 = vsub.f32 %v741_v38, %v5853_v17 }
 0x15b   : > { %v743_v3 = vpop.f32.mrf.mxu0  ;;  %v6059_v13 = vsub.f32 %v939_v48, %v5857_v19  ;;  %7772 = vst [vmem:[#allocation18_spill] sm:$0xff] %v6063_v63  ;;  %v1129_v38 = vmax.f32 %v6063_v63, %v6050_v0  ;;  %v1126_v2 = vmax.f32 %v1125_v1, %v6047_v55 }
 0x15c   : > { %v5182_v56 = vpop.f32.mrf.mxu1  ;;  %v6056_v21 = vsub.f32 %v743_v3, %v5855_v18  ;;  %v1134_v14 = vmax.f32 %v1133_v27, %v6037_v23  ;;  %v6070_v3 = vsub.f32 %v929_v40, %v5857_v19 }
 0x15d   : > { %7771 = vst [vmem:[#allocation17_spill] sm:$0xff] %v6059_v13  ;;  %v747_v22 = vpop.f32.mrf.mxu0 }
 0x15e   : > { %7770 = vst [vmem:[#allocation16_spill] sm:$0xff] %v6056_v21  ;;  %v944_v37 = vpop.f32.mrf.mxu1  ;;  %v1137_v44 = vmax.f32 %v6053_v12, %v6056_v21  ;;  %1135 = vmax.xlane.f32.xlu1 %v1134_v14  ;;  %7773 = vst [vmem:[#allocation19_spill] sm:$0xff] %v6070_v3  ;;  %v6074_v27 = vsub.f32 %v747_v22, %v5853_v17  ;;  %v1130_v22 = vmax.f32 %v1129_v38, %v6070_v3 }
 0x15f   : > { %v749_v56 = vpop.f32.mrf.mxu0  ;;  %v6080_v23 = vsub.f32 %v944_v37, %v5857_v19 }
 0x160   : > { %v5185_v48 = vpop.f32.mrf.mxu1  ;;  %v6077_v39 = vsub.f32 %v749_v56, %v5855_v18  ;;  %v1138_v14 = vmax.f32 %v1137_v44, %v6059_v13 }
 0x161   : > { %v753_v21 = vpop.f32.mrf.mxu0 }
 0x162   : > { %v949_v0 = vpop.f32.mrf.mxu1  ;;  %v1141_v40 = vmax.f32 %v6074_v27, %v6077_v39  ;;  %1127 = vmax.xlane.f32.xlu1 %v1126_v2  ;;  %1139 = vmax.xlane.f32.xlu0 %v1138_v14  ;;  %v6087_v63 = vsub.f32 %v753_v21, %v5853_v17 }
 0x163   : > { %v755_v48 = vpop.f32.mrf.mxu0  ;;  %v6093_v37 = vsub.f32 %v949_v0, %v5857_v19 }
 0x164   : > { %v5188_v1 = vpop.f32.mrf.mxu1  ;;  %7774 = vst [vmem:[#allocation20_spill] sm:$0xff] %v6087_v63  ;;  %v6090_v56 = vsub.f32 %v755_v48, %v5855_v18  ;;  %v1142_v44 = vmax.f32 %v1141_v40, %v6080_v23 }
 0x165   : > { %7776 = vst [vmem:[#allocation22_spill] sm:$0xff] %v6093_v37  ;;  %v759_v55 = vpop.f32.mrf.mxu0 }
 0x166   : > { %7775 = vst [vmem:[#allocation21_spill] sm:$0xff] %v6090_v56  ;;  %v954_v13 = vpop.f32.mrf.mxu1  ;;  %v1145_v2 = vmax.f32 %v6087_v63, %v6090_v56  ;;  %1131 = vmax.xlane.f32.xlu1 %v1130_v22  ;;  %1143 = vmax.xlane.f32.xlu0 %v1142_v44  ;;  %v6099_v21 = vsub.f32 %v759_v55, %v5853_v17 }
 0x167   : > { %v761_v14 = vpop.f32.mrf.mxu0  ;;  %v6105_v0 = vsub.f32 %v954_v13, %v5857_v19 }
 0x168   : > { %v5191_v38 = vpop.f32.mrf.mxu1  ;;  %7777 = vst [vmem:[#allocation23_spill] sm:$0xff] %v6099_v21  ;;  %v6102_v48 = vsub.f32 %v761_v14, %v5855_v18  ;;  %v1146_v40 = vmax.f32 %v1145_v2, %v6093_v37 }
 0x169   : > { %7779 = vst [vmem:[#allocation25_spill] sm:$0xff] %v6105_v0  ;;  %v765_v1 = vpop.f32.mrf.mxu0 }
 0x16a   : > { %7778 = vst [vmem:[#allocation24_spill] sm:$0xff] %v6102_v48  ;;  %v959_v3 = vpop.f32.mrf.mxu1  ;;  %v1149_v56 = vmax.f32 %v6099_v21, %v6102_v48  ;;  %1147 = vmax.xlane.f32.xlu0 %v1146_v40  ;;  %v6111_v38 = vsub.f32 %v765_v1, %v5853_v17 }
 0x16b   : > { %v767_v22 = vpop.f32.mrf.mxu0  ;;  %v6117_v14 = vsub.f32 %v959_v3, %v5857_v19 }
 0x16c   : > { %v5194_v44 = vpop.f32.mrf.mxu1  ;;  %7780 = vst [vmem:[#allocation26_spill] sm:$0xff] %v6111_v38  ;;  %v6114_v55 = vsub.f32 %v767_v22, %v5855_v18  ;;  %v1150_v13 = vmax.f32 %v1149_v56, %v6105_v0 }
 0x16d   : > { %7782 = vst [vmem:[#allocation28_spill] sm:$0xff] %v6117_v14  ;;  %v771_v2 = vpop.f32.mrf.mxu0 }
 0x16e   : > { %7781 = vst [vmem:[#allocation27_spill] sm:$0xff] %v6114_v55  ;;  %v964_v37 = vpop.f32.mrf.mxu1  ;;  %v1153_v63 = vmax.f32 %v6111_v38, %v6114_v55  ;;  %1151 = vmax.xlane.f32.xlu0 %v1150_v13  ;;  %v6123_v44 = vsub.f32 %v771_v2, %v5853_v17 }
 0x16f   : > { %v773_v40 = vpop.f32.mrf.mxu0  ;;  %v6129_v22 = vsub.f32 %v964_v37, %v5857_v19 }
 0x170   : > { %v5197_v48 = vpop.f32.mrf.mxu1  ;;  %v6126_v1 = vsub.f32 %v773_v40, %v5855_v18  ;;  %v1154_v3 = vmax.f32 %v1153_v63, %v6117_v14 }
 0x171   : > { %v777_v56 = vpop.f32.mrf.mxu0 }
 0x172   : > { %7783 = vst [vmem:[#allocation29_spill] sm:$0xff] %v6126_v1  ;;  %v969_v0 = vpop.f32.mrf.mxu1  ;;  %v1157_v21 = vmax.f32 %v6123_v44, %v6126_v1  ;;  %1155 = vmax.xlane.f32.xlu0 %v1154_v3  ;;  %v6135_v48 = vsub.f32 %v777_v56, %v5853_v17 }
 0x173   : > { %v779_v13 = vpop.f32.mrf.mxu0  ;;  %v6141_v40 = vsub.f32 %v969_v0, %v5857_v19 }
 0x174   : > { %v5200_v55 = vpop.f32.mrf.mxu1  ;;  %v6138_v2 = vsub.f32 %v779_v13, %v5855_v18  ;;  %v1158_v37 = vmax.f32 %v1157_v21, %v6129_v22 }
 0x175   : > { %v783_v63 = vpop.f32.mrf.mxu0 }
 0x176   : > { %7784 = vst [vmem:[#allocation30_spill] sm:$0xff] %v6138_v2  ;;  %v974_v14 = vpop.f32.mrf.mxu1  ;;  %v1161_v38 = vmax.f32 %v6135_v48, %v6138_v2  ;;  %1159 = vmax.xlane.f32.xlu0 %v1158_v37  ;;  %v6147_v55 = vsub.f32 %v783_v63, %v5853_v17  ;;  %v7785_v37 = vlaneseq  ;;  %v6162_v17 = vld [vmem:[#allocation2] sm:$0xff] }
 0x177   : > { %v785_v3 = vpop.f32.mrf.mxu0  ;;  %v6153_v13 = vsub.f32 %v974_v14, %v5857_v19  ;;  %7786 = vst [vmem:[#allocation31_spill] sm:$0xff] %v6162_v17  ;;  %v6185_v14 = vld [vmem:[#allocation2 + $0x8] sm:$0xff] }
 0x178   : > { %v5203_v1 = vpop.f32.mrf.mxu1  ;;  %v6150_v56 = vsub.f32 %v785_v3, %v5855_v18  ;;  %v1162_v0 = vmax.f32 %v1161_v38, %v6141_v40  ;;  %7788 = vst [vmem:[#allocation33_spill] sm:$0xff] %v6185_v14 }
 0x179   : > { %v6160_v1 = vand.u32 127, %v7785_v37 }
 0x17a   : > { %v1165_v21 = vmax.f32 %v6147_v55, %v6150_v56  ;;  %1163 = vmax.xlane.f32.xlu0 %v1162_v0 }
 0x17b   : > { %v6165_v18 = vadd.s32 128, %v6160_v1  ;;  %v6170_v19 = vadd.s32 256, %v6160_v1 }
 0x17c   : > { %v1166_v2 = vmax.f32 %v1165_v21, %v6153_v13 }
 0x17e   : > { %1167 = vmax.xlane.f32.xlu0 %v1166_v2 }
 0x1a7   : > { %v6167_v63 = vpop.xlane.xlu0 %1071 }
 0x1a8   : > { %7787 = vst [vmem:[#allocation32_spill] sm:$0xff] %v6167_v63  ;;  %vm1798_vm3 = vcmp.gt.f32.partialorder %v6167_v63, %v6162_v17  ;;  %vm1173_vm4 = vcmp.eq.f32.partialorder %v5860_v24, %v6167_v63  ;;  %vm1174_vm5 = vcmp.eq.f32.partialorder %v5863_v25, %v6167_v63  ;;  %vm1175_vm6 = vcmp.eq.f32.partialorder %v5866_v26, %v6167_v63 }
 0x1a9   : > { %v1823_v38 = vsel %vm1798_vm3, %v6167_v63, %v6162_v17  ;;  %v1248_v2 = vsel %vm1173_vm4, %v6160_v1, 384  ;;  %v1249_v3 = vsel %vm1174_vm5, %v6165_v18, 384  ;;  %v1250_v25 = vsel %vm1175_vm6, %v6170_v19, 384 }
 0x1aa   : > { %1849 = vst.msk [vmem:[#allocation2] sm:$0xff] %vm228_vm2, %v1823_v38  ;;  %vm1323_vm7 = vcmp.lt.s32.totalorder %v1248_v2, %v1249_v3 }
 0x1ab   : > { %v6190_v24 = vpop.xlane.xlu0 %1075  ;;  %v1324_v26 = vsel %vm1323_vm7, %v1248_v2, %v1249_v3 }
 0x1ac   : > { %7789 = vst [vmem:[#allocation34_spill] sm:$0xff] %v6190_v24  ;;  %vm1799_vm8 = vcmp.gt.f32.partialorder %v6190_v24, %v6185_v14  ;;  %vm1325_vm9 = vcmp.lt.s32.totalorder %v1324_v26, %v1250_v25  ;;  %vm1176_vm10 = vcmp.eq.f32.partialorder %v5871_v32, %v6190_v24  ;;  %vm1177_vm11 = vcmp.eq.f32.partialorder %v5874_v33, %v6190_v24 }
 0x1ad   : > { %v1824_v0 = vsel %vm1799_vm8, %v6190_v24, %v6185_v14  ;;  %v6204_v21 = vsel %vm1325_vm9, %v1324_v26, %v1250_v25  ;;  %vm1178_vm12 = vcmp.eq.f32.partialorder %v5877_v34, %v6190_v24  ;;  %v1251_v38 = vsel %vm1176_vm10, %v6160_v1, 384  ;;  %v6221_v34 = vld [vmem:[#allocation2 + $0x10] sm:$0xff] }
 0x1ae   : > { %1850 = vst.msk [vmem:[#allocation2 + $0x8] sm:$0xff] %vm228_vm2, %v1824_v0  ;;  %v1328_v32 = vshra.s32 %v6204_v21, 16  ;;  %v1252_v2 = vsel %vm1177_vm11, %v6165_v18, 384  ;;  %v1253_v3 = vsel %vm1178_vm12, %v6170_v19, 384  ;;  %7791 = vst [vmem:[#allocation36_spill] sm:$0xff] %v6221_v34 }
 0x1af   : > { %v6212_v33 = vpop.xlane.xlu1 %1079  ;;  %vm1341_vm13 = vcmp.lt.s32.totalorder %v1251_v38, %v1252_v2 }
 0x1b0   : > { %7790 = vst [vmem:[#allocation35_spill] sm:$0xff] %v6212_v33  ;;  %v6215_v37 = vcvt.s32.f32 %v1328_v32  ;;  %v1342_v25 = vsel %vm1341_vm13, %v1251_v38, %v1252_v2  ;;  %vm1179_vm14 = vcmp.eq.f32.partialorder %v5883_v41, %v6212_v33  ;;  %vm1180_vm15 = vcmp.eq.f32.partialorder %v5886_v42, %v6212_v33 }
 0x1b1   : > { %vm1343_vm0 = vcmp.lt.s32.totalorder %v1342_v25, %v1253_v3  ;;  %vm1181_vm1 = vcmp.eq.f32.partialorder %v5889_v43, %v6212_v33  ;;  %v1254_v26 = vsel %vm1179_vm14, %v6160_v1, 384  ;;  %v1255_v0 = vsel %vm1180_vm15, %v6165_v18, 384  ;;  %v6242_v43 = vld [vmem:[#allocation2 + $0x18] sm:$0xff] }
 0x1b2   : > { %1331 = vmin.xlane.f32.xlu1 %v6215_v37  ;;  %v6228_v32 = vsel %vm1343_vm0, %v1342_v25, %v1253_v3  ;;  %vm1359_vm4 = vcmp.lt.s32.totalorder %v1254_v26, %v1255_v0  ;;  %v1256_v42 = vsel %vm1181_vm1, %v6170_v19, 384  ;;  %vm1800_vm5 = vcmp.gt.f32.partialorder %v6212_v33, %v6221_v34  ;;  %7793 = vst [vmem:[#allocation38_spill] sm:$0xff] %v6242_v43  ;;  %v6246_v25 = vld [vmem:[#allocation2 + $0x20] sm:$0xff] }
 0x1b3   : > { %v6230_v38 = vpop.xlane.xlu1 %1083  ;;  %v1346_v41 = vshra.s32 %v6228_v32, 16  ;;  %v1360_v2 = vsel %vm1359_vm4, %v1254_v26, %v1255_v0  ;;  %7794 = vst [vmem:[#allocation39_spill] sm:$0xff] %v6246_v25 }
 0x1b4   : > { %7792 = vst [vmem:[#allocation37_spill] sm:$0xff] %v6230_v38  ;;  %vm1361_vm6 = vcmp.lt.s32.totalorder %v1360_v2, %v1256_v42  ;;  %vm1182_vm7 = vcmp.eq.f32.partialorder %v5895_v50, %v6230_v38  ;;  %vm1183_vm9 = vcmp.eq.f32.partialorder %v5898_v51, %v6230_v38  ;;  %vm1184_vm10 = vcmp.eq.f32.partialorder %v5901_v52, %v6230_v38 }
 0x1b5   : > { %v6244_v3 = vcvt.s32.f32 %v1346_v41  ;;  %v6248_v26 = vsel %vm1361_vm6, %v1360_v2, %v1256_v42  ;;  %v1257_v0 = vsel %vm1182_vm7, %v6160_v1, 384  ;;  %v1258_v14 = vsel %vm1183_vm9, %v6165_v18, 384 }
 0x1b6   : > { %v1364_v50 = vshra.s32 %v6248_v26, 16  ;;  %vm1377_vm11 = vcmp.lt.s32.totalorder %v1257_v0, %v1258_v14  ;;  %v1259_v52 = vsel %vm1184_vm10, %v6170_v19, 384  ;;  %v1825_v41 = vsel %vm1800_vm5, %v6212_v33, %v6221_v34 }
 0x1b7   : > { %1349 = vmin.xlane.f32.xlu0 %v6244_v3  ;;  %v6254_v51 = vpop.xlane.xlu0 %1087  ;;  %v1378_v24 = vsel %vm1377_vm11, %v1257_v0, %v1258_v14  ;;  %vm1801_vm12 = vcmp.gt.f32.partialorder %v6230_v38, %v6242_v43  ;;  %1851 = vst.msk [vmem:[#allocation2 + $0x10] sm:$0xff] %vm228_vm2, %v1825_v41 }
 0x1b8   : > { %7795 = vst [vmem:[#allocation40_spill] sm:$0xff] %v6254_v51  ;;  %vm1802_vm13 = vcmp.gt.f32.partialorder %v6254_v51, %v6246_v25  ;;  %v6266_v42 = vcvt.s32.f32 %v1364_v50  ;;  %vm1379_vm14 = vcmp.lt.s32.totalorder %v1378_v24, %v1259_v52  ;;  %vm1185_vm15 = vcmp.eq.f32.partialorder %v5907_v59, %v6254_v51 }
 0x1b9   : > { %v1827_v14 = vsel %vm1802_vm13, %v6254_v51, %v6246_v25  ;;  %v6276_v2 = vsel %vm1379_vm14, %v1378_v24, %v1259_v52  ;;  %vm1186_vm0 = vcmp.eq.f32.partialorder %v5910_v60, %v6254_v51  ;;  %vm1187_vm1 = vcmp.eq.f32.partialorder %v5913_v61, %v6254_v51  ;;  %v6304_v25 = vld [vmem:[#allocation2 + $0x30] sm:$0xff] }
 0x1ba   : > { %1853 = vst.msk [vmem:[#allocation2 + $0x20] sm:$0xff] %vm228_vm2, %v1827_v14  ;;  %1367 = vmin.xlane.f32.xlu1 %v6266_v42  ;;  %v1382_v59 = vshra.s32 %v6276_v2, 16  ;;  %v1260_v0 = vsel %vm1185_vm15, %v6160_v1, 384  ;;  %v1261_v50 = vsel %vm1186_vm0, %v6165_v18, 384  ;;  %v1262_v24 = vsel %vm1187_vm1, %v6170_v19, 384  ;;  %v6302_v14 = vld [vmem:[#allocation2 + $0x28] sm:$0xff] }
 0x1bb   : > { %v6287_v41 = vpop.xlane.xlu1 %1091  ;;  %vm1395_vm4 = vcmp.lt.s32.totalorder %v1260_v0, %v1261_v50  ;;  %v1826_v60 = vsel %vm1801_vm12, %v6230_v38, %v6242_v43  ;;  %7797 = vst [vmem:[#allocation42_spill] sm:$0xff] %v6302_v14  ;;  %7798 = vst [vmem:[#allocation43_spill] sm:$0xff] %v6304_v25 }
 0x1bc   : > { %7796 = vst [vmem:[#allocation41_spill] sm:$0xff] %v6287_v41  ;;  %v6295_v61 = vcvt.s32.f32 %v1382_v59  ;;  %v1396_v52 = vsel %vm1395_vm4, %v1260_v0, %v1261_v50  ;;  %vm1188_vm6 = vcmp.eq.f32.partialorder %v5919_v5, %v6287_v41  ;;  %vm1189_vm7 = vcmp.eq.f32.partialorder %v5922_v6, %v6287_v41  ;;  %1852 = vst.msk [vmem:[#allocation2 + $0x18] sm:$0xff] %vm228_vm2, %v1826_v60 }
 0x1bd   : > { %vm1397_vm9 = vcmp.lt.s32.totalorder %v1396_v52, %v1262_v24  ;;  %vm1190_vm10 = vcmp.eq.f32.partialorder %v5925_v7, %v6287_v41  ;;  %v1263_v59 = vsel %vm1188_vm6, %v6160_v1, 384  ;;  %v1264_v0 = vsel %vm1189_vm7, %v6165_v18, 384 }
 0x1be   : > { %1385 = vmin.xlane.f32.xlu0 %v6295_v61  ;;  %v6311_v5 = vsel %vm1397_vm9, %v1396_v52, %v1262_v24  ;;  %vm1413_vm11 = vcmp.lt.s32.totalorder %v1263_v59, %v1264_v0  ;;  %v1265_v60 = vsel %vm1190_vm10, %v6170_v19, 384  ;;  %vm1803_vm14 = vcmp.gt.f32.partialorder %v6287_v41, %v6302_v14 }
 0x1bf   : > { %v6313_v6 = vpop.xlane.xlu0 %1095  ;;  %v1400_v50 = vshra.s32 %v6311_v5, 16  ;;  %v1414_v51 = vsel %vm1413_vm11, %v1263_v59, %v1264_v0 }
 0x1c0   : > { %7799 = vst [vmem:[#allocation44_spill] sm:$0xff] %v6313_v6  ;;  %vm1804_vm15 = vcmp.gt.f32.partialorder %v6313_v6, %v6304_v25  ;;  %vm1415_vm0 = vcmp.lt.s32.totalorder %v1414_v51, %v1265_v60  ;;  %vm1191_vm1 = vcmp.eq.f32.partialorder %v5931_v15, %v6313_v6  ;;  %vm1192_vm4 = vcmp.eq.f32.partialorder %v5934_v16, %v6313_v6 }
 0x1c1   : > { %v1829_v7 = vsel %vm1804_vm15, %v6313_v6, %v6304_v25  ;;  %v6330_v24 = vcvt.s32.f32 %v1400_v50  ;;  %v6332_v52 = vsel %vm1415_vm0, %v1414_v51, %v1265_v60  ;;  %vm1193_vm6 = vcmp.eq.f32.partialorder %v5937_v20, %v6313_v6  ;;  %v6358_v25 = vld [vmem:[#allocation2 + $0x40] sm:$0xff] }
 0x1c2   : > { %1855 = vst.msk [vmem:[#allocation2 + $0x30] sm:$0xff] %vm228_vm2, %v1829_v7  ;;  %v1418_v15 = vshra.s32 %v6332_v52, 16  ;;  %v1266_v59 = vsel %vm1191_vm1, %v6160_v1, 384  ;;  %v1267_v16 = vsel %vm1192_vm4, %v6165_v18, 384  ;;  %v1268_v50 = vsel %vm1193_vm6, %v6170_v19, 384  ;;  %v6356_v7 = vld [vmem:[#allocation2 + $0x38] sm:$0xff] }
 0x1c3   : > { %1403 = vmin.xlane.f32.xlu1 %v6330_v24  ;;  %v6341_v0 = vpop.xlane.xlu1 %1099  ;;  %vm1431_vm7 = vcmp.lt.s32.totalorder %v1266_v59, %v1267_v16  ;;  %v1828_v20 = vsel %vm1803_vm14, %v6287_v41, %v6302_v14  ;;  %7801 = vst [vmem:[#allocation46_spill] sm:$0xff] %v6356_v7  ;;  %7802 = vst [vmem:[#allocation47_spill] sm:$0xff] %v6358_v25  ;;  %v7833_v14 = vld [vmem:[#allocation14_spill] sm:$0xff] }
 0x1c4   : > { %7800 = vst [vmem:[#allocation45_spill] sm:$0xff] %v6341_v0  ;;  %v6349_v51 = vcvt.s32.f32 %v1418_v15  ;;  %v1432_v60 = vsel %vm1431_vm7, %v1266_v59, %v1267_v16  ;;  %vm1194_vm9 = vcmp.eq.f32.partialorder %v5943_v30, %v6341_v0  ;;  %vm1195_vm10 = vcmp.eq.f32.partialorder %v5946_v31, %v6341_v0  ;;  %1854 = vst.msk [vmem:[#allocation2 + $0x28] sm:$0xff] %vm228_vm2, %v1828_v20 }
 0x1c5   : > { %vm1433_vm11 = vcmp.lt.s32.totalorder %v1432_v60, %v1268_v50  ;;  %vm1196_vm0 = vcmp.eq.f32.partialorder %v5949_v35, %v6341_v0  ;;  %v1269_v15 = vsel %vm1194_vm9, %v6160_v1, 384  ;;  %v1270_v59 = vsel %vm1195_vm10, %v6165_v18, 384 }
 0x1c6   : > { %1421 = vmin.xlane.f32.xlu0 %v6349_v51  ;;  %v6365_v30 = vsel %vm1433_vm11, %v1432_v60, %v1268_v50  ;;  %vm1449_vm1 = vcmp.lt.s32.totalorder %v1269_v15, %v1270_v59  ;;  %v1271_v20 = vsel %vm1196_vm0, %v6170_v19, 384  ;;  %vm1805_vm4 = vcmp.gt.f32.partialorder %v6341_v0, %v6356_v7  ;;  %v6386_v60 = vld [vmem:[#allocation2 + $0x48] sm:$0xff] }
 0x1c7   : > { %v6367_v31 = vpop.xlane.xlu0 %1103  ;;  %v1436_v16 = vshra.s32 %v6365_v30, 16  ;;  %v1450_v6 = vsel %vm1449_vm1, %v1269_v15, %v1270_v59  ;;  %7804 = vst [vmem:[#allocation49_spill] sm:$0xff] %v6386_v60 }
 0x1c8   : > { %7803 = vst [vmem:[#allocation48_spill] sm:$0xff] %v6367_v31  ;;  %vm7705_vm6 = vcmp.gt.f32.partialorder %v6367_v31, %v6358_v25  ;;  %vm1451_vm7 = vcmp.lt.s32.totalorder %v1450_v6, %v1271_v20  ;;  %vm1197_vm9 = vcmp.eq.f32.partialorder %v5955_v45, %v6367_v31  ;;  %vm1198_vm10 = vcmp.eq.f32.partialorder %v5958_v46, %v6367_v31 }
 0x1c9   : > { %v1831_v35 = vsel %vm7705_vm6, %v6367_v31, %v6358_v25  ;;  %v6384_v50 = vcvt.s32.f32 %v1436_v16  ;;  %v6388_v15 = vsel %vm1451_vm7, %v1450_v6, %v1271_v20  ;;  %vm1199_vm11 = vcmp.eq.f32.partialorder %v5961_v47, %v6367_v31  ;;  %v6417_v31 = vld [vmem:[#allocation2 + $0x50] sm:$0xff] }
 0x1ca   : > { %1857 = vst.msk [vmem:[#allocation2 + $0x40] sm:$0xff] %vm228_vm2, %v1831_v35  ;;  %v1454_v45 = vshra.s32 %v6388_v15, 16  ;;  %v1272_v46 = vsel %vm1197_vm9, %v6160_v1, 384  ;;  %v1273_v59 = vsel %vm1198_vm10, %v6165_v18, 384  ;;  %v1274_v16 = vsel %vm1199_vm11, %v6170_v19, 384  ;;  %7806 = vst [vmem:[#allocation51_spill] sm:$0xff] %v6417_v31 }
 0x1cb   : > { %1439 = vmin.xlane.f32.xlu1 %v6384_v50  ;;  %v6397_v25 = vpop.xlane.xlu1 %1107  ;;  %vm1467_vm0 = vcmp.lt.s32.totalorder %v1272_v46, %v1273_v59  ;;  %v1830_v47 = vsel %vm1805_vm4, %v6341_v0, %v6356_v7 }
 0x1cc   : > { %7805 = vst [vmem:[#allocation50_spill] sm:$0xff] %v6397_v25  ;;  %vm7704_vm1 = vcmp.gt.f32.partialorder %v6397_v25, %v6386_v60  ;;  %v6407_v6 = vcvt.s32.f32 %v1454_v45  ;;  %v1468_v20 = vsel %vm1467_vm0, %v1272_v46, %v1273_v59  ;;  %vm1200_vm7 = vcmp.eq.f32.partialorder %v5967_v57, %v6397_v25  ;;  %1856 = vst.msk [vmem:[#allocation2 + $0x38] sm:$0xff] %vm228_vm2, %v1830_v47 }
 0x1cd   : > { %v1832_v35 = vsel %vm7704_vm1, %v6397_v25, %v6386_v60  ;;  %vm1469_vm9 = vcmp.lt.s32.totalorder %v1468_v20, %v1274_v16  ;;  %vm1201_vm10 = vcmp.eq.f32.partialorder %v5970_v58, %v6397_v25  ;;  %vm1202_vm11 = vcmp.eq.f32.partialorder %v5973_v62, %v6397_v25  ;;  %v7827_v25 = vld [vmem:[#allocation17_spill] sm:$0xff] }
 0x1ce   : > { %1858 = vst.msk [vmem:[#allocation2 + $0x48] sm:$0xff] %vm228_vm2, %v1832_v35  ;;  %1457 = vmin.xlane.f32.xlu0 %v6407_v6  ;;  %v6425_v57 = vsel %vm1469_vm9, %v1468_v20, %v1274_v16  ;;  %v1275_v45 = vsel %vm1200_vm7, %v6160_v1, 384  ;;  %v1276_v46 = vsel %vm1201_vm10, %v6165_v18, 384  ;;  %v1277_v60 = vsel %vm1202_vm11, %v6170_v19, 384  ;;  %v6446_v20 = vld [vmem:[#allocation2 + $0x58] sm:$0xff] }
 0x1cf   : > { %v6429_v59 = vpop.xlane.xlu1 %1111  ;;  %v1472_v47 = vshra.s32 %v6425_v57, 16  ;;  %vm1485_vm0 = vcmp.lt.s32.totalorder %v1275_v45, %v1276_v46  ;;  %7808 = vst [vmem:[#allocation53_spill] sm:$0xff] %v6446_v20 }
 0x1d0   : > { %7807 = vst [vmem:[#allocation52_spill] sm:$0xff] %v6429_v59  ;;  %vm7718_vm1 = vcmp.gt.f32.partialorder %v6429_v59, %v6417_v31  ;;  %v1486_v58 = vsel %vm1485_vm0, %v1275_v45, %v1276_v46  ;;  %vm1203_vm6 = vcmp.eq.f32.partialorder %v5979_v9, %v6429_v59  ;;  %vm1204_vm9 = vcmp.eq.f32.partialorder %v5982_v10, %v6429_v59 }
 0x1d1   : > { %v1833_v62 = vsel %vm7718_vm1, %v6429_v59, %v6417_v31  ;;  %v6444_v16 = vcvt.s32.f32 %v1472_v47  ;;  %vm1487_vm7 = vcmp.lt.s32.totalorder %v1486_v58, %v1277_v60  ;;  %vm1205_vm10 = vcmp.eq.f32.partialorder %v5985_v11, %v6429_v59 }
 0x1d2   : > { %1859 = vst.msk [vmem:[#allocation2 + $0x50] sm:$0xff] %vm228_vm2, %v1833_v62  ;;  %v6451_v9 = vsel %vm1487_vm7, %v1486_v58, %v1277_v60  ;;  %v1278_v10 = vsel %vm1203_vm6, %v6160_v1, 384  ;;  %v1279_v35 = vsel %vm1204_vm9, %v6165_v18, 384  ;;  %v1280_v47 = vsel %vm1205_vm10, %v6170_v19, 384  ;;  %v6473_v62 = vld [vmem:[#allocation2 + $0x60] sm:$0xff] }
 0x1d3   : > { %1475 = vmin.xlane.f32.xlu1 %v6444_v16  ;;  %v6456_v45 = vpop.xlane.xlu1 %1115  ;;  %v1490_v46 = vshra.s32 %v6451_v9, 16  ;;  %vm1503_vm11 = vcmp.lt.s32.totalorder %v1278_v10, %v1279_v35  ;;  %7810 = vst [vmem:[#allocation55_spill] sm:$0xff] %v6473_v62 }
 0x1d4   : > { %7809 = vst [vmem:[#allocation54_spill] sm:$0xff] %v6456_v45  ;;  %vm7707_vm0 = vcmp.gt.f32.partialorder %v6456_v45, %v6446_v20  ;;  %v1504_v11 = vsel %vm1503_vm11, %v1278_v10, %v1279_v35  ;;  %vm1206_vm7 = vcmp.eq.f32.partialorder %v5991_v28, %v6456_v45  ;;  %vm1207_vm6 = vcmp.eq.f32.partialorder %v5994_v29, %v6456_v45 }
 0x1d5   : > { %v1834_v60 = vsel %vm7707_vm0, %v6456_v45, %v6446_v20  ;;  %v6471_v58 = vcvt.s32.f32 %v1490_v46  ;;  %vm1505_vm9 = vcmp.lt.s32.totalorder %v1504_v11, %v1280_v47  ;;  %vm1208_vm10 = vcmp.eq.f32.partialorder %v5997_v36, %v6456_v45 }
 0x1d6   : > { %1860 = vst.msk [vmem:[#allocation2 + $0x58] sm:$0xff] %vm228_vm2, %v1834_v60  ;;  %v6478_v28 = vsel %vm1505_vm9, %v1504_v11, %v1280_v47  ;;  %v1281_v29 = vsel %vm1206_vm7, %v6160_v1, 384  ;;  %v1282_v10 = vsel %vm1207_vm6, %v6165_v18, 384  ;;  %v1283_v20 = vsel %vm1208_vm10, %v6170_v19, 384  ;;  %v6500_v60 = vld [vmem:[#allocation2 + $0x68] sm:$0xff] }
 0x1d7   : > { %1493 = vmin.xlane.f32.xlu0 %v6471_v58  ;;  %v6483_v35 = vpop.xlane.xlu1 %1119  ;;  %v1508_v46 = vshra.s32 %v6478_v28, 16  ;;  %vm1521_vm11 = vcmp.lt.s32.totalorder %v1281_v29, %v1282_v10  ;;  %7812 = vst [vmem:[#allocation57_spill] sm:$0xff] %v6500_v60 }
 0x1d8   : > { %7811 = vst [vmem:[#allocation56_spill] sm:$0xff] %v6483_v35  ;;  %vm7709_vm0 = vcmp.gt.f32.partialorder %v6483_v35, %v6473_v62  ;;  %v1522_v36 = vsel %vm1521_vm11, %v1281_v29, %v1282_v10  ;;  %vm1209_vm9 = vcmp.eq.f32.partialorder %v6003_v49, %v6483_v35  ;;  %vm1210_vm7 = vcmp.eq.f32.partialorder %v6006_v53, %v6483_v35 }
 0x1d9   : > { %v1835_v47 = vsel %vm7709_vm0, %v6483_v35, %v6473_v62  ;;  %v6498_v11 = vcvt.s32.f32 %v1508_v46  ;;  %vm1523_vm6 = vcmp.lt.s32.totalorder %v1522_v36, %v1283_v20  ;;  %vm1211_vm10 = vcmp.eq.f32.partialorder %v6009_v54, %v6483_v35 }
 0x1da   : > { %1861 = vst.msk [vmem:[#allocation2 + $0x60] sm:$0xff] %vm228_vm2, %v1835_v47  ;;  %v6505_v49 = vsel %vm1523_vm6, %v1522_v36, %v1283_v20  ;;  %v1284_v53 = vsel %vm1209_vm9, %v6160_v1, 384  ;;  %v1285_v29 = vsel %vm1210_vm7, %v6165_v18, 384  ;;  %v1286_v62 = vsel %vm1211_vm10, %v6170_v19, 384  ;;  %v7814_v47 = vld [vmem:[#allocation8_spill] sm:$0xff] }
 0x1db   : > { %1511 = vmin.xlane.f32.xlu0 %v6498_v11  ;;  %v6510_v10 = vpop.xlane.xlu1 %1123  ;;  %v1526_v46 = vshra.s32 %v6505_v49, 16  ;;  %vm1539_vm11 = vcmp.lt.s32.totalorder %v1284_v53, %v1285_v29 }
 0x1dc   : > { %7813 = vst [vmem:[#allocation58_spill] sm:$0xff] %v6510_v10  ;;  %vm7712_vm0 = vcmp.gt.f32.partialorder %v6510_v10, %v6500_v60  ;;  %v1540_v54 = vsel %vm1539_vm11, %v1284_v53, %v1285_v29  ;;  %vm1212_vm6 = vcmp.eq.f32.partialorder %v6015_v4, %v6510_v10  ;;  %vm1213_vm9 = vcmp.eq.f32.partialorder %v6018_v8, %v6510_v10 }
 0x1dd   : > { %v1836_v20 = vsel %vm7712_vm0, %v6510_v10, %v6500_v60  ;;  %v6525_v36 = vcvt.s32.f32 %v1526_v46  ;;  %vm1541_vm7 = vcmp.lt.s32.totalorder %v1540_v54, %v1286_v62  ;;  %vm1214_vm10 = vcmp.eq.f32.partialorder %v7814_v47, %v6510_v10 }
 0x1de   : > { %1862 = vst.msk [vmem:[#allocation2 + $0x68] sm:$0xff] %vm228_vm2, %v1836_v20  ;;  %v6530_v53 = vsel %vm1541_vm7, %v1540_v54, %v1286_v62  ;;  %v1287_v4 = vsel %vm1212_vm6, %v6160_v1, 384  ;;  %v1288_v8 = vsel %vm1213_vm9, %v6165_v18, 384  ;;  %v1289_v46 = vsel %vm1214_vm10, %v6170_v19, 384  ;;  %v6545_v20 = vld [vmem:[#allocation2 + $0x80] sm:$0xff] }
 0x1df   : > { %1529 = vmin.xlane.f32.xlu0 %v6525_v36  ;;  %v1544_v29 = vshra.s32 %v6530_v53, 16  ;;  %vm1557_vm11 = vcmp.lt.s32.totalorder %v1287_v4, %v1288_v8  ;;  %7815 = vst [vmem:[#allocation8_spill] sm:$0xff] %v6545_v20 }
 0x1e0   : > { %v1558_v60 = vsel %vm1557_vm11, %v1287_v4, %v1288_v8  ;;  %v7817_v4 = vld [vmem:[#allocation10_spill] sm:$0xff]  ;;  %v7819_v8 = vld [vmem:[#allocation12_spill] sm:$0xff] }
 0x1e1   : > { %v6537_v35 = vcvt.s32.f32 %v1544_v29  ;;  %vm1559_vm0 = vcmp.lt.s32.totalorder %v1558_v60, %v1289_v46 }
 0x1e2   : > { %v6539_v47 = vsel %vm1559_vm0, %v1558_v60, %v1289_v46  ;;  %v7818_v60 = vld [vmem:[#allocation11_spill] sm:$0xff] }
 0x1e3   : > { %1547 = vmin.xlane.f32.xlu0 %v6537_v35  ;;  %v1562_v62 = vshra.s32 %v6539_v47, 16  ;;  %v6563_v46 = vld [vmem:[#allocation2 + $0x70] sm:$0xff] }
 0x1e4   : > { %7820 = vst [vmem:[#allocation10_spill] sm:$0xff] %v6563_v46 }
 0x1e5   : > { %v6543_v54 = vcvt.s32.f32 %v1562_v62  ;;  %v6565_v62 = vld [vmem:[#allocation2 + $0x88] sm:$0xff] }
 0x1e6   : > { %7821 = vst [vmem:[#allocation11_spill] sm:$0xff] %v6565_v62 }
 0x1e7   : > { %1565 = vmin.xlane.f32.xlu0 %v6543_v54  ;;  %v6548_v10 = vpop.xlane.xlu1 %1135 }
 0x1e8   : > { %7816 = vst [vmem:[#allocation59_spill] sm:$0xff] %v6548_v10  ;;  %vm7717_vm6 = vcmp.gt.f32.partialorder %v6548_v10, %v6545_v20  ;;  %vm1221_vm9 = vcmp.eq.f32.partialorder %v7817_v4, %v6548_v10  ;;  %vm1222_vm0 = vcmp.eq.f32.partialorder %v7818_v60, %v6548_v10  ;;  %vm1223_vm7 = vcmp.eq.f32.partialorder %v7819_v8, %v6548_v10 }
 0x1e9   : > { %v1839_v29 = vsel %vm7717_vm6, %v6548_v10, %v6545_v20  ;;  %v1296_v45 = vsel %vm1221_vm9, %v6160_v1, 384  ;;  %v1297_v4 = vsel %vm1222_vm0, %v6165_v18, 384  ;;  %v1298_v31 = vsel %vm1223_vm7, %v6170_v19, 384  ;;  %v6593_v20 = vld [vmem:[#allocation2 + $0x90] sm:$0xff] }
 0x1ea   : > { %1865 = vst.msk [vmem:[#allocation2 + $0x80] sm:$0xff] %vm228_vm2, %v1839_v29  ;;  %vm1611_vm10 = vcmp.lt.s32.totalorder %v1296_v45, %v1297_v4  ;;  %7825 = vst [vmem:[#allocation62_spill] sm:$0xff] %v6593_v20 }
 0x1eb   : > { %v6570_v60 = vpop.xlane.xlu1 %1127  ;;  %v6572_v8 = vpop.xlane.xlu0 %1139  ;;  %v1612_v59 = vsel %vm1611_vm10, %v1296_v45, %v1297_v4  ;;  %v6591_v4 = vld [vmem:[#allocation2 + $0x78] sm:$0xff] }
 0x1ec   : > { %7822 = vst [vmem:[#allocation12_spill] sm:$0xff] %v6570_v60  ;;  %7823 = vst [vmem:[#allocation60_spill] sm:$0xff] %v6572_v8  ;;  %vm7727_vm11 = vcmp.gt.f32.partialorder %v6570_v60, %v6563_v46  ;;  %vm7726_vm6 = vcmp.gt.f32.partialorder %v6572_v8, %v6565_v62  ;;  %vm1613_vm1 = vcmp.lt.s32.totalorder %v1612_v59, %v1298_v31 }
 0x1ed   : > { %vm1224_vm9 = vcmp.eq.f32.partialorder %v6053_v12, %v6572_v8  ;;  %v1837_v29 = vsel %vm7727_vm11, %v6570_v60, %v6563_v46  ;;  %v1840_v45 = vsel %vm7726_vm6, %v6572_v8, %v6565_v62  ;;  %7824 = vst [vmem:[#allocation61_spill] sm:$0xff] %v6591_v4  ;;  %v6595_v10 = vsel %vm1613_vm1, %v1612_v59, %v1298_v31  ;;  %v7826_v12 = vld [vmem:[#allocation16_spill] sm:$0xff] }
 0x1ee   : > { %vm1225_vm0 = vcmp.eq.f32.partialorder %v7826_v12, %v6572_v8  ;;  %1863 = vst.msk [vmem:[#allocation2 + $0x70] sm:$0xff] %vm228_vm2, %v1837_v29  ;;  %1866 = vst.msk [vmem:[#allocation2 + $0x88] sm:$0xff] %vm228_vm2, %v1840_v45  ;;  %v1616_v46 = vshra.s32 %v6595_v10, 16  ;;  %vm1226_vm7 = vcmp.eq.f32.partialorder %v7827_v25, %v6572_v8  ;;  %v1299_v62 = vsel %vm1224_vm9, %v6160_v1, 384  ;;  %v7830_v29 = vld [vmem:[#allocation13_spill] sm:$0xff] }
 0x1ef   : > { %v1300_v7 = vsel %vm1225_vm0, %v6165_v18, 384  ;;  %v6606_v0 = vpop.xlane.xlu1 %1131  ;;  %v6608_v31 = vpop.xlane.xlu0 %1143  ;;  %v1301_v59 = vsel %vm1226_vm7, %v6170_v19, 384  ;;  %vm1215_vm10 = vcmp.eq.f32.partialorder %v7830_v29, %v6570_v60  ;;  %v7831_v45 = vld [vmem:[#allocation9_spill] sm:$0xff]  ;;  %vm1217_vm7 = vcmp.eq.f32.partialorder %v7833_v14, %v6570_v60 }
 0x1f0   : > { %7828 = vst [vmem:[#allocation16_spill] sm:$0xff] %v6606_v0  ;;  %7829 = vst [vmem:[#allocation17_spill] sm:$0xff] %v6608_v31  ;;  %vm1629_vm1 = vcmp.lt.s32.totalorder %v1299_v62, %v1300_v7  ;;  %vm1216_vm6 = vcmp.eq.f32.partialorder %v7831_v45, %v6570_v60  ;;  %vm7734_vm11 = vcmp.gt.f32.partialorder %v6606_v0, %v6591_v4  ;;  %v6619_v25 = vcvt.s32.f32 %v1616_v46  ;;  %v6631_v45 = vld [vmem:[#allocation2 + $0x98] sm:$0xff]  ;;  %v7842_v60 = vld [vmem:[#allocation21_spill] sm:$0xff] }
 0x1f1   : > { %vm7733_vm9 = vcmp.gt.f32.partialorder %v6608_v31, %v6593_v20  ;;  %v1630_v12 = vsel %vm1629_vm1, %v1299_v62, %v1300_v7  ;;  %v1838_v8 = vsel %vm7734_vm11, %v6606_v0, %v6591_v4  ;;  %7832 = vst [vmem:[#allocation13_spill] sm:$0xff] %v6631_v45  ;;  %v1290_v46 = vsel %vm1215_vm10, %v6160_v1, 384 }
 0x1f2   : > { %v1841_v29 = vsel %vm7733_vm9, %v6608_v31, %v6593_v20  ;;  %vm1631_vm0 = vcmp.lt.s32.totalorder %v1630_v12, %v1301_v59  ;;  %1864 = vst.msk [vmem:[#allocation2 + $0x78] sm:$0xff] %vm228_vm2, %v1838_v8  ;;  %1619 = vmin.xlane.f32.xlu0 %v6619_v25  ;;  %v1291_v62 = vsel %vm1216_vm6, %v6165_v18, 384  ;;  %v1292_v20 = vsel %vm1217_vm7, %v6170_v19, 384 }
 0x1f3   : > { %1867 = vst.msk [vmem:[#allocation2 + $0x90] sm:$0xff] %vm228_vm2, %v1841_v29  ;;  %v6638_v7 = vsel %vm1631_vm0, %v1630_v12, %v1301_v59  ;;  %v6643_v4 = vpop.xlane.xlu0 %1147  ;;  %vm1575_vm1 = vcmp.lt.s32.totalorder %v1290_v46, %v1291_v62  ;;  %vm1227_vm9 = vcmp.eq.f32.partialorder %v6074_v27, %v6608_v31  ;;  %vm1228_vm11 = vcmp.eq.f32.partialorder %v6077_v39, %v6608_v31  ;;  %v6662_v27 = vld [vmem:[#allocation2 + $0xa0] sm:$0xff] }
 0x1f4   : > { %7834 = vst [vmem:[#allocation9_spill] sm:$0xff] %v6643_v4  ;;  %v1634_v41 = vshra.s32 %v6638_v7, 16  ;;  %vm7753_vm0 = vcmp.gt.f32.partialorder %v6643_v4, %v6631_v45  ;;  %v1576_v14 = vsel %vm1575_vm1, %v1290_v46, %v1291_v62  ;;  %vm1229_vm6 = vcmp.eq.f32.partialorder %v6080_v23, %v6608_v31  ;;  %7835 = vst [vmem:[#allocation14_spill] sm:$0xff] %v6662_v27  ;;  %v7836_v46 = vld [vmem:[#allocation18_spill] sm:$0xff]  ;;  %v7838_v31 = vld [vmem:[#allocation15_spill] sm:$0xff] }
 0x1f5   : > { %v1302_v8 = vsel %vm1227_vm9, %v6160_v1, 384  ;;  %v1842_v59 = vsel %vm7753_vm0, %v6643_v4, %v6631_v45  ;;  %vm1577_vm10 = vcmp.lt.s32.totalorder %v1576_v14, %v1292_v20  ;;  %v1303_v39 = vsel %vm1228_vm11, %v6165_v18, 384 }
 0x1f6   : > { %v6660_v12 = vcvt.s32.f32 %v1634_v41  ;;  %1868 = vst.msk [vmem:[#allocation2 + $0x98] sm:$0xff] %vm228_vm2, %v1842_v59  ;;  %v6666_v29 = vsel %vm1577_vm10, %v1576_v14, %v1292_v20  ;;  %v1304_v23 = vsel %vm1229_vm6, %v6170_v19, 384  ;;  %vm1647_vm9 = vcmp.lt.s32.totalorder %v1302_v8, %v1303_v39  ;;  %v7839_v59 = vld [vmem:[#allocation19_spill] sm:$0xff] }
 0x1f7   : > { %vm1218_vm7 = vcmp.eq.f32.partialorder %v7836_v46, %v6606_v0  ;;  %v1580_v41 = vshra.s32 %v6666_v29, 16  ;;  %v6673_v62 = vpop.xlane.xlu0 %1151  ;;  %v1648_v45 = vsel %vm1647_vm9, %v1302_v8, %v1303_v39  ;;  %vm1219_vm11 = vcmp.eq.f32.partialorder %v7838_v31, %v6606_v0 }
 0x1f8   : > { %1637 = vmin.xlane.f32.xlu1 %v6660_v12  ;;  %7837 = vst [vmem:[#allocation18_spill] sm:$0xff] %v6673_v62  ;;  %vm1220_vm1 = vcmp.eq.f32.partialorder %v7839_v59, %v6606_v0  ;;  %vm7742_vm6 = vcmp.gt.f32.partialorder %v6673_v62, %v6662_v27  ;;  %vm1649_vm10 = vcmp.lt.s32.totalorder %v1648_v45, %v1304_v23  ;;  %v1293_v20 = vsel %vm1218_vm7, %v6160_v1, 384  ;;  %v6693_v59 = vld [vmem:[#allocation2 + $0xa8] sm:$0xff] }
 0x1f9   : > { %v1294_v14 = vsel %vm1219_vm11, %v6165_v18, 384  ;;  %v6683_v46 = vcvt.s32.f32 %v1580_v41  ;;  %v1843_v8 = vsel %vm7742_vm6, %v6673_v62, %v6662_v27  ;;  %v6690_v31 = vsel %vm1649_vm10, %v1648_v45, %v1304_v23  ;;  %7840 = vst [vmem:[#allocation15_spill] sm:$0xff] %v6693_v59  ;;  %v7841_v41 = vld [vmem:[#allocation20_spill] sm:$0xff]  ;;  %v7844_v23 = vld [vmem:[#allocation22_spill] sm:$0xff] }
 0x1fa   : > { %v1295_v39 = vsel %vm1220_vm1, %v6170_v19, 384  ;;  %1869 = vst.msk [vmem:[#allocation2 + $0xa0] sm:$0xff] %vm228_vm2, %v1843_v8  ;;  %v1652_v0 = vshra.s32 %v6690_v31, 16  ;;  %vm1593_vm9 = vcmp.lt.s32.totalorder %v1293_v20, %v1294_v14  ;;  %vm1230_vm7 = vcmp.eq.f32.partialorder %v7841_v41, %v6643_v4 }
 0x1fb   : > { %vm1231_vm11 = vcmp.eq.f32.partialorder %v7842_v60, %v6643_v4  ;;  %1583 = vmin.xlane.f32.xlu0 %v6683_v46  ;;  %v1594_v27 = vsel %vm1593_vm9, %v1293_v20, %v1294_v14  ;;  %v6702_v45 = vpop.xlane.xlu0 %1155  ;;  %vm1232_vm1 = vcmp.eq.f32.partialorder %v7844_v23, %v6643_v4  ;;  %v1305_v43 = vsel %vm1230_vm7, %v6160_v1, 384  ;;  %v6720_v14 = vld [vmem:[#allocation2 + $0xb0] sm:$0xff]  ;;  %v7848_v4 = vld [vmem:[#allocation25_spill] sm:$0xff] }
 0x1fc   : > { %7843 = vst [vmem:[#allocation19_spill] sm:$0xff] %v6702_v45  ;;  %v1306_v8 = vsel %vm1231_vm11, %v6165_v18, 384  ;;  %v6708_v38 = vcvt.s32.f32 %v1652_v0  ;;  %vm1595_vm10 = vcmp.lt.s32.totalorder %v1594_v27, %v1295_v39  ;;  %vm7749_vm6 = vcmp.gt.f32.partialorder %v6702_v45, %v6693_v59  ;;  %7845 = vst [vmem:[#allocation20_spill] sm:$0xff] %v6720_v14  ;;  %v7846_v0 = vld [vmem:[#allocation23_spill] sm:$0xff] }
 0x1fd   : > { %v1307_v60 = vsel %vm1232_vm1, %v6170_v19, 384  ;;  %v6713_v41 = vsel %vm1595_vm10, %v1594_v27, %v1295_v39  ;;  %v1844_v20 = vsel %vm7749_vm6, %v6702_v45, %v6693_v59  ;;  %vm1665_vm9 = vcmp.lt.s32.totalorder %v1305_v43, %v1306_v8  ;;  %v7847_v39 = vld [vmem:[#allocation24_spill] sm:$0xff] }
 0x1fe   : > { %vm1233_vm7 = vcmp.eq.f32.partialorder %v7846_v0, %v6673_v62  ;;  %1655 = vmin.xlane.f32.xlu1 %v6708_v38  ;;  %v1598_v23 = vshra.s32 %v6713_v41, 16  ;;  %1870 = vst.msk [vmem:[#allocation2 + $0xa8] sm:$0xff] %vm228_vm2, %v1844_v20  ;;  %v1666_v27 = vsel %vm1665_vm9, %v1305_v43, %v1306_v8  ;;  %vm1234_vm11 = vcmp.eq.f32.partialorder %v7847_v39, %v6673_v62  ;;  %v6748_v20 = vld [vmem:[#allocation2 + $0xb8] sm:$0xff] }
 0x1ff   : > { %vm1235_vm1 = vcmp.eq.f32.partialorder %v7848_v4, %v6673_v62  ;;  %vm1667_vm10 = vcmp.lt.s32.totalorder %v1666_v27, %v1307_v60  ;;  %v6731_v59 = vpop.xlane.xlu0 %1159  ;;  %v1308_v34 = vsel %vm1233_vm7, %v6160_v1, 384  ;;  %v1309_v0 = vsel %vm1234_vm11, %v6165_v18, 384 }
 0x200   : > { %v1310_v33 = vsel %vm1235_vm1, %v6170_v19, 384  ;;  %v6736_v17 = vcvt.s32.f32 %v1598_v23  ;;  %v6738_v63 = vsel %vm1667_vm10, %v1666_v27, %v1307_v60  ;;  %vm7752_vm9 = vcmp.gt.f32.partialorder %v6731_v59, %v6720_v14  ;;  %v7849_v23 = vld [vmem:[#allocation26_spill] sm:$0xff]  ;;  %v7850_v60 = vld [vmem:[#allocation27_spill] sm:$0xff]  ;;  %v7851_v27 = vld [vmem:[#allocation28_spill] sm:$0xff] }
 0x201   : > { %vm1683_vm6 = vcmp.lt.s32.totalorder %v1308_v34, %v1309_v0  ;;  %v1670_v43 = vshra.s32 %v6738_v63, 16  ;;  %v1845_v4 = vsel %vm7752_vm9, %v6731_v59, %v6720_v14  ;;  %vm1236_vm7 = vcmp.eq.f32.partialorder %v7849_v23, %v6702_v45 }
 0x202   : > { %v1684_v8 = vsel %vm1683_vm6, %v1308_v34, %v1309_v0  ;;  %1601 = vmin.xlane.f32.xlu0 %v6736_v17  ;;  %1871 = vst.msk [vmem:[#allocation2 + $0xb0] sm:$0xff] %vm228_vm2, %v1845_v4  ;;  %vm1237_vm1 = vcmp.eq.f32.partialorder %v7850_v60, %v6702_v45  ;;  %vm1238_vm10 = vcmp.eq.f32.partialorder %v7851_v27, %v6702_v45  ;;  %v1311_v39 = vsel %vm1236_vm7, %v6160_v1, 384  ;;  %v7854_v60 = vld [vmem:[#allocation29_spill] sm:$0xff] }
 0x203   : > { %vm1685_vm11 = vcmp.lt.s32.totalorder %v1684_v8, %v1310_v33  ;;  %v6759_v14 = vcvt.s32.f32 %v1670_v43  ;;  %v6763_v0 = vpop.xlane.xlu0 %1163  ;;  %v1312_v23 = vsel %vm1237_vm1, %v6165_v18, 384  ;;  %v1313_v62 = vsel %vm1238_vm10, %v6170_v19, 384 }
 0x204   : > { %v6761_v34 = vsel %vm1685_vm11, %v1684_v8, %v1310_v33  ;;  %vm7756_vm6 = vcmp.gt.f32.partialorder %v6763_v0, %v6748_v20  ;;  %vm1701_vm9 = vcmp.lt.s32.totalorder %v1311_v39, %v1312_v23  ;;  %vm1239_vm0 = vcmp.eq.f32.partialorder %v6123_v44, %v6731_v59  ;;  %v6778_v8 = vld [vmem:[#allocation2 + $0xc0] sm:$0xff] }
 0x205   : > { %7852 = vst [vmem:[#allocation21_spill] sm:$0xff] %v6759_v14  ;;  %v1688_v4 = vshra.s32 %v6761_v34, 16  ;;  %1673 = vmin.xlane.f32.xlu1 %v6759_v14  ;;  %v1846_v33 = vsel %vm7756_vm6, %v6763_v0, %v6748_v20  ;;  %v1702_v43 = vsel %vm1701_vm9, %v1311_v39, %v1312_v23  ;;  %7853 = vst [vmem:[#allocation22_spill] sm:$0xff] %v6778_v8  ;;  %v1314_v44 = vsel %vm1239_vm0, %v6160_v1, 384 }
 0x206   : > { %vm1240_vm7 = vcmp.eq.f32.partialorder %v7854_v60, %v6731_v59  ;;  %vm1241_vm11 = vcmp.eq.f32.partialorder %v6129_v22, %v6731_v59  ;;  %1872 = vst.msk [vmem:[#allocation2 + $0xb8] sm:$0xff] %vm228_vm2, %v1846_v33  ;;  %vm1703_vm1 = vcmp.lt.s32.totalorder %v1702_v43, %v1313_v62  ;;  %vm1242_vm10 = vcmp.eq.f32.partialorder %v6135_v48, %v6763_v0  ;;  %v7855_v33 = vld [vmem:[#allocation30_spill] sm:$0xff] }
 0x207   : > { %v6784_v27 = vcvt.s32.f32 %v1688_v4  ;;  %v1315_v45 = vsel %vm1240_vm7, %v6165_v18, 384  ;;  %v6789_v14 = vsel %vm1703_vm1, %v1702_v43, %v1313_v62  ;;  %v6791_v39 = vpop.xlane.xlu0 %1167  ;;  %v1316_v23 = vsel %vm1241_vm11, %v6170_v19, 384 }
 0x208   : > { %vm1719_vm9 = vcmp.lt.s32.totalorder %v1314_v44, %v1315_v45  ;;  %v1706_v22 = vshra.s32 %v6789_v14, 16  ;;  %vm7757_vm6 = vcmp.gt.f32.partialorder %v6791_v39, %v6778_v8  ;;  %vm1243_vm0 = vcmp.eq.f32.partialorder %v7855_v33, %v6763_v0 }
 0x209   : > { %v1720_v4 = vsel %vm1719_vm9, %v1314_v44, %v1315_v45  ;;  %1691 = vmin.xlane.f32.xlu1 %v6784_v27  ;;  %v1847_v62 = vsel %vm7757_vm6, %v6791_v39, %v6778_v8  ;;  %vm1244_vm11 = vcmp.eq.f32.partialorder %v6141_v40, %v6763_v0  ;;  %v1317_v48 = vsel %vm1242_vm10, %v6160_v1, 384 }
 0x20a   : > { %vm1721_vm7 = vcmp.lt.s32.totalorder %v1720_v4, %v1316_v23  ;;  %v6810_v43 = vcvt.s32.f32 %v1706_v22  ;;  %1873 = vst.msk [vmem:[#allocation2 + $0xc0] sm:$0xff] %vm228_vm2, %v1847_v62  ;;  %v1318_v60 = vsel %vm1243_vm0, %v6165_v18, 384  ;;  %v1319_v44 = vsel %vm1244_vm11, %v6170_v19, 384 }
 0x20b   : > { %v6813_v45 = vsel %vm1721_vm7, %v1720_v4, %v1316_v23  ;;  %vm1737_vm1 = vcmp.lt.s32.totalorder %v1317_v48, %v1318_v60  ;;  %vm1245_vm9 = vcmp.eq.f32.partialorder %v6147_v55, %v6791_v39  ;;  %vm1246_vm6 = vcmp.eq.f32.partialorder %v6150_v56, %v6791_v39 }
 0x20c   : > { %v1724_v33 = vshra.s32 %v6813_v45, 16  ;;  %v1738_v40 = vsel %vm1737_vm1, %v1317_v48, %v1318_v60  ;;  %vm1247_vm10 = vcmp.eq.f32.partialorder %v6153_v13, %v6791_v39  ;;  %v1320_v23 = vsel %vm1245_vm9, %v6160_v1, 384 }
 0x20d   : > { %v1321_v22 = vsel %vm1246_vm6, %v6165_v18, 384  ;;  %1709 = vmin.xlane.f32.xlu1 %v6810_v43  ;;  %vm1739_vm0 = vcmp.lt.s32.totalorder %v1738_v40, %v1319_v44  ;;  %v1322_v55 = vsel %vm1247_vm10, %v6170_v19, 384  ;;  %v1327_v19 = vand.u32 65535, %v6204_v21 }
 0x20e   : > { %v6827_v4 = vcvt.s32.f32 %v1724_v33  ;;  %vm1755_vm7 = vcmp.lt.s32.totalorder %v1320_v23, %v1321_v22  ;;  %v6829_v62 = vsel %vm1739_vm0, %v1738_v40, %v1319_v44  ;;  %v5372_v44 = vmov 0  }
 0x20f   : > { %v1756_v8 = vsel %vm1755_vm7, %v1320_v23, %v1321_v22  ;;  %v1742_v56 = vshra.s32 %v6829_v62, 16  ;;  %254 = vst.msk [vmem:[#allocation3] sm:$0xff] %vm228_vm2, %v5372_v44  ;;  %255 = vst.msk [vmem:[#allocation3 + $0x8] sm:$0xff] %vm228_vm2, %v5372_v44  ;;  %5264 = vset.pattern.permute.xlu1 %v5372_v44  ;;  %5265 = vset.pattern.permute.xlu0 %v5372_v44  ;;  %v1329_v33 = vcvt.s32.f32 %v1327_v19  ;;  %v1345_v40 = vand.u32 65535, %v6228_v32 }
 0x210   : > { %vm1757_vm11 = vcmp.lt.s32.totalorder %v1756_v8, %v1322_v55  ;;  %256 = vst.msk [vmem:[#allocation3 + $0x10] sm:$0xff] %vm228_vm2, %v5372_v44  ;;  %257 = vst.msk [vmem:[#allocation3 + $0x18] sm:$0xff] %vm228_vm2, %v5372_v44  ;;  %v1363_v22 = vand.u32 65535, %v6248_v26  ;;  %v1381_v19 = vand.u32 65535, %v6276_v2 }
 0x211   : > { %v6833_v48 = vsel %vm1757_vm11, %v1756_v8, %v1322_v55  ;;  %1727 = vmin.xlane.f32.xlu1 %v6827_v4  ;;  %v6836_v13 = vcvt.s32.f32 %v1742_v56  ;;  %258 = vst.msk [vmem:[#allocation3 + $0x20] sm:$0xff] %vm228_vm2, %v5372_v44  ;;  %259 = vst.msk [vmem:[#allocation3 + $0x28] sm:$0xff] %vm228_vm2, %v5372_v44  ;;  %v1347_v56 = vcvt.s32.f32 %v1345_v40  ;;  %v1417_v40 = vand.u32 65535, %v6332_v52 }
 0x212   : > { %v1760_v18 = vshra.s32 %v6833_v48, 16  ;;  %260 = vst.msk [vmem:[#allocation3 + $0x30] sm:$0xff] %vm228_vm2, %v5372_v44  ;;  %261 = vst.msk [vmem:[#allocation3 + $0x38] sm:$0xff] %vm228_vm2, %v5372_v44  ;;  %v1383_v26 = vcvt.s32.f32 %v1381_v19  ;;  %v1453_v52 = vand.u32 65535, %v6388_v15 }
 0x213   : > { %262 = vst.msk [vmem:[#allocation3 + $0x40] sm:$0xff] %vm228_vm2, %v5372_v44  ;;  %263 = vst.msk [vmem:[#allocation3 + $0x48] sm:$0xff] %vm228_vm2, %v5372_v44 }
 0x214   : > { %v6840_v60 = vcvt.s32.f32 %v1760_v18  ;;  %264 = vst.msk [vmem:[#allocation3 + $0x50] sm:$0xff] %vm228_vm2, %v5372_v44  ;;  %265 = vst.msk [vmem:[#allocation3 + $0x58] sm:$0xff] %vm228_vm2, %v5372_v44 }
 0x215   : > { %1745 = vmin.xlane.f32.xlu1 %v6836_v13  ;;  %266 = vst.msk [vmem:[#allocation3 + $0x60] sm:$0xff] %vm228_vm2, %v5372_v44  ;;  %267 = vst.msk [vmem:[#allocation3 + $0x68] sm:$0xff] %vm228_vm2, %v5372_v44 }
 0x216   : > { %268 = vst.msk [vmem:[#allocation3 + $0x70] sm:$0xff] %vm228_vm2, %v5372_v44  ;;  %269 = vst.msk [vmem:[#allocation3 + $0x78] sm:$0xff] %vm228_vm2, %v5372_v44 }
 0x217   : > { %270 = vst.msk [vmem:[#allocation3 + $0x80] sm:$0xff] %vm228_vm2, %v5372_v44  ;;  %271 = vst.msk [vmem:[#allocation3 + $0x88] sm:$0xff] %vm228_vm2, %v5372_v44 }
 0x218   : > { %272 = vst.msk [vmem:[#allocation3 + $0x90] sm:$0xff] %vm228_vm2, %v5372_v44  ;;  %273 = vst.msk [vmem:[#allocation3 + $0x98] sm:$0xff] %vm228_vm2, %v5372_v44 }
 0x219   : > { %1763 = vmin.xlane.f32.xlu1 %v6840_v60  ;;  %274 = vst.msk [vmem:[#allocation3 + $0xa0] sm:$0xff] %vm228_vm2, %v5372_v44  ;;  %275 = vst.msk [vmem:[#allocation3 + $0xa8] sm:$0xff] %vm228_vm2, %v5372_v44 }
 0x21a   : > { %276 = vst.msk [vmem:[#allocation3 + $0xb0] sm:$0xff] %vm228_vm2, %v5372_v44  ;;  %277 = vst.msk [vmem:[#allocation3 + $0xb8] sm:$0xff] %vm228_vm2, %v5372_v44 }
 0x21b   : > { %278 = vst.msk [vmem:[#allocation3 + $0xc0] sm:$0xff] %vm228_vm2, %v5372_v44  ;;  %v1365_v44 = vcvt.s32.f32 %v1363_v22 }
 0x23b   : > { %v6869_v8 = vpop.xlane.xlu1 %1331 }
 0x23c   : > { %vm1333_vm6 = vcmp.eq.f32.partialorder %v6215_v37, %v6869_v8 }
 0x23d   : > { %v1334_v23 = vsel %vm1333_vm6, %v1329_v33, inf }
 0x23e   : > { %1335 = vmin.xlane.f32.xlu0 %v1334_v23 }
 0x240   : > { %v6875_v55 = vpop.xlane.xlu0 %1349 }
 0x241   : > { %vm1351_vm1 = vcmp.eq.f32.partialorder %v6244_v3, %v6875_v55  ;;  %v1399_v3 = vand.u32 65535, %v6311_v5 }
 0x242   : > { %v1352_v18 = vsel %vm1351_vm1, %v1347_v56, inf  ;;  %v1419_v56 = vcvt.s32.f32 %v1417_v40 }
 0x243   : > { %1353 = vmin.xlane.f32.xlu1 %v1352_v18  ;;  %v6879_v21 = vpop.xlane.xlu1 %1367  ;;  %v1401_v2 = vcvt.s32.f32 %v1399_v3  ;;  %v1489_v3 = vand.u32 65535, %v6451_v9  ;;  %v1525_v9 = vand.u32 65535, %v6505_v49  ;;  %v1561_v49 = vand.u32 65535, %v6539_v47 }
 0x244   : > { %vm1369_vm9 = vcmp.eq.f32.partialorder %v6266_v42, %v6879_v21 }
 0x245   : > { %v1370_v37 = vsel %vm1369_vm9, %v1365_v44, inf  ;;  %v1491_v40 = vcvt.s32.f32 %v1489_v3  ;;  %v1579_v3 = vand.u32 65535, %v6666_v29  ;;  %v1597_v29 = vand.u32 65535, %v6713_v41 }
 0x246   : > { %1371 = vmin.xlane.f32.xlu0 %v1370_v37  ;;  %v1455_v37 = vcvt.s32.f32 %v1453_v52  ;;  %v1687_v41 = vand.u32 65535, %v6761_v34  ;;  %v1723_v34 = vand.u32 65535, %v6813_v45  ;;  %v1759_v45 = vand.u32 65535, %v6833_v48 }
 0x247   : > { %v6884_v32 = vpop.xlane.xlu0 %1385 }
 0x248   : > { %vm1387_vm10 = vcmp.eq.f32.partialorder %v6295_v61, %v6884_v32  ;;  %v1435_v61 = vand.u32 65535, %v6365_v30 }
 0x249   : > { %v1388_v33 = vsel %vm1387_vm10, %v1383_v26, inf }
 0x24a   : > { %1389 = vmin.xlane.f32.xlu1 %v1388_v33  ;;  %v1437_v44 = vcvt.s32.f32 %v1435_v61  ;;  %v1527_v61 = vcvt.s32.f32 %v1525_v9 }
 0x24c   : > { %v6890_v23 = vpop.xlane.xlu1 %1403 }
 0x24d   : > { %vm1405_vm0 = vcmp.eq.f32.partialorder %v6330_v24, %v6890_v23 }
 0x24e   : > { %v1406_v42 = vsel %vm1405_vm0, %v1401_v2, inf  ;;  %v1507_v2 = vand.u32 65535, %v6478_v28  ;;  %v1543_v28 = vand.u32 65535, %v6530_v53 }
 0x24f   : > { %1407 = vmin.xlane.f32.xlu0 %v1406_v42  ;;  %v6894_v22 = vpop.xlane.xlu0 %1421 }
 0x250   : > { %vm1423_vm7 = vcmp.eq.f32.partialorder %v6349_v51, %v6894_v22  ;;  %v1471_v51 = vand.u32 65535, %v6425_v57  ;;  %v1509_v42 = vcvt.s32.f32 %v1507_v2  ;;  %v1545_v52 = vcvt.s32.f32 %v1543_v28 }
 0x251   : > { %v1424_v5 = vsel %vm1423_vm7, %v1419_v56, inf }
 0x252   : > { %1425 = vmin.xlane.f32.xlu1 %v1424_v5  ;;  %v1473_v15 = vcvt.s32.f32 %v1471_v51 }
 0x254   : > { %v6900_v18 = vpop.xlane.xlu1 %1439 }
 0x255   : > { %vm1441_vm11 = vcmp.eq.f32.partialorder %v6384_v50, %v6900_v18 }
 0x256   : > { %v1442_v24 = vsel %vm1441_vm11, %v1437_v44, inf }
 0x257   : > { %1443 = vmin.xlane.f32.xlu0 %v1442_v24  ;;  %v6904_v19 = vpop.xlane.xlu0 %1457  ;;  %v1563_v24 = vcvt.s32.f32 %v1561_v49 }
 0x258   : > { %vm1459_vm6 = vcmp.eq.f32.partialorder %v6407_v6, %v6904_v19 }
 0x259   : > { %v1460_v30 = vsel %vm1459_vm6, %v1455_v37, inf }
 0x25a   : > { %1461 = vmin.xlane.f32.xlu1 %v1460_v30 }
 0x25c   : > { %v6909_v26 = vpop.xlane.xlu1 %1475 }
 0x25d   : > { %vm1477_vm1 = vcmp.eq.f32.partialorder %v6444_v16, %v6909_v26 }
 0x25e   : > { %v1478_v50 = vsel %vm1477_vm1, %v1473_v15, inf }
 0x25f   : > { %1479 = vmin.xlane.f32.xlu0 %v1478_v50 }
 0x260   : > { %v6914_v33 = vpop.xlane.xlu0 %1493 }
 0x261   : > { %vm1495_vm9 = vcmp.eq.f32.partialorder %v6471_v58, %v6914_v33 }
 0x262   : > { %v1496_v6 = vsel %vm1495_vm9, %v1491_v40, inf  ;;  %v1581_v40 = vcvt.s32.f32 %v1579_v3  ;;  %v1374_v3 = vcvt.f32.s32 %v6879_v21  ;;  %v1482_v21 = vcvt.f32.s32 %v6909_v26 }
 0x263   : > { %1497 = vmin.xlane.f32.xlu1 %v1496_v6 }
 0x264   : > { %v6919_v57 = vpop.xlane.xlu0 %1511 }
 0x265   : > { %vm1513_vm10 = vcmp.eq.f32.partialorder %v6498_v11, %v6919_v57 }
 0x266   : > { %v1514_v16 = vsel %vm1513_vm10, %v1509_v42, inf  ;;  %v1599_v42 = vcvt.s32.f32 %v1597_v29  ;;  %v1901_v29 = vld [vmem:[#allocation3] sm:$0xff] }
 0x267   : > { %1515 = vmin.xlane.f32.xlu1 %v1514_v16 }
 0x268   : > { %v6924_v56 = vpop.xlane.xlu0 %1529 }
 0x269   : > { %vm1531_vm0 = vcmp.eq.f32.partialorder %v6525_v36, %v6924_v56  ;;  %v1615_v36 = vand.u32 65535, %v6595_v10  ;;  %v1651_v10 = vand.u32 65535, %v6690_v31  ;;  %v1669_v31 = vand.u32 65535, %v6738_v63 }
 0x26a   : > { %v1532_v58 = vsel %vm1531_vm0, %v1527_v61, inf  ;;  %v7856_v61 = vld [vmem:[#allocation21_spill] sm:$0xff]  ;;  %v1689_v63 = vcvt.s32.f32 %v1687_v41 }
 0x26b   : > { %1533 = vmin.xlane.f32.xlu1 %v1532_v58  ;;  %v1617_v51 = vcvt.s32.f32 %v1615_v36  ;;  %v1653_v2 = vcvt.s32.f32 %v1651_v10  ;;  %v1671_v16 = vcvt.s32.f32 %v1669_v31  ;;  %v1705_v58 = vand.u32 65535, %v6789_v14 }
 0x26c   : > { %v6929_v5 = vpop.xlane.xlu0 %1547  ;;  %v1741_v14 = vand.u32 65535, %v6829_v62 }
 0x26d   : > { %vm1549_vm7 = vcmp.eq.f32.partialorder %v6537_v35, %v6929_v5  ;;  %v1633_v35 = vand.u32 65535, %v6638_v7  ;;  %v1707_v49 = vcvt.s32.f32 %v1705_v58 }
 0x26e   : > { %v1550_v11 = vsel %vm1549_vm7, %v1545_v52, inf }
 0x26f   : > { %1551 = vmin.xlane.f32.xlu1 %v1550_v11  ;;  %v1635_v15 = vcvt.s32.f32 %v1633_v35 }
 0x270   : > { %v6934_v44 = vpop.xlane.xlu0 %1565 }
 0x271   : > { %vm1567_vm11 = vcmp.eq.f32.partialorder %v6543_v54, %v6934_v44 }
 0x272   : > { %v1568_v53 = vsel %vm1567_vm11, %v1563_v24, inf }
 0x273   : > { %1569 = vmin.xlane.f32.xlu1 %v1568_v53  ;;  %v1725_v53 = vcvt.s32.f32 %v1723_v34 }
 0x27b   : > { %v6939_v37 = vpop.xlane.xlu0 %1619 }
 0x27c   : > { %vm1621_vm6 = vcmp.eq.f32.partialorder %v6619_v25, %v6939_v37 }
 0x27d   : > { %v1622_v47 = vsel %vm1621_vm6, %v1617_v51, inf  ;;  %v1743_v51 = vcvt.s32.f32 %v1741_v14 }
 0x27e   : > { %1623 = vmin.xlane.f32.xlu1 %v1622_v47  ;;  %v1761_v47 = vcvt.s32.f32 %v1759_v45  ;;  %v7859_v45 = vld [vmem:[#allocation7_spill] sm:$0xff] }
 0x281   : > { %v6944_v30 = vpop.xlane.xlu1 %1637 }
 0x282   : > { %vm1639_vm1 = vcmp.eq.f32.partialorder %v6660_v12, %v6944_v30 }
 0x283   : > { %v1640_v54 = vsel %vm1639_vm1, %v1635_v15, inf  ;;  %v1356_v15 = vcvt.f32.s32 %v6875_v55 }
 0x284   : > { %1641 = vmin.xlane.f32.xlu0 %v1640_v54  ;;  %v6950_v50 = vpop.xlane.xlu0 %1583 }
 0x285   : > { %vm1585_vm9 = vcmp.eq.f32.partialorder %v6683_v46, %v6950_v50  ;;  %v1357_v55 = vshll.u32 %v1356_v15, 16 }
 0x286   : > { %v1586_v25 = vsel %vm1585_vm9, %v1581_v40, inf }
 0x287   : > { %1587 = vmin.xlane.f32.xlu1 %v1586_v25  ;;  %v6954_v7 = vpop.xlane.xlu1 %1655  ;;  %v1392_v25 = vcvt.f32.s32 %v6884_v32  ;;  %v1536_v32 = vcvt.f32.s32 %v6924_v56  ;;  %v1572_v56 = vcvt.f32.s32 %v6934_v44  ;;  %v1644_v44 = vcvt.f32.s32 %v6944_v30 }
 0x288   : > { %vm1657_vm10 = vcmp.eq.f32.partialorder %v6708_v38, %v6954_v7 }
 0x289   : > { %v1658_v12 = vsel %vm1657_vm10, %v1653_v2, inf  ;;  %v1410_v2 = vcvt.f32.s32 %v6890_v23 }
 0x28a   : > { %1659 = vmin.xlane.f32.xlu0 %v1658_v12  ;;  %v1446_v12 = vcvt.f32.s32 %v6900_v18  ;;  %v1393_v18 = vshll.u32 %v1392_v25, 16 }
 0x28b   : > { %v6960_v6 = vpop.xlane.xlu0 %1601 }
 0x28c   : > { %vm1603_vm0 = vcmp.eq.f32.partialorder %v6736_v17, %v6960_v6 }
 0x28d   : > { %v1604_v46 = vsel %vm1603_vm0, %v1599_v42, inf  ;;  %v1375_v42 = vshll.u32 %v1374_v3, 16  ;;  %v1903_v3 = vld [vmem:[#allocation3 + $0x10] sm:$0xff] }
 0x28e   : > { %1605 = vmin.xlane.f32.xlu1 %v1604_v46  ;;  %v6964_v9 = vpop.xlane.xlu1 %1673  ;;  %v1500_v46 = vcvt.f32.s32 %v6914_v33  ;;  %v7014_v33 = vshll.u32 %v1446_v12, 16 }
 0x28f   : > { %vm1675_vm7 = vcmp.eq.f32.partialorder %v7856_v61, %v6964_v9  ;;  %v1680_v30 = vcvt.f32.s32 %v6964_v9  ;;  %v1904_v9 = vld [vmem:[#allocation3 + $0x18] sm:$0xff] }
 0x290   : > { %v1676_v38 = vsel %vm1675_vm7, %v1671_v16, inf  ;;  %v1518_v16 = vcvt.f32.s32 %v6919_v57  ;;  %v7021_v34 = vshll.u32 %v1500_v46, 16 }
 0x291   : > { %1677 = vmin.xlane.f32.xlu0 %v1676_v38 }
 0x292   : > { %v6969_v28 = vpop.xlane.xlu1 %1691  ;;  %v7024_v14 = vshll.u32 %v1518_v16, 16  ;;  %v7064_v16 = vshll.u32 %v1680_v30, 16 }
 0x293   : > { %vm1693_vm11 = vcmp.eq.f32.partialorder %v6784_v27, %v6969_v28 }
 0x294   : > { %v1694_v17 = vsel %vm1693_vm11, %v1689_v63, inf  ;;  %v7008_v63 = vshll.u32 %v1410_v2, 16 }
 0x295   : > { %1695 = vmin.xlane.f32.xlu0 %v1694_v17  ;;  %v1902_v17 = vld [vmem:[#allocation3 + $0x8] sm:$0xff] }
 0x296   : > { %v6974_v52 = vpop.xlane.xlu1 %1709 }
 0x297   : > { %vm1711_vm6 = vcmp.eq.f32.partialorder %v6810_v43, %v6974_v52  ;;  %v1716_v25 = vcvt.f32.s32 %v6974_v52 }
 0x298   : > { %v1712_v11 = vsel %vm1711_vm6, %v1707_v49, inf  ;;  %v7019_v49 = vshll.u32 %v1482_v21, 16 }
 0x299   : > { %1713 = vmin.xlane.f32.xlu0 %v1712_v11  ;;  %v1626_v11 = vcvt.f32.s32 %v6939_v37 }
 0x29a   : > { %v6979_v24 = vpop.xlane.xlu1 %1727 }
 0x29b   : > { %vm1729_vm1 = vcmp.eq.f32.partialorder %v6827_v4, %v6979_v24  ;;  %v1338_v4 = vcvt.f32.s32 %v6869_v8  ;;  %v1464_v8 = vcvt.f32.s32 %v6904_v19  ;;  %v1554_v19 = vcvt.f32.s32 %v6929_v5 }
 0x29c   : > { %v1730_v27 = vsel %vm1729_vm1, %v1725_v53, inf }
 0x29d   : > { %1731 = vmin.xlane.f32.xlu0 %v1730_v27  ;;  %v1339_v54 = vshll.u32 %v1338_v4, 16  ;;  %v7016_v57 = vshll.u32 %v1464_v8, 16  ;;  %v7026_v27 = vshll.u32 %v1536_v32, 16 }
 0x29e   : > { %v6984_v36 = vpop.xlane.xlu1 %1745 }
 0x29f   : > { %vm1747_vm9 = vcmp.eq.f32.partialorder %v6836_v13, %v6984_v36  ;;  %v5373_v13 = vmov 1966171168  }
 0x2a0   : > { %v1748_v43 = vsel %vm1747_vm9, %v1743_v51, inf  ;;  %v2006_v40 = vunpack.c.l.s4 %v5373_v13 }
 0x2a1   : > { %1749 = vmin.xlane.f32.xlu0 %v1748_v43 }
 0x2a2   : > { %v6989_v35 = vpop.xlane.xlu1 %1763  ;;  %v2007_v38 = vunpack.c.0.s8 %v2006_v40  ;;  %v7043_v40 = vshll.u32 %v1626_v11, 16 }
 0x2a3   : > { %vm1765_vm10 = vcmp.eq.f32.partialorder %v6840_v60, %v6989_v35  ;;  %v1428_v60 = vcvt.f32.s32 %v6894_v22 }
 0x2a4   : > { %v1766_v62 = vsel %vm1765_vm10, %v1761_v47, inf  ;;  %v7029_v43 = vsub.s32 %v2007_v38, %v7859_v45  ;;  %v7031_v47 = vshll.u32 %v1554_v19, 16 }
 0x2a5   : > { %1767 = vmin.xlane.f32.xlu0 %v1766_v62  ;;  %v7012_v58 = vshll.u32 %v1428_v60, 16  ;;  %v1590_v62 = vcvt.f32.s32 %v6950_v50  ;;  %v1698_v50 = vcvt.f32.s32 %v6969_v28  ;;  %v1752_v60 = vcvt.f32.s32 %v6984_v36 }
 0x2a6   : > { %v1770_v36 = vcvt.f32.s32 %v6989_v35 }
 0x2a7   : > { %v7066_v32 = vshll.u32 %v1698_v50, 16  ;;  %v7073_v38 = vshll.u32 %v1752_v60, 16 }
 0x2c7   : > { %v1336_v48 = vpop.xlane.xlu0 %1335 }
 0x2c8   : > { %v1337_v10 = vcvt.f32.s32 %v1336_v48  ;;  %v7038_v48 = vshll.u32 %v1572_v56, 16 }
 0x2ca   : > { %v1340_v31 = vadd.s32 %v1339_v54, %v1337_v10  ;;  %v1662_v54 = vcvt.f32.s32 %v6954_v7  ;;  %v1608_v10 = vcvt.f32.s32 %v6960_v6 }
 0x2cc   : > { %v1926_v61 = vsel %vm1798_vm3, %v1340_v31, %v1901_v29  ;;  %v1354_v22 = vpop.xlane.xlu1 %1353  ;;  %v1734_v29 = vcvt.f32.s32 %v6979_v24  ;;  %v7059_v21 = vshll.u32 %v1662_v54, 16  ;;  %v7061_v24 = vshll.u32 %v1608_v10, 16 }
 0x2cd   : > { %1951 = vst.msk [vmem:[#allocation3] sm:$0xff] %vm228_vm2, %v1926_v61  ;;  %v1355_v26 = vcvt.f32.s32 %v1354_v22  ;;  %v7069_v61 = vshll.u32 %v1716_v25, 16 }
 0x2ce   : > { %v7071_v22 = vshll.u32 %v1734_v29, 16 }
 0x2cf   : > { %v1358_v53 = vadd.s32 %v1357_v55, %v1355_v26  ;;  %v1372_v5 = vpop.xlane.xlu0 %1371  ;;  %v7053_v55 = vshll.u32 %v1644_v44, 16  ;;  %v1905_v44 = vld [vmem:[#allocation3 + $0x20] sm:$0xff] }
 0x2d0   : > { %v1373_v51 = vcvt.f32.s32 %v1372_v5 }
 0x2d1   : > { %v1927_v37 = vsel %vm1799_vm8, %v1358_v53, %v1902_v17 }
 0x2d2   : > { %1952 = vst.msk [vmem:[#allocation3 + $0x8] sm:$0xff] %vm228_vm2, %v1927_v37  ;;  %v1376_v13 = vadd.s32 %v1375_v42, %v1373_v51  ;;  %v7055_v42 = vshll.u32 %v1590_v62, 16  ;;  %v7081_v51 = vshll.u32 %v1770_v36, 16 }
 0x2d3   : > { %v1390_v2 = vpop.xlane.xlu1 %1389 }
 0x2d4   : > { %v1928_v6 = vsel %vm1800_vm5, %v1376_v13, %v1903_v3  ;;  %v1391_v8 = vcvt.f32.s32 %v1390_v2  ;;  %v1979_v31 = vld [vmem:[#allocation3] sm:$0xff] }
 0x2d5   : > { %1953 = vst.msk [vmem:[#allocation3 + $0x10] sm:$0xff] %vm228_vm2, %v1928_v6  ;;  %v2004_v28 = vcombine.high %v1979_v31, %v1979_v31  ;;  %v2011_v52 = vrot.slane %v1979_v31, %v7029_v43  ;;  %v1906_v6 = vld [vmem:[#allocation3 + $0x28] sm:$0xff] }
 0x2d6   : > { %v1394_v46 = vadd.s32 %v1393_v18, %v1391_v8 }
 0x2d7   : > { %v2018_v41 = vrot.slane %v2004_v28, %v7029_v43  ;;  %v2019_v23 = vcombine.high %v2011_v52, %v2011_v52  ;;  %v2027_v11 = vrot.slane %v2011_v52, %v7029_v43 }
 0x2d8   : > { %v1929_v56 = vsel %vm1801_vm12, %v1394_v46, %v1904_v9  ;;  %v1408_v17 = vpop.xlane.xlu0 %1407 }
 0x2d9   : > { %1954 = vst.msk [vmem:[#allocation3 + $0x18] sm:$0xff] %vm228_vm2, %v1929_v56  ;;  %v1409_v35 = vcvt.f32.s32 %v1408_v17  ;;  %v2020_v18 = vcombine.high %v2018_v41, %v2018_v41  ;;  %v2041_v53 = vrot.slane %v2019_v23, %v7029_v43  ;;  %v1980_v5 = vld [vmem:[#allocation3 + $0x8] sm:$0xff]  ;;  %v2034_v62 = vrot.slane %v2018_v41, %v7029_v43 }
 0x2da   : > { %v2053_v4 = vcombine.high %v1980_v5, %v1980_v5  ;;  %v2060_v15 = vrot.slane %v1980_v5, %v7029_v43 }
 0x2db   : > { %v1412_v37 = vadd.s32 %v7008_v63, %v1409_v35  ;;  %v1426_v3 = vpop.xlane.xlu1 %1425  ;;  %v2048_v54 = vrot.slane %v2020_v18, %v7029_v43  ;;  %v3229_v10 = vcombine.low %v2027_v11, %v2041_v53  ;;  %v4918_v13 = vcombine.high %v2027_v11, %v2041_v53 }
 0x2dc   : > { %v1427_v30 = vcvt.f32.s32 %v1426_v3  ;;  %v2067_v50 = vrot.slane %v2053_v4, %v7029_v43  ;;  %v2068_v25 = vcombine.high %v2060_v15, %v2060_v15  ;;  %v2076_v2 = vrot.slane %v2060_v15, %v7029_v43  ;;  %v1981_v29 = vld [vmem:[#allocation3 + $0x10] sm:$0xff] }
 0x2dd   : > { %v1930_v7 = vsel %vm1802_vm13, %v1412_v37, %v1905_v44  ;;  %v3231_v8 = vcombine.low %v2034_v62, %v2048_v54  ;;  %v4919_v31 = vcombine.high %v2034_v62, %v2048_v54  ;;  %v3239_v63 = vrot.slane %v3229_v10, %v7029_v43  ;;  %v1907_v4 = vld [vmem:[#allocation3 + $0x30] sm:$0xff] }
 0x2de   : > { %1955 = vst.msk [vmem:[#allocation3 + $0x20] sm:$0xff] %vm228_vm2, %v1930_v7  ;;  %v1430_v9 = vadd.s32 %v7012_v58, %v1427_v30  ;;  %v3246_v28 = vrot.slane %v4918_v13, %v7029_v43  ;;  %v2069_v52 = vcombine.high %v2067_v50, %v2067_v50  ;;  %v2083_v36 = vrot.slane %v2067_v50, %v7029_v43 }
 0x2df   : > { %v3253_v46 = vrot.slane %v3231_v8, %v7029_v43  ;;  %v3260_v41 = vrot.slane %v4919_v31, %v7029_v43  ;;  %v2090_v23 = vrot.slane %v2068_v25, %v7029_v43  ;;  %v2102_v19 = vcombine.high %v1981_v29, %v1981_v29  ;;  %v7874_v8 = vld [vmem:[#allocation48_spill] sm:$0xff] }
 0x2e0   : > { %v1931_v17 = vsel %vm1803_vm14, %v1430_v9, %v1906_v6  ;;  %v1444_v35 = vpop.xlane.xlu0 %1443  ;;  %v3261_v18 = vcombine.low %v3239_v63, %v3246_v28  ;;  %v2097_v58 = vrot.slane %v2069_v52, %v7029_v43  ;;  %v2109_v11 = vrot.slane %v1981_v29, %v7029_v43  ;;  %v1982_v7 = vld [vmem:[#allocation3 + $0x18] sm:$0xff] }
 0x2e1   : > { %1956 = vst.msk [vmem:[#allocation3 + $0x28] sm:$0xff] %vm228_vm2, %v1931_v17  ;;  %v1445_v53 = vcvt.f32.s32 %v1444_v35  ;;  %v3262_v5 = vcombine.low %v3253_v46, %v3260_v41  ;;  %v3278_v44 = vcombine.low %v2076_v2, %v2090_v23  ;;  %v4920_v62 = vcombine.high %v2076_v2, %v2090_v23  ;;  %v1908_v63 = vld [vmem:[#allocation3 + $0x38] sm:$0xff] }
 0x2e2   : > { %v3269_v15 = vrot.slane %v3261_v18, %v7029_v43  ;;  %v3280_v37 = vcombine.low %v2083_v36, %v2097_v58  ;;  %v4921_v3 = vcombine.high %v2083_v36, %v2097_v58  ;;  %v2116_v54 = vrot.slane %v2102_v19, %v7029_v43 }
 0x2e3   : > { %v1448_v10 = vadd.s32 %v7014_v33, %v1445_v53  ;;  %v1462_v13 = vpop.xlane.xlu1 %1461  ;;  %v3276_v30 = vrot.slane %v3262_v5, %v7029_v43  ;;  %v3288_v50 = vrot.slane %v3278_v44, %v7029_v43  ;;  %v3295_v25 = vrot.slane %v4920_v62, %v7029_v43 }
 0x2e4   : > { %v1463_v29 = vcvt.f32.s32 %v1462_v13  ;;  %v3302_v60 = vrot.slane %v3280_v37, %v7029_v43  ;;  %v3309_v2 = vrot.slane %v4921_v3, %v7029_v43  ;;  %v2117_v12 = vcombine.high %v2109_v11, %v2109_v11  ;;  %v1909_v37 = vld [vmem:[#allocation3 + $0x40] sm:$0xff] }
 0x2e5   : > { %v1932_v31 = vsel %vm1804_vm15, %v1448_v10, %v1907_v4  ;;  %v3277_v33 = vcombine.low %v3269_v15, %v3276_v30  ;;  %v3310_v9 = vcombine.low %v3288_v50, %v3295_v25  ;;  %v2118_v28 = vcombine.high %v2116_v54, %v2116_v54  ;;  %v1983_v52 = vld [vmem:[#allocation3 + $0x20] sm:$0xff] }
 0x2e6   : > { %1957 = vst.msk [vmem:[#allocation3 + $0x30] sm:$0xff] %vm228_vm2, %v1932_v31  ;;  %v1466_v36 = vadd.s32 %v7016_v57, %v1463_v29  ;;  %v3311_v46 = vcombine.low %v3302_v60, %v3309_v2  ;;  %v2125_v41 = vrot.slane %v2109_v11, %v7029_v43  ;;  %v2132_v23 = vrot.slane %v2116_v54, %v7029_v43  ;;  %v7875_v31 = vld [vmem:[#allocation47_spill] sm:$0xff] }
 0x2e7   : > { %4455 = vperm.xlu1 %5264, %v3277_v33   ;;  %v3318_v19 = vrot.slane %v3310_v9, %v7029_v43  ;;  %v2139_v26 = vrot.slane %v2117_v12, %v7029_v43  ;;  %v2146_v56 = vrot.slane %v2118_v28, %v7029_v43  ;;  %v2151_v17 = vcombine.high %v1982_v7, %v1982_v7  ;;  %v1910_v28 = vld [vmem:[#allocation3 + $0x48] sm:$0xff] }
 0x2e8   : > { %v1933_v58 = vsel %vm1805_vm4, %v1466_v36, %v1908_v63  ;;  %v1480_v53 = vpop.xlane.xlu0 %1479  ;;  %v3325_v57 = vrot.slane %v3311_v46, %v7029_v43  ;;  %v2158_v5 = vrot.slane %v1982_v7, %v7029_v43  ;;  %v2200_v11 = vcombine.high %v1983_v52, %v1983_v52 }
 0x2e9   : > { %1958 = vst.msk [vmem:[#allocation3 + $0x38] sm:$0xff] %vm228_vm2, %v1933_v58  ;;  %v1481_v44 = vcvt.f32.s32 %v1480_v53  ;;  %v3327_v62 = vcombine.low %v2125_v41, %v2139_v26  ;;  %v4922_v4 = vcombine.high %v2125_v41, %v2139_v26  ;;  %v3329_v15 = vcombine.low %v2132_v23, %v2146_v56 }
 0x2ea   : > { %v3326_v3 = vcombine.low %v3318_v19, %v3325_v57  ;;  %v4923_v54 = vcombine.high %v2132_v23, %v2146_v56  ;;  %v2165_v10 = vrot.slane %v2151_v17, %v7029_v43  ;;  %v2166_v13 = vcombine.high %v2158_v5, %v2158_v5 }
 0x2eb   : > { %v1484_v30 = vadd.s32 %v7019_v49, %v1481_v44  ;;  %v3337_v50 = vrot.slane %v3327_v62, %v7029_v43  ;;  %v3344_v25 = vrot.slane %v4922_v4, %v7029_v43  ;;  %v3351_v29 = vrot.slane %v3329_v15, %v7029_v43  ;;  %v7878_v44 = vld [vmem:[#allocation49_spill] sm:$0xff]  ;;  %v1911_v15 = vld [vmem:[#allocation3 + $0x50] sm:$0xff] }
 0x2ec   : > { %4458 = vperm.xlu0 %5265, %v3326_v3   ;;  %v1498_v60 = vpop.xlane.xlu1 %1497  ;;  %v3358_v2 = vrot.slane %v4923_v54, %v7029_v43  ;;  %v2167_v12 = vcombine.high %v2165_v10, %v2165_v10  ;;  %v2174_v7 = vrot.slane %v2158_v5, %v7029_v43  ;;  %v2181_v6 = vrot.slane %v2165_v10, %v7029_v43  ;;  %v7877_v5 = vld [vmem:[#allocation50_spill] sm:$0xff] }
 0x2ed   : > { %vm7876_vm3 = vcmp.gt.f32.partialorder %v7874_v8, %v7875_v31  ;;  %v1499_v49 = vcvt.f32.s32 %v1498_v60  ;;  %v3359_v33 = vcombine.low %v3337_v50, %v3344_v25  ;;  %v2188_v9 = vrot.slane %v2166_v13, %v7029_v43  ;;  %v7881_v8 = vld [vmem:[#allocation51_spill] sm:$0xff] }
 0x2ee   : > { %v1934_v63 = vsel %vm7876_vm3, %v1484_v30, %v1909_v37  ;;  %v3360_v36 = vcombine.low %v3351_v29, %v3358_v2  ;;  %v2195_v46 = vrot.slane %v2167_v12, %v7029_v43  ;;  %v2207_v41 = vrot.slane %v1983_v52, %v7029_v43 }
 0x2ef   : > { %1959 = vst.msk [vmem:[#allocation3 + $0x40] sm:$0xff] %vm228_vm2, %v1934_v63  ;;  %v2214_v23 = vrot.slane %v2200_v11, %v7029_v43  ;;  %v1502_v19 = vadd.s32 %v7021_v34, %v1499_v49  ;;  %v3367_v26 = vrot.slane %v3359_v33, %v7029_v43  ;;  %v3376_v56 = vcombine.low %v2174_v7, %v2188_v9  ;;  %v1984_v34 = vld [vmem:[#allocation3 + $0x28] sm:$0xff]  ;;  %v1912_v33 = vld [vmem:[#allocation3 + $0x58] sm:$0xff] }
 0x2f0   : > { %v4924_v17 = vcombine.high %v2174_v7, %v2188_v9  ;;  %v1516_v35 = vpop.xlane.xlu1 %1515  ;;  %v3374_v18 = vrot.slane %v3360_v36, %v7029_v43  ;;  %v3378_v58 = vcombine.low %v2181_v6, %v2195_v46  ;;  %v4925_v53 = vcombine.high %v2181_v6, %v2195_v46  ;;  %v7880_v6 = vld [vmem:[#allocation52_spill] sm:$0xff] }
 0x2f1   : > { %v2215_v57 = vcombine.high %v2207_v41, %v2207_v41  ;;  %vm7879_vm8 = vcmp.gt.f32.partialorder %v7877_v5, %v7878_v44  ;;  %v1517_v4 = vcvt.f32.s32 %v1516_v35  ;;  %v3386_v52 = vrot.slane %v3376_v56, %v7029_v43  ;;  %v7884_v5 = vld [vmem:[#allocation53_spill] sm:$0xff] }
 0x2f2   : > { %v1935_v62 = vsel %vm7879_vm8, %v1502_v19, %v1910_v28  ;;  %v3393_v11 = vrot.slane %v4924_v17, %v7029_v43  ;;  %v3375_v37 = vcombine.low %v3367_v26, %v3374_v18  ;;  %v3400_v3 = vrot.slane %v3378_v58, %v7029_v43 }
 0x2f3   : > { %1960 = vst.msk [vmem:[#allocation3 + $0x48] sm:$0xff] %vm228_vm2, %v1935_v62  ;;  %v3407_v54 = vrot.slane %v4925_v53, %v7029_v43  ;;  %v2216_v10 = vcombine.high %v2214_v23, %v2214_v23  ;;  %v1520_v13 = vadd.s32 %v7024_v14, %v1517_v4  ;;  %v2223_v50 = vrot.slane %v2207_v41, %v7029_v43  ;;  %v1985_v53 = vld [vmem:[#allocation3 + $0x30] sm:$0xff] }
 0x2f4   : > { %v3408_v30 = vcombine.low %v3386_v52, %v3393_v11  ;;  %v2230_v25 = vrot.slane %v2214_v23, %v7029_v43  ;;  %4461 = vperm.xlu1 %5264, %v3375_v37   ;;  %v1534_v29 = vpop.xlane.xlu1 %1533  ;;  %v2237_v2 = vrot.slane %v2215_v57, %v7029_v43  ;;  %v2249_v7 = vcombine.high %v1984_v34, %v1984_v34  ;;  %v7883_v57 = vld [vmem:[#allocation54_spill] sm:$0xff] }
 0x2f5   : > { %v3409_v60 = vcombine.low %v3400_v3, %v3407_v54  ;;  %v2244_v12 = vrot.slane %v2216_v10, %v7029_v43  ;;  %vm7882_vm5 = vcmp.gt.f32.partialorder %v7880_v6, %v7881_v8  ;;  %v1535_v63 = vcvt.f32.s32 %v1534_v29  ;;  %v1913_v52 = vld [vmem:[#allocation3 + $0x60] sm:$0xff] }
 0x2f6   : > { %v1936_v31 = vsel %vm7882_vm5, %v1520_v13, %v1911_v15  ;;  %v3416_v14 = vrot.slane %v3408_v30, %v7029_v43  ;;  %v2256_v49 = vrot.slane %v1984_v34, %v7029_v43  ;;  %v3425_v28 = vcombine.low %v2223_v50, %v2237_v2 }
 0x2f7   : > { %1961 = vst.msk [vmem:[#allocation3 + $0x50] sm:$0xff] %vm228_vm2, %v1936_v31  ;;  %v3423_v9 = vrot.slane %v3409_v60, %v7029_v43  ;;  %v4926_v36 = vcombine.high %v2223_v50, %v2237_v2  ;;  %v3427_v46 = vcombine.low %v2230_v25, %v2244_v12  ;;  %v1538_v41 = vadd.s32 %v7026_v27, %v1535_v63  ;;  %v7886_v2 = vld [vmem:[#allocation56_spill] sm:$0xff] }
 0x2f8   : > { %v4927_v23 = vcombine.high %v2230_v25, %v2244_v12  ;;  %v2263_v19 = vrot.slane %v2249_v7, %v7029_v43  ;;  %v2264_v26 = vcombine.high %v2256_v49, %v2256_v49  ;;  %v1552_v17 = vpop.xlane.xlu1 %1551  ;;  %v3435_v35 = vrot.slane %v3425_v28, %v7029_v43  ;;  %v7887_v12 = vld [vmem:[#allocation55_spill] sm:$0xff] }
 0x2f9   : > { %v3424_v56 = vcombine.low %v3416_v14, %v3423_v9  ;;  %v3442_v18 = vrot.slane %v4926_v36, %v7029_v43  ;;  %v3449_v58 = vrot.slane %v3427_v46, %v7029_v43  ;;  %vm7885_vm12 = vcmp.gt.f32.partialorder %v7883_v57, %v7884_v5  ;;  %v1986_v9 = vld [vmem:[#allocation3 + $0x38] sm:$0xff] }
 0x2fa   : > { %v1937_v44 = vsel %vm7885_vm12, %v1538_v41, %v1912_v33  ;;  %v1553_v62 = vcvt.f32.s32 %v1552_v17  ;;  %v3456_v27 = vrot.slane %v4927_v23, %v7029_v43  ;;  %v2265_v4 = vcombine.high %v2263_v19, %v2263_v19  ;;  %v1987_v17 = vld [vmem:[#allocation3 + $0x40] sm:$0xff] }
 0x2fb   : > { %1962 = vst.msk [vmem:[#allocation3 + $0x58] sm:$0xff] %vm228_vm2, %v1937_v44  ;;  %4464 = vperm.xlu1 %5264, %v3424_v56   ;;  %v3457_v11 = vcombine.low %v3435_v35, %v3442_v18  ;;  %v2272_v34 = vrot.slane %v2256_v49, %v7029_v43  ;;  %v2279_v15 = vrot.slane %v2263_v19, %v7029_v43  ;;  %v7889_v35 = vld [vmem:[#allocation58_spill] sm:$0xff]  ;;  %v7890_v18 = vld [vmem:[#allocation57_spill] sm:$0xff]  ;;  %vm4545_vm5 = vcmask 195712  }
 0x2fc   : > { %v2286_v37 = vrot.slane %v2264_v26, %v7029_v43  ;;  %v1556_v3 = vadd.s32 %v7031_v47, %v1553_v62  ;;  %v3458_v54 = vcombine.low %v3449_v58, %v3456_v27  ;;  %v2293_v10 = vrot.slane %v2265_v4, %v7029_v43  ;;  %v1570_v50 = vpop.xlane.xlu1 %1569  ;;  %v1914_v47 = vld [vmem:[#allocation3 + $0x68] sm:$0xff] }
 0x2fd   : > { %v2298_v13 = vcombine.high %v1985_v53, %v1985_v53  ;;  %v3465_v30 = vrot.slane %v3457_v11, %v7029_v43  ;;  %v2305_v60 = vrot.slane %v1985_v53, %v7029_v43  ;;  %vm7888_vm13 = vcmp.gt.f32.partialorder %v7886_v2, %v7887_v12 }
 0x2fe   : > { %v3474_v25 = vcombine.low %v2272_v34, %v2286_v37  ;;  %v4928_v29 = vcombine.high %v2272_v34, %v2286_v37  ;;  %v1938_v7 = vsel %vm7888_vm13, %v1556_v3, %v1913_v52  ;;  %v3472_v6 = vrot.slane %v3458_v54, %v7029_v43 }
 0x2ff   : > { %v1571_v8 = vcvt.f32.s32 %v1570_v50  ;;  %v3476_v31 = vcombine.low %v2279_v15, %v2293_v10  ;;  %1963 = vst.msk [vmem:[#allocation3 + $0x60] sm:$0xff] %vm228_vm2, %v1938_v7  ;;  %v4929_v63 = vcombine.high %v2279_v15, %v2293_v10  ;;  %v2312_v33 = vrot.slane %v2298_v13, %v7029_v43 }
 0x300   : > { %v3484_v14 = vrot.slane %v3474_v25, %v7029_v43  ;;  %v3491_v49 = vrot.slane %v4928_v29, %v7029_v43  ;;  %v3473_v28 = vcombine.low %v3465_v30, %v3472_v6  ;;  %v2313_v41 = vcombine.high %v2305_v60, %v2305_v60  ;;  %v1988_v25 = vld [vmem:[#allocation3 + $0x48] sm:$0xff] }
 0x301   : > { %v1574_v36 = vadd.s32 %v7038_v48, %v1571_v8  ;;  %v3498_v46 = vrot.slane %v3476_v31, %v7029_v43  ;;  %v3505_v23 = vrot.slane %v4929_v63, %v7029_v43  ;;  %v2314_v26 = vcombine.high %v2312_v33, %v2312_v33 }
 0x302   : > { %v3506_v19 = vcombine.low %v3484_v14, %v3491_v49  ;;  %v2321_v56 = vrot.slane %v2305_v60, %v7029_v43  ;;  %4467 = vperm.xlu1 %5264, %v3473_v28   ;;  %vm7891_vm14 = vcmp.gt.f32.partialorder %v7889_v35, %v7890_v18  ;;  %v2328_v53 = vrot.slane %v2312_v33, %v7029_v43 }
 0x303   : > { %v1939_v58 = vsel %vm7891_vm14, %v1574_v36, %v1914_v47  ;;  %v2335_v57 = vrot.slane %v2313_v41, %v7029_v43  ;;  %v2347_v48 = vcombine.high %v1986_v9, %v1986_v9  ;;  %v3507_v5 = vcombine.low %v3498_v46, %v3505_v23  ;;  %v1917_v41 = vld [vmem:[#allocation3 + $0x80] sm:$0xff] }
 0x304   : > { %1964 = vst.msk [vmem:[#allocation3 + $0x68] sm:$0xff] %vm228_vm2, %v1939_v58  ;;  %v3514_v44 = vrot.slane %v3506_v19, %v7029_v43  ;;  %v2342_v62 = vrot.slane %v2314_v26, %v7029_v43  ;;  %v2354_v27 = vrot.slane %v1986_v9, %v7029_v43  ;;  %v2396_v34 = vcombine.high %v1987_v17, %v1987_v17 }
 0x305   : > { %v3523_v4 = vcombine.low %v2321_v56, %v2335_v57  ;;  %v4930_v52 = vcombine.high %v2321_v56, %v2335_v57  ;;  %v2361_v11 = vrot.slane %v2347_v48, %v7029_v43  ;;  %v3521_v15 = vrot.slane %v3507_v5, %v7029_v43  ;;  %v7892_v48 = vld [vmem:[#allocation59_spill] sm:$0xff]  ;;  %v7893_v5 = vld [vmem:[#allocation8_spill] sm:$0xff] }
 0x306   : > { %v3525_v37 = vcombine.low %v2328_v53, %v2342_v62  ;;  %v4931_v3 = vcombine.high %v2328_v53, %v2342_v62  ;;  %v2362_v54 = vcombine.high %v2354_v27, %v2354_v27  ;;  %v2370_v50 = vrot.slane %v2354_v27, %v7029_v43 }
 0x307   : > { %v3533_v10 = vrot.slane %v3523_v4, %v7029_v43  ;;  %v3540_v13 = vrot.slane %v4930_v52, %v7029_v43  ;;  %v2363_v30 = vcombine.high %v2361_v11, %v2361_v11  ;;  %v3522_v29 = vcombine.low %v3514_v44, %v3521_v15  ;;  %v1624_v31 = vpop.xlane.xlu1 %1623 }
 0x308   : > { %v3547_v60 = vrot.slane %v3525_v37, %v7029_v43  ;;  %v3554_v2 = vrot.slane %v4931_v3, %v7029_v43  ;;  %v2377_v12 = vrot.slane %v2361_v11, %v7029_v43  ;;  %v2384_v6 = vrot.slane %v2362_v54, %v7029_v43 }
 0x309   : > { %v3555_v7 = vcombine.low %v3533_v10, %v3540_v13  ;;  %v2391_v8 = vrot.slane %v2363_v30, %v7029_v43  ;;  %v2403_v47 = vrot.slane %v1987_v17, %v7029_v43  ;;  %4470 = vperm.xlu1 %5264, %v3522_v29   ;;  %v1625_v14 = vcvt.f32.s32 %v1624_v31  ;;  %v1989_v31 = vld [vmem:[#allocation3 + $0x50] sm:$0xff] }
 0x30a   : > { %v3556_v63 = vcombine.low %v3547_v60, %v3554_v2  ;;  %v2410_v49 = vrot.slane %v2396_v34, %v7029_v43  ;;  %v2445_v33 = vcombine.high %v1988_v25, %v1988_v25  ;;  %v3572_v28 = vcombine.low %v2370_v50, %v2384_v6 }
 0x30b   : > { %v3563_v9 = vrot.slane %v3555_v7, %v7029_v43  ;;  %v4932_v36 = vcombine.high %v2370_v50, %v2384_v6  ;;  %v3574_v46 = vcombine.low %v2377_v12, %v2391_v8  ;;  %v4933_v19 = vcombine.high %v2377_v12, %v2391_v8 }
 0x30c   : > { %v3570_v23 = vrot.slane %v3556_v63, %v7029_v43  ;;  %v1628_v26 = vadd.s32 %v7043_v40, %v1625_v14  ;;  %v2411_v56 = vcombine.high %v2403_v47, %v2403_v47  ;;  %v3582_v17 = vrot.slane %v3572_v28, %v7029_v43  ;;  %v1915_v14 = vld [vmem:[#allocation3 + $0x70] sm:$0xff] }
 0x30d   : > { %v3589_v35 = vrot.slane %v4932_v36, %v7029_v43  ;;  %v3596_v18 = vrot.slane %v3574_v46, %v7029_v43  ;;  %v2412_v58 = vcombine.high %v2410_v49, %v2410_v49  ;;  %v3603_v57 = vrot.slane %v4933_v19, %v7029_v43  ;;  %v1642_v27 = vpop.xlane.xlu0 %1641 }
 0x30e   : > { %v3571_v53 = vcombine.low %v3563_v9, %v3570_v23  ;;  %vm7894_vm15 = vcmp.gt.f32.partialorder %v7892_v48, %v7893_v5  ;;  %v2419_v62 = vrot.slane %v2403_v47, %v7029_v43  ;;  %v2426_v40 = vrot.slane %v2410_v49, %v7029_v43 }
 0x30f   : > { %v1942_v44 = vsel %vm7894_vm15, %v1628_v26, %v1917_v41  ;;  %v3604_v4 = vcombine.low %v3582_v17, %v3589_v35  ;;  %v2433_v52 = vrot.slane %v2411_v56, %v7029_v43  ;;  %v2440_v11 = vrot.slane %v2412_v58, %v7029_v43  ;;  %v1918_v41 = vld [vmem:[#allocation3 + $0x88] sm:$0xff] }
 0x310   : > { %1967 = vst.msk [vmem:[#allocation3 + $0x80] sm:$0xff] %vm228_vm2, %v1942_v44  ;;  %4473 = vperm.xlu1 %5264, %v3571_v53   ;;  %v3605_v34 = vcombine.low %v3596_v18, %v3603_v57  ;;  %v2452_v15 = vrot.slane %v1988_v25, %v7029_v43  ;;  %v2459_v37 = vrot.slane %v2445_v33, %v7029_v43  ;;  %v1643_v3 = vcvt.f32.s32 %v1642_v27  ;;  %v1588_v60 = vpop.xlane.xlu1 %1587  ;;  %v7895_v18 = vld [vmem:[#allocation12_spill] sm:$0xff]  ;;  %v7896_v58 = vld [vmem:[#allocation10_spill] sm:$0xff] }
 0x311   : > { %v3612_v54 = vrot.slane %v3604_v4, %v7029_v43  ;;  %v3621_v10 = vcombine.low %v2419_v62, %v2433_v52  ;;  %v4934_v13 = vcombine.high %v2419_v62, %v2433_v52  ;;  %v3623_v30 = vcombine.low %v2426_v40, %v2440_v11  ;;  %v7898_v62 = vld [vmem:[#allocation60_spill] sm:$0xff] }
 0x312   : > { %v3619_v50 = vrot.slane %v3605_v34, %v7029_v43  ;;  %v4935_v29 = vcombine.high %v2426_v40, %v2440_v11  ;;  %v2460_v2 = vcombine.high %v2452_v15, %v2452_v15  ;;  %v2461_v12 = vcombine.high %v2459_v37, %v2459_v37 }
 0x313   : > { %v3631_v7 = vrot.slane %v3621_v10, %v7029_v43  ;;  %v3638_v6 = vrot.slane %v4934_v13, %v7029_v43  ;;  %v3645_v25 = vrot.slane %v3623_v30, %v7029_v43  ;;  %v1589_v8 = vcvt.f32.s32 %v1588_v60  ;;  %v1660_v17 = vpop.xlane.xlu0 %1659  ;;  %v1990_v10 = vld [vmem:[#allocation3 + $0x58] sm:$0xff] }
 0x314   : > { %v3620_v47 = vcombine.low %v3612_v54, %v3619_v50  ;;  %v3652_v63 = vrot.slane %v4935_v29, %v7029_v43  ;;  %v2468_v49 = vrot.slane %v2452_v15, %v7029_v43  ;;  %v2475_v33 = vrot.slane %v2459_v37, %v7029_v43  ;;  %v1916_v30 = vld [vmem:[#allocation3 + $0x78] sm:$0xff] }
 0x315   : > { %v3653_v9 = vcombine.low %v3631_v7, %v3638_v6  ;;  %v1592_v28 = vadd.s32 %v7055_v42, %v1589_v8  ;;  %v2482_v36 = vrot.slane %v2460_v2, %v7029_v43  ;;  %v2489_v46 = vrot.slane %v2461_v12, %v7029_v43 }
 0x316   : > { %4476 = vperm.xlu1 %5264, %v3620_v47   ;;  %v3654_v23 = vcombine.low %v3645_v25, %v3652_v63  ;;  %v1646_v19 = vadd.s32 %v7053_v55, %v1643_v3  ;;  %v2494_v26 = vcombine.high %v1989_v31, %v1989_v31  ;;  %v2501_v56 = vrot.slane %v1989_v31, %v7029_v43  ;;  %v7899_v55 = vld [vmem:[#allocation11_spill] sm:$0xff] }
 0x317   : > { %v3661_v35 = vrot.slane %v3653_v9, %v7029_v43  ;;  %vm7897_vm4 = vcmp.gt.f32.partialorder %v7895_v18, %v7896_v58  ;;  %v3670_v42 = vcombine.low %v2468_v49, %v2482_v36  ;;  %v4936_v57 = vcombine.high %v2468_v49, %v2482_v36  ;;  %v1606_v52 = vpop.xlane.xlu1 %1605  ;;  %v7901_v49 = vld [vmem:[#allocation16_spill] sm:$0xff]  ;;  %v1991_v18 = vld [vmem:[#allocation3 + $0x60] sm:$0xff] }
 0x318   : > { %v1940_v53 = vsel %vm7897_vm4, %v1592_v28, %v1915_v14  ;;  %v3668_v48 = vrot.slane %v3654_v23, %v7029_v43  ;;  %v3672_v5 = vcombine.low %v2475_v33, %v2489_v46  ;;  %v4937_v44 = vcombine.high %v2475_v33, %v2489_v46  ;;  %v7902_v33 = vld [vmem:[#allocation61_spill] sm:$0xff] }
 0x319   : > { %1965 = vst.msk [vmem:[#allocation3 + $0x70] sm:$0xff] %vm228_vm2, %v1940_v53  ;;  %vm7900_vm0 = vcmp.gt.f32.partialorder %v7898_v62, %v7899_v55  ;;  %v3680_v4 = vrot.slane %v3670_v42, %v7029_v43  ;;  %v3687_v40 = vrot.slane %v4936_v57, %v7029_v43  ;;  %v2508_v11 = vrot.slane %v2494_v26, %v7029_v43  ;;  %v7904_v57 = vld [vmem:[#allocation17_spill] sm:$0xff] }
 0x31a   : > { %v1943_v27 = vsel %vm7900_vm0, %v1646_v19, %v1918_v41  ;;  %v2509_v34 = vcombine.high %v2501_v56, %v2501_v56  ;;  %v3669_v15 = vcombine.low %v3661_v35, %v3668_v48  ;;  %v3694_v37 = vrot.slane %v3672_v5, %v7029_v43  ;;  %v1678_v25 = vpop.xlane.xlu0 %1677  ;;  %v7905_v48 = vld [vmem:[#allocation62_spill] sm:$0xff] }
 0x31b   : > { %1968 = vst.msk [vmem:[#allocation3 + $0x88] sm:$0xff] %vm228_vm2, %v1943_v27  ;;  %v3701_v3 = vrot.slane %v4937_v44, %v7029_v43  ;;  %v1607_v54 = vcvt.f32.s32 %v1606_v52  ;;  %v3702_v13 = vcombine.low %v3680_v4, %v3687_v40  ;;  %v2510_v50 = vcombine.high %v2508_v11, %v2508_v11 }
 0x31c   : > { %v2517_v29 = vrot.slane %v2501_v56, %v7029_v43  ;;  %v2524_v60 = vrot.slane %v2508_v11, %v7029_v43  ;;  %4479 = vperm.xlu1 %5264, %v3669_v15   ;;  %v2531_v7 = vrot.slane %v2509_v34, %v7029_v43  ;;  %v1661_v6 = vcvt.f32.s32 %v1660_v17 }
 0x31d   : > { %v3703_v2 = vcombine.low %v3694_v37, %v3701_v3  ;;  %v1610_v12 = vadd.s32 %v7061_v24, %v1607_v54  ;;  %v3710_v8 = vrot.slane %v3702_v13, %v7029_v43  ;;  %v2538_v31 = vrot.slane %v2510_v50, %v7029_v43  ;;  %v1919_v24 = vld [vmem:[#allocation3 + $0x90] sm:$0xff]  ;;  %v1920_v3 = vld [vmem:[#allocation3 + $0x98] sm:$0xff] }
 0x31e   : > { %v2543_v47 = vcombine.high %v1990_v10, %v1990_v10  ;;  %v2550_v63 = vrot.slane %v1990_v10, %v7029_v43  ;;  %vm7903_vm7 = vcmp.gt.f32.partialorder %v7901_v49, %v7902_v33  ;;  %v3719_v28 = vcombine.low %v2517_v29, %v2531_v7  ;;  %v1696_v58 = vpop.xlane.xlu0 %1695 }
 0x31f   : > { %v3717_v14 = vrot.slane %v3703_v2, %v7029_v43  ;;  %v1941_v9 = vsel %vm7903_vm7, %v1610_v12, %v1916_v30  ;;  %v4938_v36 = vcombine.high %v2517_v29, %v2531_v7  ;;  %v3721_v46 = vcombine.low %v2524_v60, %v2538_v31 }
 0x320   : > { %1966 = vst.msk [vmem:[#allocation3 + $0x78] sm:$0xff] %vm228_vm2, %v1941_v9  ;;  %v4939_v41 = vcombine.high %v2524_v60, %v2538_v31  ;;  %v1664_v23 = vadd.s32 %v7059_v21, %v1661_v6  ;;  %v2557_v19 = vrot.slane %v2543_v47, %v7029_v43  ;;  %v3729_v56 = vrot.slane %v3719_v28, %v7029_v43  ;;  %v1992_v6 = vld [vmem:[#allocation3 + $0x68] sm:$0xff]  ;;  %v7907_v47 = vld [vmem:[#allocation9_spill] sm:$0xff] }
 0x321   : > { %v3718_v26 = vcombine.low %v3710_v8, %v3717_v14  ;;  %v3736_v17 = vrot.slane %v4938_v36, %v7029_v43  ;;  %v2558_v35 = vcombine.high %v2550_v63, %v2550_v63  ;;  %v3743_v53 = vrot.slane %v3721_v46, %v7029_v43 }
 0x322   : > { %v3750_v42 = vrot.slane %v4939_v41, %v7029_v43  ;;  %vm7906_vm11 = vcmp.gt.f32.partialorder %v7904_v57, %v7905_v48  ;;  %v2559_v44 = vcombine.high %v2557_v19, %v2557_v19  ;;  %v2566_v62 = vrot.slane %v2550_v63, %v7029_v43  ;;  %v1714_v10 = vpop.xlane.xlu0 %1713  ;;  %v7908_v63 = vld [vmem:[#allocation13_spill] sm:$0xff] }
 0x323   : > { %v1944_v5 = vsel %vm7906_vm11, %v1664_v23, %v1919_v24  ;;  %4482 = vperm.xlu1 %5264, %v3718_v26   ;;  %v3751_v21 = vcombine.low %v3729_v56, %v3736_v17  ;;  %v2573_v55 = vrot.slane %v2557_v19, %v7029_v43  ;;  %v2580_v27 = vrot.slane %v2558_v35, %v7029_v43  ;;  %v1921_v26 = vld [vmem:[#allocation3 + $0xa0] sm:$0xff] }
 0x324   : > { %1969 = vst.msk [vmem:[#allocation3 + $0x90] sm:$0xff] %vm228_vm2, %v1944_v5  ;;  %v3752_v4 = vcombine.low %v3743_v53, %v3750_v42  ;;  %v2587_v40 = vrot.slane %v2559_v44, %v7029_v43  ;;  %v1679_v52 = vcvt.f32.s32 %v1678_v25  ;;  %v2592_v11 = vcombine.high %v1991_v18, %v1991_v18 }
 0x325   : > { %v3759_v34 = vrot.slane %v3751_v21, %v7029_v43  ;;  %v3768_v15 = vcombine.low %v2566_v62, %v2580_v27  ;;  %v4940_v37 = vcombine.high %v2566_v62, %v2580_v27  ;;  %v2599_v54 = vrot.slane %v1991_v18, %v7029_v43  ;;  %v7911_v27 = vld [vmem:[#allocation14_spill] sm:$0xff] }
 0x326   : > { %v3766_v13 = vrot.slane %v3752_v4, %v7029_v43  ;;  %v3770_v30 = vcombine.low %v2573_v55, %v2587_v40  ;;  %v4941_v50 = vcombine.high %v2573_v55, %v2587_v40  ;;  %v1682_v29 = vadd.s32 %v7064_v16, %v1679_v52  ;;  %v1732_v28 = vpop.xlane.xlu0 %1731  ;;  %v7910_v55 = vld [vmem:[#allocation18_spill] sm:$0xff] }
 0x327   : > { %v3778_v60 = vrot.slane %v3768_v15, %v7029_v43  ;;  %v3785_v2 = vrot.slane %v4940_v37, %v7029_v43  ;;  %v2606_v12 = vrot.slane %v2592_v11, %v7029_v43  ;;  %v2607_v7 = vcombine.high %v2599_v54, %v2599_v54  ;;  %v1922_v15 = vld [vmem:[#allocation3 + $0xa8] sm:$0xff] }
 0x328   : > { %v3767_v25 = vcombine.low %v3759_v34, %v3766_v13  ;;  %v3792_v8 = vrot.slane %v3770_v30, %v7029_v43  ;;  %v3799_v31 = vrot.slane %v4941_v50, %v7029_v43  ;;  %vm7909_vm6 = vcmp.gt.f32.partialorder %v7907_v47, %v7908_v63 }
 0x329   : > { %v1945_v14 = vsel %vm7909_vm6, %v1682_v29, %v1920_v3  ;;  %v3800_v49 = vcombine.low %v3778_v60, %v3785_v2  ;;  %v2608_v16 = vcombine.high %v2606_v12, %v2606_v12  ;;  %v2615_v33 = vrot.slane %v2599_v54, %v7029_v43  ;;  %v1995_v60 = vld [vmem:[#allocation3 + $0x80] sm:$0xff] }
 0x32a   : > { %1970 = vst.msk [vmem:[#allocation3 + $0x98] sm:$0xff] %vm228_vm2, %v1945_v14  ;;  %v2622_v9 = vrot.slane %v2606_v12, %v7029_v43  ;;  %4485 = vperm.xlu1 %5264, %v3767_v25   ;;  %v3801_v36 = vcombine.low %v3792_v8, %v3799_v31  ;;  %v2629_v24 = vrot.slane %v2607_v7, %v7029_v43  ;;  %v1697_v46 = vcvt.f32.s32 %v1696_v58  ;;  %v1750_v40 = vpop.xlane.xlu0 %1749  ;;  %v7914_v25 = vld [vmem:[#allocation15_spill] sm:$0xff] }
 0x32b   : > { %v2641_v41 = vcombine.high %v1992_v6, %v1992_v6  ;;  %v3808_v23 = vrot.slane %v3800_v49, %v7029_v43  ;;  %v2636_v19 = vrot.slane %v2608_v16, %v7029_v43  ;;  %v2648_v56 = vrot.slane %v1992_v6, %v7029_v43  ;;  %v7913_v6 = vld [vmem:[#allocation19_spill] sm:$0xff]  ;;  %v1924_v49 = vld [vmem:[#allocation3 + $0xb8] sm:$0xff] }
 0x32c   : > { %v1715_v17 = vcvt.f32.s32 %v1714_v10  ;;  %v3815_v35 = vrot.slane %v3801_v36, %v7029_v43  ;;  %v3817_v18 = vcombine.low %v2615_v33, %v2629_v24  ;;  %v4942_v53 = vcombine.high %v2615_v33, %v2629_v24  ;;  %v1923_v31 = vld [vmem:[#allocation3 + $0xb0] sm:$0xff] }
 0x32d   : > { %v1700_v42 = vadd.s32 %v7066_v32, %v1697_v46  ;;  %v3819_v57 = vcombine.low %v2622_v9, %v2636_v19  ;;  %v4943_v48 = vcombine.high %v2622_v9, %v2636_v19  ;;  %v2655_v5 = vrot.slane %v2641_v41, %v7029_v43  ;;  %v1993_v24 = vld [vmem:[#allocation3 + $0x70] sm:$0xff] }
 0x32e   : > { %v2656_v58 = vcombine.high %v2648_v56, %v2648_v56  ;;  %v3816_v44 = vcombine.low %v3808_v23, %v3815_v35  ;;  %v3827_v21 = vrot.slane %v3817_v18, %v7029_v43  ;;  %v3834_v62 = vrot.slane %v4942_v53, %v7029_v43  ;;  %v1768_v36 = vpop.xlane.xlu0 %1767  ;;  %v7916_v19 = vld [vmem:[#allocation20_spill] sm:$0xff] }
 0x32f   : > { %vm7912_vm1 = vcmp.gt.f32.partialorder %v7910_v55, %v7911_v27  ;;  %v3841_v52 = vrot.slane %v3819_v57, %v7029_v43  ;;  %v3848_v11 = vrot.slane %v4943_v48, %v7029_v43  ;;  %v2657_v32 = vcombine.high %v2655_v5, %v2655_v5 }
 0x330   : > { %v1946_v4 = vsel %vm7912_vm1, %v1700_v42, %v1921_v26  ;;  %v2664_v34 = vrot.slane %v2648_v56, %v7029_v43  ;;  %4488 = vperm.xlu1 %5264, %v3816_v44   ;;  %v3849_v37 = vcombine.low %v3827_v21, %v3834_v62  ;;  %v2671_v3 = vrot.slane %v2655_v5, %v7029_v43 }
 0x331   : > { %1971 = vst.msk [vmem:[#allocation3 + $0xa0] sm:$0xff] %vm228_vm2, %v1946_v4  ;;  %v2678_v54 = vrot.slane %v2656_v58, %v7029_v43  ;;  %v1718_v10 = vadd.s32 %v7069_v61, %v1715_v17  ;;  %v3850_v13 = vcombine.low %v3841_v52, %v3848_v11  ;;  %v2685_v30 = vrot.slane %v2657_v32, %v7029_v43  ;;  %v7919_v11 = vld [vmem:[#allocation22_spill] sm:$0xff] }
 0x332   : > { %v1733_v50 = vcvt.f32.s32 %v1732_v28  ;;  %v1751_v29 = vcvt.f32.s32 %v1750_v40  ;;  %v3857_v2 = vrot.slane %v3849_v37, %v7029_v43  ;;  %vm7915_vm9 = vcmp.gt.f32.partialorder %v7913_v6, %v7914_v25  ;;  %v1996_v40 = vld [vmem:[#allocation3 + $0x88] sm:$0xff] }
 0x333   : > { %v3866_v12 = vcombine.low %v2664_v34, %v2678_v54  ;;  %v4944_v7 = vcombine.high %v2664_v34, %v2678_v54  ;;  %v1947_v8 = vsel %vm7915_vm9, %v1718_v10, %v1922_v15  ;;  %v3864_v47 = vrot.slane %v3850_v13, %v7029_v43 }
 0x334   : > { %v3868_v63 = vcombine.low %v2671_v3, %v2685_v30  ;;  %v4945_v14 = vcombine.high %v2671_v3, %v2685_v30  ;;  %1972 = vst.msk [vmem:[#allocation3 + $0xa8] sm:$0xff] %vm228_vm2, %v1947_v8  ;;  %v1736_v61 = vadd.s32 %v7071_v22, %v1733_v50  ;;  %v1754_v9 = vadd.s32 %v7073_v38, %v1751_v29 }
 0x335   : > { %v3876_v16 = vrot.slane %v3866_v12, %v7029_v43  ;;  %v3883_v33 = vrot.slane %v4944_v7, %v7029_v43  ;;  %v2788_v28 = vcombine.high %v1995_v60, %v1995_v60  ;;  %v3865_v46 = vcombine.low %v3857_v2, %v3864_v47 }
 0x336   : > { %v3890_v41 = vrot.slane %v3868_v63, %v7029_v43  ;;  %v3897_v23 = vrot.slane %v4945_v14, %v7029_v43  ;;  %vm7917_vm10 = vcmp.gt.f32.partialorder %v6731_v59, %v7916_v19  ;;  %vm7918_vm3 = vcmp.gt.f32.partialorder %v6763_v0, %v6748_v20  ;;  %v1925_v20 = vld [vmem:[#allocation3 + $0xc0] sm:$0xff] }
 0x337   : > { %v1948_v26 = vsel %vm7917_vm10, %v1736_v61, %v1923_v31  ;;  %v3898_v22 = vcombine.low %v3876_v16, %v3883_v33  ;;  %v1949_v56 = vsel %vm7918_vm3, %v1754_v9, %v1924_v49  ;;  %v2795_v38 = vrot.slane %v1995_v60, %v7029_v43  ;;  %4491 = vperm.xlu1 %5264, %v3865_v46   ;;  %v1994_v33 = vld [vmem:[#allocation3 + $0x78] sm:$0xff] }
 0x338   : > { %1973 = vst.msk [vmem:[#allocation3 + $0xb0] sm:$0xff] %vm228_vm2, %v1948_v26  ;;  %v2802_v17 = vrot.slane %v2788_v28, %v7029_v43  ;;  %v3899_v35 = vcombine.low %v3890_v41, %v3897_v23  ;;  %1974 = vst.msk [vmem:[#allocation3 + $0xb8] sm:$0xff] %vm228_vm2, %v1949_v56  ;;  %v1769_v18 = vcvt.f32.s32 %v1768_v36  ;;  %v2690_v53 = vcombine.high %v1993_v24, %v1993_v24 }
 0x339   : > { %v2697_v59 = vrot.slane %v1993_v24, %v7029_v43  ;;  %v3906_v42 = vrot.slane %v3898_v22, %v7029_v43  ;;  %v2803_v57 = vcombine.high %v2795_v38, %v2795_v38  ;;  %v2811_v5 = vrot.slane %v2795_v38, %v7029_v43 }
 0x33a   : > { %v2804_v48 = vcombine.high %v2802_v17, %v2802_v17  ;;  %v3913_v0 = vrot.slane %v3899_v35, %v7029_v43  ;;  %v2818_v58 = vrot.slane %v2802_v17, %v7029_v43  ;;  %v1772_v44 = vadd.s32 %v7081_v51, %v1769_v18 }
 0x33b   : > { %v2704_v21 = vrot.slane %v2690_v53, %v7029_v43  ;;  %v2825_v62 = vrot.slane %v2803_v57, %v7029_v43  ;;  %v2705_v27 = vcombine.high %v2697_v59, %v2697_v59  ;;  %v2713_v4 = vrot.slane %v2697_v59, %v7029_v43 }
 0x33c   : > { %v2832_v55 = vrot.slane %v2804_v48, %v7029_v43  ;;  %v3914_v52 = vcombine.low %v3906_v42, %v3913_v0  ;;  %vm7920_vm8 = vcmp.gt.f32.partialorder %v6791_v39, %v7919_v11  ;;  %v2837_v30 = vcombine.high %v1996_v40, %v1996_v40 }
 0x33d   : > { %v1950_v32 = vsel %vm7920_vm8, %v1772_v44, %v1925_v20  ;;  %v2706_v34 = vcombine.high %v2704_v21, %v2704_v21  ;;  %v2720_v15 = vrot.slane %v2704_v21, %v7029_v43  ;;  %v4013_v37 = vcombine.low %v2811_v5, %v2825_v62  ;;  %v1998_v21 = vld [vmem:[#allocation3 + $0x98] sm:$0xff] }
 0x33e   : > { %v4950_v51 = vcombine.high %v2811_v5, %v2825_v62  ;;  %v4015_v3 = vcombine.low %v2818_v58, %v2832_v55  ;;  %v4951_v54 = vcombine.high %v2818_v58, %v2832_v55  ;;  %1975 = vst.msk [vmem:[#allocation3 + $0xc0] sm:$0xff] %vm228_vm2, %v1950_v32  ;;  %4494 = vperm.xlu1 %5264, %v3914_v52   ;;  %v1997_v5 = vld [vmem:[#allocation3 + $0x90] sm:$0xff]  ;;  %vm4538_vm2 = vcmask 130112  }
 0x33f   : > { %v2727_v10 = vrot.slane %v2705_v27, %v7029_v43  ;;  %v2734_v13 = vrot.slane %v2706_v34, %v7029_v43  ;;  %v2844_v50 = vrot.slane %v1996_v40, %v7029_v43  ;;  %v4023_v39 = vrot.slane %v4013_v37, %v7029_v43 }
 0x340   : > { %v4030_v29 = vrot.slane %v4950_v51, %v7029_v43  ;;  %v4037_v60 = vrot.slane %v4015_v3, %v7029_v43  ;;  %v4044_v2 = vrot.slane %v4951_v54, %v7029_v43  ;;  %v2851_v47 = vrot.slane %v2837_v30, %v7029_v43 }
 0x341   : > { %v3915_v12 = vcombine.low %v2713_v4, %v2727_v10  ;;  %v4946_v7 = vcombine.high %v2713_v4, %v2727_v10  ;;  %v3917_v6 = vcombine.low %v2720_v15, %v2734_v13  ;;  %v4947_v25 = vcombine.high %v2720_v15, %v2734_v13 }
 0x342   : > { %v4045_v8 = vcombine.low %v4023_v39, %v4030_v29  ;;  %v4046_v31 = vcombine.low %v4037_v60, %v4044_v2  ;;  %v2852_v63 = vcombine.high %v2844_v50, %v2844_v50  ;;  %v2853_v36 = vcombine.high %v2851_v47, %v2851_v47 }
 0x343   : > { %v3925_v14 = vrot.slane %v3915_v12, %v7029_v43  ;;  %v3932_v61 = vrot.slane %v4946_v7, %v7029_v43  ;;  %v3939_v49 = vrot.slane %v3917_v6, %v7029_v43  ;;  %v3946_v16 = vrot.slane %v4947_v25, %v7029_v43  ;;  %v1999_v6 = vld [vmem:[#allocation3 + $0xa0] sm:$0xff] }
 0x344   : > { %v4053_v9 = vrot.slane %v4045_v8, %v7029_v43  ;;  %v4060_v28 = vrot.slane %v4046_v31, %v7029_v43  ;;  %v2860_v24 = vrot.slane %v2844_v50, %v7029_v43  ;;  %v2867_v23 = vrot.slane %v2851_v47, %v7029_v43 }
 0x345   : > { %v3947_v46 = vcombine.low %v3925_v14, %v3932_v61  ;;  %v3948_v41 = vcombine.low %v3939_v49, %v3946_v16  ;;  %v2874_v19 = vrot.slane %v2852_v63, %v7029_v43  ;;  %v2881_v22 = vrot.slane %v2853_v36, %v7029_v43 }
 0x346   : > { %v4061_v26 = vcombine.low %v4053_v9, %v4060_v28  ;;  %v2739_v56 = vcombine.high %v1994_v33, %v1994_v33  ;;  %v2746_v38 = vrot.slane %v1994_v33, %v7029_v43  ;;  %v2886_v11 = vcombine.high %v1997_v5, %v1997_v5 }
 0x347   : > { %v3955_v17 = vrot.slane %v3947_v46, %v7029_v43  ;;  %v3962_v35 = vrot.slane %v3948_v41, %v7029_v43  ;;  %v4062_v18 = vcombine.low %v2860_v24, %v2874_v19  ;;  %v4952_v53 = vcombine.high %v2860_v24, %v2874_v19 }
 0x348   : > { %4503 = vperm.xlu1 %5264, %v4061_v26   ;;  %v4064_v59 = vcombine.low %v2867_v23, %v2881_v22  ;;  %v4953_v42 = vcombine.high %v2867_v23, %v2881_v22  ;;  %v2753_v57 = vrot.slane %v2739_v56, %v7029_v43  ;;  %v2754_v48 = vcombine.high %v2746_v38, %v2746_v38 }
 0x349   : > { %v3963_v20 = vcombine.low %v3955_v17, %v3962_v35  ;;  %v4072_v0 = vrot.slane %v4062_v18, %v7029_v43  ;;  %v4079_v58 = vrot.slane %v4952_v53, %v7029_v43  ;;  %v2762_v44 = vrot.slane %v2746_v38, %v7029_v43 }
 0x34a   : > { %v4086_v62 = vrot.slane %v4064_v59, %v7029_v43  ;;  %v4093_v55 = vrot.slane %v4953_v42, %v7029_v43  ;;  %v2755_v27 = vcombine.high %v2753_v57, %v2753_v57  ;;  %v2769_v4 = vrot.slane %v2753_v57, %v7029_v43 }
 0x34b   : > { %v4094_v40 = vcombine.low %v4072_v0, %v4079_v58  ;;  %v2776_v52 = vrot.slane %v2754_v48, %v7029_v43  ;;  %v2893_v32 = vrot.slane %v1997_v5, %v7029_v43  ;;  %v2935_v37 = vcombine.high %v1998_v21, %v1998_v21 }
 0x34c   : > { %4497 = vperm.xlu1 %5264, %v3963_v20   ;;  %v4095_v34 = vcombine.low %v4086_v62, %v4093_v55  ;;  %v2783_v15 = vrot.slane %v2755_v27, %v7029_v43  ;;  %v2942_v51 = vrot.slane %v1998_v21, %v7029_v43  ;;  %v2900_v13 = vrot.slane %v2886_v11, %v7029_v43 }
 0x34d   : > { %v4102_v3 = vrot.slane %v4094_v40, %v7029_v43  ;;  %v3964_v54 = vcombine.low %v2762_v44, %v2776_v52  ;;  %v4948_v10 = vcombine.high %v2762_v44, %v2776_v52  ;;  %v2901_v29 = vcombine.high %v2893_v32, %v2893_v32  ;;  %v2000_v40 = vld [vmem:[#allocation3 + $0xa8] sm:$0xff] }
 0x34e   : > { %v4109_v30 = vrot.slane %v4095_v34, %v7029_v43  ;;  %v3966_v50 = vcombine.low %v2769_v4, %v2783_v15  ;;  %v4949_v39 = vcombine.high %v2769_v4, %v2783_v15  ;;  %v2902_v12 = vcombine.high %v2900_v13, %v2900_v13 }
 0x34f   : > { %v3974_v60 = vrot.slane %v3964_v54, %v7029_v43  ;;  %v3981_v2 = vrot.slane %v4948_v10, %v7029_v43  ;;  %v2909_v7 = vrot.slane %v2893_v32, %v7029_v43  ;;  %v2916_v47 = vrot.slane %v2900_v13, %v7029_v43 }
 0x350   : > { %v4110_v25 = vcombine.low %v4102_v3, %v4109_v30  ;;  %v3988_v8 = vrot.slane %v3966_v50, %v7029_v43  ;;  %v3995_v31 = vrot.slane %v4949_v39, %v7029_v43  ;;  %v2923_v14 = vrot.slane %v2901_v29, %v7029_v43 }
 0x351   : > { %v3996_v63 = vcombine.low %v3974_v60, %v3981_v2  ;;  %v2930_v61 = vrot.slane %v2902_v12, %v7029_v43  ;;  %v2949_v49 = vrot.slane %v2935_v37, %v7029_v43  ;;  %v2950_v33 = vcombine.high %v2942_v51, %v2942_v51 }
 0x352   : > { %4506 = vperm.xlu0 %5265, %v4110_v25   ;;  %v3997_v16 = vcombine.low %v3988_v8, %v3995_v31  ;;  %v2958_v9 = vrot.slane %v2942_v51, %v7029_v43  ;;  %v2984_v28 = vcombine.high %v1999_v6, %v1999_v6  ;;  %v4111_v24 = vcombine.low %v2909_v7, %v2923_v14  ;;  %v2001_v25 = vld [vmem:[#allocation3 + $0xb0] sm:$0xff] }
 0x353   : > { %v4004_v36 = vrot.slane %v3996_v63, %v7029_v43  ;;  %v4954_v46 = vcombine.high %v2909_v7, %v2923_v14  ;;  %v4113_v41 = vcombine.low %v2916_v47, %v2930_v61  ;;  %v4955_v19 = vcombine.high %v2916_v47, %v2930_v61  ;;  %v2002_v14 = vld [vmem:[#allocation3 + $0xb8] sm:$0xff] }
 0x354   : > { %v4011_v23 = vrot.slane %v3997_v16, %v7029_v43  ;;  %v2951_v26 = vcombine.high %v2949_v49, %v2949_v49  ;;  %v2965_v22 = vrot.slane %v2949_v49, %v7029_v43  ;;  %v4121_v56 = vrot.slane %v4111_v24, %v7029_v43 }
 0x355   : > { %v4128_v38 = vrot.slane %v4954_v46, %v7029_v43  ;;  %v4135_v17 = vrot.slane %v4113_v41, %v7029_v43  ;;  %v2972_v35 = vrot.slane %v2950_v33, %v7029_v43  ;;  %v4142_v53 = vrot.slane %v4955_v19, %v7029_v43 }
 0x356   : > { %v4012_v18 = vcombine.low %v4004_v36, %v4011_v23  ;;  %v2979_v59 = vrot.slane %v2951_v26, %v7029_v43  ;;  %v2991_v42 = vrot.slane %v1999_v6, %v7029_v43  ;;  %v2998_v20 = vrot.slane %v2984_v28, %v7029_v43 }
 0x357   : > { %v4143_v57 = vcombine.low %v4121_v56, %v4128_v38  ;;  %v4160_v48 = vcombine.low %v2958_v9, %v2972_v35  ;;  %v4956_v5 = vcombine.high %v2958_v9, %v2972_v35  ;;  %v4144_v0 = vcombine.low %v4135_v17, %v4142_v53 }
 0x358   : > { %4500 = vperm.xlu1 %5264, %v4012_v18   ;;  %v4162_v58 = vcombine.low %v2965_v22, %v2979_v59  ;;  %v4957_v44 = vcombine.high %v2965_v22, %v2979_v59  ;;  %v2999_v21 = vcombine.high %v2991_v42, %v2991_v42  ;;  %v3000_v4 = vcombine.high %v2998_v20, %v2998_v20 }
 0x359   : > { %v4151_v62 = vrot.slane %v4143_v57, %v7029_v43  ;;  %v4170_v55 = vrot.slane %v4160_v48, %v7029_v43  ;;  %v4177_v27 = vrot.slane %v4956_v5, %v7029_v43  ;;  %v4158_v52 = vrot.slane %v4144_v0, %v7029_v43  ;;  %v2003_v5 = vld [vmem:[#allocation3 + $0xc0] sm:$0xff] }
 0x35a   : > { %v4184_v11 = vrot.slane %v4162_v58, %v7029_v43  ;;  %v4191_v32 = vrot.slane %v4957_v44, %v7029_v43  ;;  %v3007_v34 = vrot.slane %v2991_v42, %v7029_v43  ;;  %v3014_v37 = vrot.slane %v2998_v20, %v7029_v43 }
 0x35b   : > { %v4192_v15 = vcombine.low %v4170_v55, %v4177_v27  ;;  %v3021_v51 = vrot.slane %v2999_v21, %v7029_v43  ;;  %v3028_v3 = vrot.slane %v3000_v4, %v7029_v43  ;;  %v4159_v54 = vcombine.low %v4151_v62, %v4158_v52 }
 0x35c   : > { %v4193_v10 = vcombine.low %v4184_v11, %v4191_v32  ;;  %v3033_v13 = vcombine.high %v2000_v40, %v2000_v40  ;;  %v3040_v30 = vrot.slane %v2000_v40, %v7029_v43  ;;  %v3082_v36 = vcombine.high %v2001_v25, %v2001_v25 }
 0x35d   : > { %v4200_v50 = vrot.slane %v4192_v15, %v7029_v43  ;;  %v4209_v39 = vcombine.low %v3007_v34, %v3021_v51  ;;  %v4958_v29 = vcombine.high %v3007_v34, %v3021_v51  ;;  %v4211_v60 = vcombine.low %v3014_v37, %v3028_v3  ;;  %4509 = vperm.xlu0 %5265, %v4159_v54  }
 0x35e   : > { %v4207_v2 = vrot.slane %v4193_v10, %v7029_v43  ;;  %v4959_v12 = vcombine.high %v3014_v37, %v3028_v3  ;;  %v3047_v7 = vrot.slane %v3033_v13, %v7029_v43  ;;  %v3048_v6 = vcombine.high %v3040_v30, %v3040_v30 }
 0x35f   : > { %v4219_v8 = vrot.slane %v4209_v39, %v7029_v43  ;;  %v4226_v31 = vrot.slane %v4958_v29, %v7029_v43  ;;  %v4233_v47 = vrot.slane %v4211_v60, %v7029_v43  ;;  %v3056_v63 = vrot.slane %v3040_v30, %v7029_v43 }
 0x360   : > { %v4208_v61 = vcombine.low %v4200_v50, %v4207_v2  ;;  %v4240_v49 = vrot.slane %v4959_v12, %v7029_v43  ;;  %v3049_v16 = vcombine.high %v3047_v7, %v3047_v7  ;;  %v3063_v33 = vrot.slane %v3047_v7, %v7029_v43 }
 0x361   : > { %v4241_v9 = vcombine.low %v4219_v8, %v4226_v31  ;;  %v3070_v28 = vrot.slane %v3048_v6, %v7029_v43  ;;  %v3089_v24 = vrot.slane %v2001_v25, %v7029_v43  ;;  %v3131_v23 = vcombine.high %v2002_v14, %v2002_v14 }
 0x362   : > { %4512 = vperm.xlu0 %5265, %v4208_v61   ;;  %v4242_v46 = vcombine.low %v4233_v47, %v4240_v49  ;;  %v3077_v41 = vrot.slane %v3049_v16, %v7029_v43  ;;  %v3138_v19 = vrot.slane %v2002_v14, %v7029_v43  ;;  %v3096_v38 = vrot.slane %v3082_v36, %v7029_v43 }
 0x363   : > { %v4249_v26 = vrot.slane %v4241_v9, %v7029_v43  ;;  %v4258_v22 = vcombine.low %v3056_v63, %v3070_v28  ;;  %v4960_v56 = vcombine.high %v3056_v63, %v3070_v28  ;;  %v3097_v53 = vcombine.high %v3089_v24, %v3089_v24 }
 0x364   : > { %v4256_v17 = vrot.slane %v4242_v46, %v7029_v43  ;;  %v4260_v35 = vcombine.low %v3063_v33, %v3077_v41  ;;  %v4961_v18 = vcombine.high %v3063_v33, %v3077_v41  ;;  %v3098_v57 = vcombine.high %v3096_v38, %v3096_v38 }
 0x365   : > { %v4268_v59 = vrot.slane %v4258_v22, %v7029_v43  ;;  %v4275_v42 = vrot.slane %v4960_v56, %v7029_v43  ;;  %v3105_v48 = vrot.slane %v3089_v24, %v7029_v43  ;;  %v3112_v44 = vrot.slane %v3096_v38, %v7029_v43 }
 0x366   : > { %v4257_v20 = vcombine.low %v4249_v26, %v4256_v17  ;;  %v4282_v0 = vrot.slane %v4260_v35, %v7029_v43  ;;  %v4289_v58 = vrot.slane %v4961_v18, %v7029_v43  ;;  %v3119_v62 = vrot.slane %v3097_v53, %v7029_v43 }
 0x367   : > { %v4290_v21 = vcombine.low %v4268_v59, %v4275_v42  ;;  %v3126_v55 = vrot.slane %v3098_v57, %v7029_v43  ;;  %v3145_v27 = vrot.slane %v3131_v23, %v7029_v43  ;;  %v3146_v40 = vcombine.high %v3138_v19, %v3138_v19 }
 0x368   : > { %4515 = vperm.xlu0 %5265, %v4257_v20   ;;  %v4291_v4 = vcombine.low %v4282_v0, %v4289_v58  ;;  %v3154_v52 = vrot.slane %v3138_v19, %v7029_v43  ;;  %v3180_v11 = vcombine.high %v2003_v5, %v2003_v5  ;;  %v4307_v34 = vcombine.low %v3105_v48, %v3119_v62 }
 0x369   : > { %v4298_v32 = vrot.slane %v4290_v21, %v7029_v43  ;;  %v4962_v15 = vcombine.high %v3105_v48, %v3119_v62  ;;  %v4309_v37 = vcombine.low %v3112_v44, %v3126_v55  ;;  %v4963_v3 = vcombine.high %v3112_v44, %v3126_v55  ;;  %v4456_v62 = vpop.permute.xlu1 %4455 }
 0x36a   : > { %v4305_v51 = vrot.slane %v4291_v4, %v7029_v43  ;;  %v3147_v54 = vcombine.high %v3145_v27, %v3145_v27  ;;  %v3161_v10 = vrot.slane %v3145_v27, %v7029_v43  ;;  %v4317_v13 = vrot.slane %v4307_v34, %v7029_v43 }
 0x36b   : > { %v4324_v30 = vrot.slane %v4962_v15, %v7029_v43  ;;  %v4331_v50 = vrot.slane %v4309_v37, %v7029_v43  ;;  %v3168_v39 = vrot.slane %v3146_v40, %v7029_v43  ;;  %v4338_v60 = vrot.slane %v4963_v3, %v7029_v43  ;;  %v4459_v15 = vpop.permute.xlu0 %4458 }
 0x36c   : > { %v4306_v29 = vcombine.low %v4298_v32, %v4305_v51  ;;  %v3175_v2 = vrot.slane %v3147_v54, %v7029_v43  ;;  %v3187_v12 = vrot.slane %v2003_v5, %v7029_v43  ;;  %v3194_v8 = vrot.slane %v3180_v11, %v7029_v43 }
 0x36d   : > { %v4339_v7 = vcombine.low %v4317_v13, %v4324_v30  ;;  %v4356_v6 = vcombine.low %v3154_v52, %v3168_v39  ;;  %v4964_v25 = vcombine.high %v3154_v52, %v3168_v39  ;;  %v4340_v31 = vcombine.low %v4331_v50, %v4338_v60 }
 0x36e   : > { %4518 = vperm.xlu0 %5265, %v4306_v29   ;;  %v4358_v47 = vcombine.low %v3161_v10, %v3175_v2  ;;  %v4965_v63 = vcombine.high %v3161_v10, %v3175_v2  ;;  %v3195_v14 = vcombine.high %v3187_v12, %v3187_v12  ;;  %v3196_v33 = vcombine.high %v3194_v8, %v3194_v8 }
 0x36f   : > { %v4347_v61 = vrot.slane %v4339_v7, %v7029_v43  ;;  %v4366_v49 = vrot.slane %v4356_v6, %v7029_v43  ;;  %v4373_v16 = vrot.slane %v4964_v25, %v7029_v43  ;;  %v4354_v9 = vrot.slane %v4340_v31, %v7029_v43  ;;  %v4462_v55 = vpop.permute.xlu1 %4461 }
 0x370   : > { %v4380_v28 = vrot.slane %v4358_v47, %v7029_v43  ;;  %v4387_v36 = vrot.slane %v4965_v63, %v7029_v43  ;;  %v3203_v24 = vrot.slane %v3187_v12, %v7029_v43  ;;  %v3210_v41 = vrot.slane %v3194_v8, %v7029_v43 }
 0x371   : > { %v4388_v46 = vcombine.low %v4366_v49, %v4373_v16  ;;  %v3217_v23 = vrot.slane %v3195_v14, %v7029_v43  ;;  %v3224_v19 = vrot.slane %v3196_v33, %v7029_v43  ;;  %v4355_v26 = vcombine.low %v4347_v61, %v4354_v9 }
 0x372   : > { %v4389_v22 = vcombine.low %v4380_v28, %v4387_v36  ;;  %v4533_v10 = vadd.s32 4294967288, %v6160_v1  ;;  %v4540_v30 = vadd.s32 4294967280, %v6160_v1  ;;  %v4547_v50 = vadd.s32 4294967272, %v6160_v1 }
 0x373   : > { %v4405_v56 = vcombine.low %v3203_v24, %v3217_v23  ;;  %v4966_v38 = vcombine.high %v3203_v24, %v3217_v23  ;;  %v4407_v17 = vcombine.low %v3210_v41, %v3224_v19  ;;  %4521 = vperm.xlu0 %5265, %v4355_v26   ;;  %v4396_v35 = vrot.slane %v4388_v46, %v7029_v43 }
 0x374   : > { %v4403_v18 = vrot.slane %v4389_v22, %v7029_v43  ;;  %v4967_v53 = vcombine.high %v3210_v41, %v3224_v19  ;;  %v7512_v29 = vsub.s32 %v4533_v10, %v7859_v45  ;;  %v7516_v60 = vsub.s32 %v6160_v1, %v7859_v45 }
 0x375   : > { %v4415_v59 = vrot.slane %v4405_v56, %v7029_v43  ;;  %v4422_v42 = vrot.slane %v4966_v38, %v7029_v43  ;;  %v4429_v57 = vrot.slane %v4407_v17, %v7029_v43  ;;  %v7519_v2 = vsub.s32 %v4540_v30, %v7859_v45 }
 0x376   : > { %v4404_v48 = vcombine.low %v4396_v35, %v4403_v18  ;;  %v4436_v5 = vrot.slane %v4967_v53, %v7029_v43  ;;  %v4465_v27 = vpop.permute.xlu1 %4464  ;;  %v7522_v12 = vsub.s32 %v4547_v50, %v7859_v45  ;;  %v4537_v6 = vrot.slane %v4459_v15, %v7512_v29 }
 0x377   : > { %v4437_v20 = vcombine.low %v4415_v59, %v4422_v42  ;;  %v4554_v25 = vadd.s32 4294967264, %v6160_v1  ;;  %v4561_v8 = vadd.s32 4294967256, %v6160_v1  ;;  %v4532_v47 = vrot.slane %v4456_v62, %v7516_v60 }
 0x378   : > { %4524 = vperm.xlu0 %5265, %v4404_v48   ;;  %v4438_v0 = vcombine.low %v4429_v57, %v4436_v5  ;;  %v4544_v63 = vrot.slane %v4462_v55, %v7519_v2  ;;  %v4551_v14 = vrot.slane %v4465_v27, %v7522_v12  ;;  %v4568_v61 = vadd.s32 4294967248, %v6160_v1 }
 0x379   : > { %v4445_v58 = vrot.slane %v4437_v20, %v7029_v43  ;;  %v4539_v49 = vsel %vm4538_vm2, %v4537_v6, %v4532_v47  ;;  %vm4552_vm12 = vcmask 261312   ;;  %vm4559_vm13 = vcmask 326912  }
 0x37a   : > { %v4452_v44 = vrot.slane %v4438_v0, %v7029_v43  ;;  %v4575_v16 = vadd.s32 4294967240, %v6160_v1  ;;  %v7538_v33 = vsub.s32 %v4554_v25, %v7859_v45  ;;  %v7541_v9 = vsub.s32 %v4561_v8, %v7859_v45 }
 0x37b   : > { %vm4566_vm14 = vcmask 392512   ;;  %v4582_v28 = vadd.s32 4294967232, %v6160_v1  ;;  %v4546_v46 = vsel %vm4545_vm5, %v4544_v63, %v4539_v49  ;;  %vm4573_vm15 = vcmask 458112  }
 0x37c   : > { %v4453_v21 = vcombine.low %v4445_v58, %v4452_v44  ;;  %vm4580_vm4 = vcmask 523712   ;;  %v4589_v41 = vadd.s32 4294967224, %v6160_v1  ;;  %v4553_v23 = vsel %vm4552_vm12, %v4551_v14, %v4546_v46 }
 0x37d   : > { %v7484_v4 = vpop.permute.xlu1 %4467  ;;  %v7550_v19 = vsub.s32 %v4568_v61, %v7859_v45  ;;  %v4596_v26 = vadd.s32 4294967216, %v6160_v1  ;;  %v4603_v22 = vadd.s32 4294967208, %v6160_v1  ;;  %v7555_v56 = vsub.s32 %v4575_v16, %v7859_v45 }
 0x37e   : > { %4527 = vperm.xlu0 %5265, %v4453_v21   ;;  %vm4587_vm0 = vcmask 589312   ;;  %vm4594_vm7 = vcmask 654912   ;;  %v4610_v38 = vadd.s32 4294967200, %v6160_v1  ;;  %v4558_v17 = vrot.slane %v7484_v4, %v7538_v33 }
 0x37f   : > { %v7561_v35 = vsub.s32 %v4582_v28, %v7859_v45  ;;  %vm4601_vm11 = vcmask 720512   ;;  %v4617_v18 = vadd.s32 4294967192, %v6160_v1  ;;  %v4592_v59 = vsub.s32 %v4589_v41, %v7859_v45 }
 0x380   : > { %vm4608_vm6 = vcmask 786112   ;;  %v4624_v42 = vadd.s32 4294967184, %v6160_v1  ;;  %v4599_v48 = vsub.s32 %v4596_v26, %v7859_v45  ;;  %v4606_v5 = vsub.s32 %v4603_v22, %v7859_v45 }
 0x381   : > { %vm4615_vm1 = vcmask 851712   ;;  %v4613_v44 = vsub.s32 %v4610_v38, %v7859_v45  ;;  %vm4622_vm9 = vcmask 917312   ;;  %v4631_v21 = vadd.s32 4294967176, %v6160_v1 }
 0x382   : > { %v4560_v62 = vsel %vm4559_vm13, %v4558_v17, %v4553_v23  ;;  %v4620_v27 = vsub.s32 %v4617_v18, %v7859_v45  ;;  %vm4629_vm10 = vcmask 982912   ;;  %vm4636_vm3 = vcmask 1048512  }
 0x383   : > { %v7921_v26 = vlaneseq }
 0x384   : > { %v7486_v40 = vpop.permute.xlu1 %4470 }
 0x385   : > { %v4565_v53 = vrot.slane %v7486_v40, %v7541_v9  ;;  %vm4699_vm8 = vcmp.lt.s32.totalorder %v7921_v26, 200 }
 0x387   : > { %v4567_v40 = vsel %vm4566_vm14, %v4565_v53, %v4560_v62 }
 0x38b   : > { %v7488_v52 = vpop.permute.xlu1 %4473 }
 0x38c   : > { %v4572_v57 = vrot.slane %v7488_v52, %v7550_v19 }
 0x38e   : > { %v4574_v15 = vsel %vm4573_vm15, %v4572_v57, %v4567_v40 }
 0x391   : > { %v7490_v11 = vpop.permute.xlu1 %4476 }
 0x392   : > { %v4579_v58 = vrot.slane %v7490_v11, %v7555_v56  ;;  %v4627_v11 = vsub.s32 %v4624_v42, %v7859_v45 }
 0x394   : > { %v4581_v50 = vsel %vm4580_vm4, %v4579_v58, %v4574_v15 }
 0x397   : > { %v7492_v32 = vpop.permute.xlu1 %4479 }
 0x398   : > { %v4586_v55 = vrot.slane %v7492_v32, %v7561_v35 }
 0x39e   : > { %v7494_v34 = vpop.permute.xlu1 %4482 }
 0x39f   : > { %v4593_v52 = vrot.slane %v7494_v34, %v4592_v59 }
 0x3a5   : > { %v7496_v37 = vpop.permute.xlu1 %4485 }
 0x3a6   : > { %v4600_v10 = vrot.slane %v7496_v37, %v4599_v48 }
 0x3ab   : > { %v7500_v3 = vpop.permute.xlu1 %4488 }
 0x3ac   : > { %v4607_v34 = vrot.slane %v7500_v3, %v4606_v5 }
 0x3b2   : > { %v7509_v39 = vpop.permute.xlu1 %4491 }
 0x3b9   : > { %v7529_v31 = vpop.permute.xlu1 %4494 }
 0x3ba   : > { %v4621_v3 = vrot.slane %v7529_v31, %v4620_v27 }
 0x3c3   : > { %v4504_v36 = vpop.permute.xlu1 %4503 }
 0x3c4   : > { %v4641_v32 = vrot.slane %v4504_v36, %v7516_v60 }
 0x3c7   : > { %v4498_v20 = vpop.permute.xlu1 %4497 }
 0x3c8   : > { %v4628_v8 = vrot.slane %v4498_v20, %v4627_v11 }
 0x3cd   : > { %v7498_v51 = vpop.permute.xlu0 %4506 }
 0x3ce   : > { %v4645_v4 = vrot.slane %v7498_v51, %v7512_v29  ;;  %v4634_v29 = vsub.s32 %v4631_v21, %v7859_v45 }
 0x3d0   : > { %v4646_v37 = vsel %vm4538_vm2, %v4645_v4, %v4641_v32 }
 0x3d3   : > { %v4501_v60 = vpop.permute.xlu1 %4500 }
 0x3d4   : > { %v4635_v14 = vrot.slane %v4501_v60, %v4634_v29 }
 0x3d8   : > { %v7502_v54 = vpop.permute.xlu0 %4509 }
 0x3d9   : > { %v4650_v1 = vrot.slane %v7502_v54, %v7519_v2  ;;  %v4588_v54 = vsel %vm4587_vm0, %v4586_v55, %v4581_v50  ;;  %v4614_v2 = vrot.slane %v7509_v39, %v4613_v44 }
 0x3db   : > { %v4651_v45 = vsel %vm4545_vm5, %v4650_v1, %v4646_v37 }
 0x3dd   : > { %v7505_v13 = vpop.permute.xlu0 %4512 }
 0x3de   : > { %v4655_v30 = vrot.slane %v7505_v13, %v7522_v12  ;;  %v4595_v12 = vsel %vm4594_vm7, %v4593_v52, %v4588_v54 }
 0x3df   : > { %v4602_v25 = vsel %vm4601_vm11, %v4600_v10, %v4595_v12 }
 0x3e0   : > { %v4656_v39 = vsel %vm4552_vm12, %v4655_v30, %v4651_v45  ;;  %v4609_v63 = vsel %vm4608_vm6, %v4607_v34, %v4602_v25 }
 0x3e1   : > { %v4616_v31 = vsel %vm4615_vm1, %v4614_v2, %v4609_v63 }
 0x3e3   : > { %v7524_v7 = vpop.permute.xlu0 %4515 }
 0x3e4   : > { %v4660_v6 = vrot.slane %v7524_v7, %v7538_v33  ;;  %v4623_v33 = vsel %vm4622_vm9, %v4621_v3, %v4616_v31 }
 0x3e5   : > { %v4630_v36 = vsel %vm4629_vm10, %v4628_v8, %v4623_v33 }
 0x3e6   : > { %v4661_v61 = vsel %vm4559_vm13, %v4660_v6, %v4656_v39  ;;  %v4637_v46 = vsel %vm4636_vm3, %v4635_v14, %v4630_v36 }
 0x3e9   : > { %v7544_v24 = vpop.permute.xlu0 %4518 }
 0x3ea   : > { %v4665_v13 = vrot.slane %v7544_v24, %v7541_v9 }
 0x3ec   : > { %v4666_v49 = vsel %vm4566_vm14, %v4665_v13, %v4661_v61 }
 0x3ee   : > { %v4522_v0 = vpop.permute.xlu0 %4521 }
 0x3ef   : > { %v4670_v7 = vrot.slane %v4522_v0, %v7550_v19 }
 0x3f1   : > { %v4671_v9 = vsel %vm4573_vm15, %v4670_v7, %v4666_v49 }
 0x3f3   : > { %v4525_v51 = vpop.permute.xlu0 %4524 }
 0x3f4   : > { %v4675_v47 = vrot.slane %v4525_v51, %v7555_v56 }
 0x3f6   : > { %v4676_v24 = vsel %vm4580_vm4, %v4675_v47, %v4671_v9 }
 0x3f9   : > { %v4528_v16 = vpop.permute.xlu0 %4527 }
 0x3fa   : > { %v4680_v28 = vrot.slane %v4528_v16, %v7561_v35 }
 0x3fc   : > { %v4681_v41 = vsel %vm4587_vm0, %v4680_v28, %v4676_v24 }
 0x3fd   : > { %v4682_v23 = vcombine.low %v4637_v46, %v4681_v41 }
 0x3ff   : > { %v4689_v19 = vrot.slane %v4682_v23, %v7029_v43 }
 0x401   : > { %v4696_v22 = vrot.slane %v4689_v19, %v7029_v43 }
 0x403   : > { %4701 = vst.msk [vmem:[%s206_s7] sm:$0x3] %vm4699_vm8, %v4696_v22 }
 0x404   : > { %5304 = shalt.err (!%p5301_p5)
}
 0x405   : > { %s5305_s26 = scalar_lea.hbm %s4715_s5, 32  ;;  %s5309_s18 = scalar_lea.hbm %s7667_s3, 64 }
 0x406   : > { %p5306_p6 = scmp.ne.s32.totalorder %s4715_s5, %s5305_s26  ;;  %p5310_p10 = scmp.lt.s32.totalorder %s4715_s5, %s7667_s3 }
 0x407   : > { %p5311_p11 = scmp.lt.s32.totalorder %s5309_s18, %s5305_s26 }
 0x408   : > { %p5307_p7 = pnand %p5306_p6, %p5435_p4 }
 0x409   : > { %p5312_p12 = por %p5311_p11, %p5310_p10 }
 0x40a   : > { %p5308_p9 = pneg %p5307_p7 }
 0x40c   : > { %p5313_p13 = pnand %p5312_p12, %p5308_p9 }
 0x40e   : > { %5316 = shalt.err (!%p5313_p13)
}
 0x40f   : > { %5204 = dma.vmem_to_hbm [thread:$0]  (%p5435_p4), %s4718_s8, 32, %s4715_s5, %s4703_s11  }
 0x410 PF: > { %p5210_p0 = scmp.ge.s32.totalorder %s5367_s17, 2  ;;  %s4729_s4 = sand.u32 1, %s5347_s12  }
 0x411   : > { %s4730_s6 = scalar_lea.sflag [#allocation5], %s4729_s4 }
 0x412   : > { %p5207_p1 = pnand %p5210_p0, %p5442_p8 }
 0x414   : > { %p5208_p2 = pneg %p5207_p1 }
 0x416   : > { %5342 = dma.done.wait (%p5208_p2), %s4730_s6, 32  }
 0x417   : > { %5344 = vsyncadd (%p5208_p2), %s4730_s6, 4294967264  ;;  %s16_s17 = sadd.s32 1, %s5367_s17   ;;  %s7922_s12 = smov %s5351_s13 }
 0x418   : > { %p13_p3 = scmp.ge.s32.totalorder %s16_s17, 4   ;;  %s7923_s13 = smov %s5355_s14 }
 0x419   : > { %s7924_s14 = smov %s5448_s25  ;;  %s7925_s15 = smov %s5363_s16 }
 0x41a   : > { %s7926_s16 = smov %s7928_s20  ;;  %15 = sbr.rel (!%p13_p3) target bundleno = 4 (0x4), region = 81 }
 0x41f   :  { %4735 = vsyncpa [#allocation5], 1 }
 0x420   :  { %4737 = vsyncpa [#allocation5 + $0x1], 1 }

</bundles_post_ra>
